<compile_context>
chip_gen: v6e
topology: v6e:2x2x1
jax: 0.10.0
libtpu: 0.0.40
codegen_flags: <defaults>
</compile_context>

<pallas_src>
import functools

import jax
import jax.numpy as jnp
from jax.experimental import pallas as pl
from jax.experimental.pallas import tpu as pltpu


def _round_up(a, m):
    return ((a + m - 1) // m) * m


# ---------------------------------------------------------------------------
# In-kernel helpers
# ---------------------------------------------------------------------------
def _layernorm(x, g, b, eps=1e-5):
    mu = jnp.mean(x, axis=-1, keepdims=True)
    var = jnp.mean((x - mu) ** 2, axis=-1, keepdims=True)
    return (x - mu) * jax.lax.rsqrt(var + eps) * g + b


# ---------------------------------------------------------------------------
# Fused kernel: embed + L encoder blocks + final LNs + classifier
# ---------------------------------------------------------------------------
def vit_kernel(patches_ref, pw_ref, posb_ref,
               ln1g_ref, ln1b_ref, wv_ref, bv_ref,
               ln2g_ref, ln2b_ref, w1_ref, b1f_ref, w2_ref, b2f_ref,
               encg_ref, encb_ref, fing_ref, finb_ref,
               cw1_ref, cb1_ref, cw2_ref, cb2_ref,
               out_ref, *, B, S, S_pad, E, L, mm_dtype):
    # bf16 (or f32) operands, f32 MXU accumulation
    def mm(a, b):
        return jnp.dot(a.astype(mm_dtype), b.astype(mm_dtype),
                       preferred_element_type=jnp.float32)

    def bmm(eq, a, b):
        return jnp.einsum(eq, a.astype(mm_dtype), b.astype(mm_dtype),
                          preferred_element_type=jnp.float32)

    # ---- patch embedding + cls token + positional embedding ---------------
    # Patch row layout per image (prepared in the wrapper):
    #   row 0            : zeros       (cls slot)
    #   rows 1..N        : patch pixels
    #   rows N+1..S_pad-1: zeros       (padding; masked as keys below)
    # posb fuses cls_token + conv bias + pos embedding per row, so the whole
    # embed layer is one matmul + one broadcast add (no partial stores).
    x = mm(patches_ref[...], pw_ref[...]).reshape(B, S_pad, E) + posb_ref[...][None]

    # padded key tokens never receive attention weight
    key_valid = jax.lax.broadcasted_iota(jnp.int32, (1, 1, S_pad), 2) < S

    for l in range(L):   # L is small; switch to lax.fori_loop if L grows large
        # --- attention branch on norm1(x) ---------------------------------
        h = _layernorm(x, ln1g_ref[l], ln1b_ref[l])
        v = (mm(h.reshape(B * S_pad, E), wv_ref[l]) + bv_ref[l]).reshape(B, S_pad, E)
        # F.normalize(bat) via rsqrt (EUP)
        hn = h * jax.lax.rsqrt(jnp.maximum(jnp.sum(h * h, -1, keepdims=True), 1e-24))
        # TODO(synk): qiskit EstimatorQNN attention replaced by classical
        # cosine similarity of the normalized token pairs (no Pallas equivalent).
        hn_t = jnp.swapaxes(hn, 1, 2)            # transpose once, standard dot layout
        scores = bmm('bsd,bdt->bst', hn, hn_t)   # (B, S_pad, S_pad), cos-sim in [-1,1]
        # bounded scores -> no max-subtraction needed, exp cannot overflow
        e = jnp.where(key_valid, jnp.exp(scores), 0.0)
        attn = e * pl.reciprocal(jnp.sum(e, axis=-1, keepdims=True), approx=True)
        x = x + bmm('bst,btd->bsd', attn, v)

        # --- MLP branch on norm2(x) ----------------------------------------
        h2 = _layernorm(x, ln2g_ref[l], ln2b_ref[l]).reshape(B * S_pad, E)
        z = mm(h2, w1_ref[l]) + b1f_ref[l]
        z = jax.nn.gelu(z, approximate=True)     # tanh GELU -> EUP (tiny delta vs erf)
        z = mm(z, w2_ref[l]) + b2f_ref[l]
        x = x + z.reshape(B, S_pad, E)

    # ---- head: LayerNorms + classifier, applied to the CLS row only -------
    cls_tok = x[:, 0:1, :].reshape(B, E)
    c = _layernorm(cls_tok, encg_ref[...], encb_ref[...])   # LN at end of Sequential
    c = _layernorm(c, fing_ref[...], finb_ref[...])         # self.norm
    hc = jnp.tanh(mm(c, cw1_ref[...]) + cb1_ref[...])
    out_ref[...] = mm(hc, cw2_ref[...]) + cb2_ref[...]


# ---------------------------------------------------------------------------
# Wrapper: single pallas_call, batch-chunk grid, weights VMEM-resident
# ---------------------------------------------------------------------------
def vit_forward(x_nchw, params, args, *, b_chunk=None, mm_dtype=jnp.bfloat16):
    B, C, H, W = x_nchw.shape
    P, E = args['patch_size'], args['embed_dim']
    Hp, Wp = H // P, W // P
    N = Hp * Wp
    S = N + 1
    S_pad = _round_up(S, 8)                     # sublane-friendly token axis
    CPP = C * P * P
    L = args['n_layers']
    NC = args['n_classes']
    NC_pad = _round_up(NC, 128)                 # lane-dense classifier output

    # Batch chunking: each grid step handles b_chunk images so the matmul M
    # dimension (b_chunk * S_pad) is a healthy MXU tile; aim b_chunk*S_pad>=256.
    # VMEM per step is tiny here (~weights + b_chunk*S_pad*(CPP+4E) bytes), so
    # no vmem_limit_bytes override is needed; revisit if b_chunk grows into the
    # thousands on v7x (64 MiB physical VMEM).
    if b_chunk is None:
        target = max(8, _round_up(-(-256 // S_pad), 8))
        b_chunk = B if B <= target else target
    B_pad = _round_up(B, b_chunk)
    n_chunks = B_pad // b_chunk

    # Patch extraction == Conv2d(k=P, s=P) as a matmul.  Row 0 of each image is
    # a zero "cls slot", rows S..S_pad-1 are zero padding.
    patches = x_nchw.reshape(B, C, Hp, P, Wp, P).transpose(0, 2, 4, 1, 3, 5)
    patches = patches.reshape(B, N, CPP)
    patches = jnp.pad(patches, ((0, B_pad - B), (1, S_pad - S), (0, 0)))
    patches = patches.reshape(B_pad * S_pad, CPP).astype(mm_dtype)

    # Fused per-row bias: cls token + conv bias + positional embedding.
    posb = jnp.zeros((S_pad, E), jnp.float32)
    posb = posb.at[0].set(params['cls'][0] + params['pos'][0])
    posb = posb.at[1:S].set(params['pos'][1:] + params['patch_b'][0])

    cw2 = jnp.pad(params['cls_w2'], ((0, 0), (0, NC_pad - NC)))
    cb2 = jnp.pad(params['cls_b2'], ((0, 0), (0, NC_pad - NC)))

    wcast = lambda a: a.astype(mm_dtype)        # matmul operands; f32 accumulation

    weights = (wcast(params['patch_w']), posb,
               params['ln1_g'], params['ln1_b'],
               wcast(params['wv']), params['bv'],
               params['ln2_g'], params['ln2_b'],
               wcast(params['w1']), params['b1'],
               wcast(params['w2']), params['b2'],
               params['enc_ln_g'], params['enc_ln_b'],
               params['final_ln_g'], params['final_ln_b'],
               wcast(params['cls_w1']), params['cls_b1'],
               wcast(cw2), cb2)

    def resident(a):   # full array, constant block index -> stays in VMEM across steps
        nd = a.ndim
        return pl.BlockSpec(a.shape, lambda i, _n=nd: (0,) * _n)

    kern = functools.partial(vit_kernel, B=b_chunk, S=S, S_pad=S_pad, E=E, L=L,
                             mm_dtype=mm_dtype)

    out = pl.pallas_call(
        kern,
        out_shape=jax.ShapeDtypeStruct((B_pad, NC_pad), jnp.float32),
        grid=(n_chunks,),
        in_specs=[pl.BlockSpec((b_chunk * S_pad, CPP), lambda i: (i, 0))]
                 + [resident(a) for a in weights],
        out_specs=pl.BlockSpec((b_chunk, NC_pad), lambda i: (i, 0)),
        compiler_params=pltpu.CompilerParams(
            dimension_semantics=("parallel",)),   # v7x: chunks split across 2 TCs
    )(patches, *weights)
    return out[:B, :NC]


# ---------------------------------------------------------------------------
# Deterministic parameter construction (per-layer weights stacked on axis 0)
# ---------------------------------------------------------------------------
def init_params(key, args):
    E, C, P = args['embed_dim'], args['n_channels'], args['patch_size']
    N = (args['img_size'] // P) ** 2
    S = N + 1
    F = E * args['forward_mul']
    NC = args['n_classes']
    L = args['n_layers']

    keys = iter(jax.random.split(key, 16 + 8 * L))

    def nrm(shape, scale=0.02):
        return (scale * jax.random.normal(next(keys), shape)).astype(jnp.float32)

    def stack(fn):
        return jnp.stack([fn() for _ in range(L)], axis=0)

    params = {
        # EmbedLayer: Conv2d(C, E, k=P, s=P) flattened to (C*P*P, E)
        'patch_w': nrm((C * P * P, E)),
        'patch_b': nrm((1, E)),
        'cls': jax.random.uniform(next(keys), (1, E), jnp.float32),   # torch.rand
        'pos': jax.random.uniform(next(keys), (S, E), jnp.float32),   # torch.rand
        # Encoder layers (stacked: leading axis = layer index)
        'ln1_g': jnp.ones((L, 1, E), jnp.float32),
        'ln1_b': jnp.zeros((L, 1, E), jnp.float32),
        'wv': stack(lambda: nrm((E, E))), 'bv': stack(lambda: nrm((1, E))),
        'ln2_g': jnp.ones((L, 1, E), jnp.float32),
        'ln2_b': jnp.zeros((L, 1, E), jnp.float32),
        'w1': stack(lambda: nrm((E, F))), 'b1': stack(lambda: nrm((1, F))),
        'w2': stack(lambda: nrm((F, E))), 'b2': stack(lambda: nrm((1, E))),
        # LayerNorm at end of encoder Sequential + model-level norm
        'enc_ln_g': jnp.ones((1, E), jnp.float32),
        'enc_ln_b': jnp.zeros((1, E), jnp.float32),
        'final_ln_g': jnp.ones((1, E), jnp.float32),
        'final_ln_b': jnp.zeros((1, E), jnp.float32),
        # Classifier
        'cls_w1': nrm((E, E)), 'cls_b1': nrm((1, E)),
        'cls_w2': nrm((E, NC)), 'cls_b2': nrm((1, NC)),
    }
    return params


if __name__ == "__main__":
    args = dict(img_size=16, patch_size=4, n_channels=4, embed_dim=32,
                n_attention_heads=1, forward_mul=2, n_layers=2, n_classes=10)

    key = jax.random.PRNGKey(0)
    kx, kp = jax.random.split(key)
    x = jax.random.normal(
        kx, (2, args['n_channels'], args['img_size'], args['img_size']),
        dtype=jnp.float32)                                  # NCHW, like PyTorch
    params = init_params(kp, args)

    logits = vit_forward(x, params, args)
    logits = jax.block_until_ready(logits)
    assert logits.shape == (2, args['n_classes']), logits.shape
    assert bool(jnp.all(jnp.isfinite(logits)))
    print("KERNEL_OK")
</pallas_src>

<mosaic_0001>
module attributes {stable_mosaic.version = 11 : i64} {
  func.func @vit_kernel(%arg0: i32, %arg1: memref<48x64xbf16, #tpu.memory_space<vmem>>, %arg2: memref<64x32xbf16, #tpu.memory_space<vmem>>, %arg3: memref<24x32xf32, #tpu.memory_space<vmem>>, %arg4: memref<2x1x32xf32, #tpu.memory_space<vmem>>, %arg5: memref<2x1x32xf32, #tpu.memory_space<vmem>>, %arg6: memref<2x32x32xbf16, #tpu.memory_space<vmem>>, %arg7: memref<2x1x32xf32, #tpu.memory_space<vmem>>, %arg8: memref<2x1x32xf32, #tpu.memory_space<vmem>>, %arg9: memref<2x1x32xf32, #tpu.memory_space<vmem>>, %arg10: memref<2x32x64xbf16, #tpu.memory_space<vmem>>, %arg11: memref<2x1x64xf32, #tpu.memory_space<vmem>>, %arg12: memref<2x64x32xbf16, #tpu.memory_space<vmem>>, %arg13: memref<2x1x32xf32, #tpu.memory_space<vmem>>, %arg14: memref<1x32xf32, #tpu.memory_space<vmem>>, %arg15: memref<1x32xf32, #tpu.memory_space<vmem>>, %arg16: memref<1x32xf32, #tpu.memory_space<vmem>>, %arg17: memref<1x32xf32, #tpu.memory_space<vmem>>, %arg18: memref<32x32xbf16, #tpu.memory_space<vmem>>, %arg19: memref<1x32xf32, #tpu.memory_space<vmem>>, %arg20: memref<32x128xbf16, #tpu.memory_space<vmem>>, %arg21: memref<1x128xf32, #tpu.memory_space<vmem>>, %arg22: memref<2x128xf32, #tpu.memory_space<vmem>>) attributes {dimension_semantics = [#tpu.dimension_semantics<parallel>], iteration_bounds = array<i64: 1>, scalar_prefetch = 0 : i64, scratch_operands = 0 : i64, tpu.core_type = #tpu.core_type<tc>, window_params = [{transform_indices = @transform_0, window_bounds = array<i64: 48, 64>}, {pipeline_mode = #tpu.pipeline_mode<synchronous>, transform_indices = @transform_1, window_bounds = array<i64: 64, 32>}, {pipeline_mode = #tpu.pipeline_mode<synchronous>, transform_indices = @transform_2, window_bounds = array<i64: 24, 32>}, {pipeline_mode = #tpu.pipeline_mode<synchronous>, transform_indices = @transform_3, window_bounds = array<i64: 2, 1, 32>}, {pipeline_mode = #tpu.pipeline_mode<synchronous>, transform_indices = @transform_4, window_bounds = array<i64: 2, 1, 32>}, {pipeline_mode = #tpu.pipeline_mode<synchronous>, transform_indices = @transform_5, window_bounds = array<i64: 2, 32, 32>}, {pipeline_mode = #tpu.pipeline_mode<synchronous>, transform_indices = @transform_6, window_bounds = array<i64: 2, 1, 32>}, {pipeline_mode = #tpu.pipeline_mode<synchronous>, transform_indices = @transform_7, window_bounds = array<i64: 2, 1, 32>}, {pipeline_mode = #tpu.pipeline_mode<synchronous>, transform_indices = @transform_8, window_bounds = array<i64: 2, 1, 32>}, {pipeline_mode = #tpu.pipeline_mode<synchronous>, transform_indices = @transform_9, window_bounds = array<i64: 2, 32, 64>}, {pipeline_mode = #tpu.pipeline_mode<synchronous>, transform_indices = @transform_10, window_bounds = array<i64: 2, 1, 64>}, {pipeline_mode = #tpu.pipeline_mode<synchronous>, transform_indices = @transform_11, window_bounds = array<i64: 2, 64, 32>}, {pipeline_mode = #tpu.pipeline_mode<synchronous>, transform_indices = @transform_12, window_bounds = array<i64: 2, 1, 32>}, {pipeline_mode = #tpu.pipeline_mode<synchronous>, transform_indices = @transform_13, window_bounds = array<i64: 1, 32>}, {pipeline_mode = #tpu.pipeline_mode<synchronous>, transform_indices = @transform_14, window_bounds = array<i64: 1, 32>}, {pipeline_mode = #tpu.pipeline_mode<synchronous>, transform_indices = @transform_15, window_bounds = array<i64: 1, 32>}, {pipeline_mode = #tpu.pipeline_mode<synchronous>, transform_indices = @transform_16, window_bounds = array<i64: 1, 32>}, {pipeline_mode = #tpu.pipeline_mode<synchronous>, transform_indices = @transform_17, window_bounds = array<i64: 32, 32>}, {pipeline_mode = #tpu.pipeline_mode<synchronous>, transform_indices = @transform_18, window_bounds = array<i64: 1, 32>}, {pipeline_mode = #tpu.pipeline_mode<synchronous>, transform_indices = @transform_19, window_bounds = array<i64: 32, 128>}, {pipeline_mode = #tpu.pipeline_mode<synchronous>, transform_indices = @transform_20, window_bounds = array<i64: 1, 128>}, {transform_indices = @transform_21, window_bounds = array<i64: 2, 128>}]} {
    %c0 = arith.constant 0 : index
    %c0_0 = arith.constant 0 : index
    %0 = vector.load %arg1[%c0, %c0_0] : memref<48x64xbf16, #tpu.memory_space<vmem>>, vector<48x64xbf16>
    %c0_1 = arith.constant 0 : index
    %c0_2 = arith.constant 0 : index
    %1 = vector.load %arg2[%c0_1, %c0_2] : memref<64x32xbf16, #tpu.memory_space<vmem>>, vector<64x32xbf16>
    %cst = arith.constant dense<0.000000e+00> : vector<48x32xf32>
    %2 = tpu.matmul %0, %1, %cst {dimension_numbers = #tpu.dot_dimension_numbers<[1], [0], [0], [1], [0, 0, 1, 1], [], []>} : vector<48x64xbf16>, vector<64x32xbf16>, vector<48x32xf32> -> vector<48x32xf32>
    %3 = vector.shape_cast %2 : vector<48x32xf32> to vector<2x24x32xf32>
    %c0_3 = arith.constant 0 : index
    %c0_4 = arith.constant 0 : index
    %4 = vector.load %arg3[%c0_3, %c0_4] : memref<24x32xf32, #tpu.memory_space<vmem>>, vector<24x32xf32>
    %5 = vector.shape_cast %4 : vector<24x32xf32> to vector<1x24x32xf32>
    %6 = vector.broadcast %5 : vector<1x24x32xf32> to vector<2x24x32xf32>
    %7 = arith.addf %3, %6 : vector<2x24x32xf32>
    %8 = tpu.iota {dimensions = array<i32: 2>} : vector<1x1x24xi32>
    %c17_i32 = arith.constant 17 : i32
    %9 = vector.broadcast %c17_i32 : i32 to vector<1x1x24xi32>
    %10 = arith.cmpi slt, %8, %9 : vector<1x1x24xi32>
    %c0_5 = arith.constant 0 : index
    %c0_6 = arith.constant 0 : index
    %c0_7 = arith.constant 0 : index
    %11 = vector.load %arg4[%c0_5, %c0_6, %c0_7] : memref<2x1x32xf32, #tpu.memory_space<vmem>>, vector<1x1x32xf32>
    %12 = vector.shape_cast %11 : vector<1x1x32xf32> to vector<1x32xf32>
    %c0_8 = arith.constant 0 : index
    %c0_9 = arith.constant 0 : index
    %c0_10 = arith.constant 0 : index
    %13 = vector.load %arg5[%c0_8, %c0_9, %c0_10] : memref<2x1x32xf32, #tpu.memory_space<vmem>>, vector<1x1x32xf32>
    %14 = vector.shape_cast %13 : vector<1x1x32xf32> to vector<1x32xf32>
    %cst_11 = arith.constant dense<0.000000e+00> : vector<2x24xf32>
    %15 = vector.multi_reduction <add>, %7, %cst_11 [2] : vector<2x24x32xf32> to vector<2x24xf32>
    %16 = vector.shape_cast %15 : vector<2x24xf32> to vector<2x24x1xf32>
    %cst_12 = arith.constant 3.200000e+01 : f32
    %17 = vector.broadcast %cst_12 : f32 to vector<2x24x1xf32>
    %18 = arith.divf %16, %17 : vector<2x24x1xf32>
    %19 = vector.broadcast %18 : vector<2x24x1xf32> to vector<2x24x32xf32>
    %20 = arith.subf %7, %19 : vector<2x24x32xf32>
    %21 = arith.mulf %20, %20 : vector<2x24x32xf32>
    %cst_13 = arith.constant dense<0.000000e+00> : vector<2x24xf32>
    %22 = vector.multi_reduction <add>, %21, %cst_13 [2] : vector<2x24x32xf32> to vector<2x24xf32>
    %23 = vector.shape_cast %22 : vector<2x24xf32> to vector<2x24x1xf32>
    %cst_14 = arith.constant 3.200000e+01 : f32
    %24 = vector.broadcast %cst_14 : f32 to vector<2x24x1xf32>
    %25 = arith.divf %23, %24 : vector<2x24x1xf32>
    %26 = vector.broadcast %18 : vector<2x24x1xf32> to vector<2x24x32xf32>
    %27 = arith.subf %7, %26 : vector<2x24x32xf32>
    %cst_15 = arith.constant 9.99999974E-6 : f32
    %28 = vector.broadcast %cst_15 : f32 to vector<2x24x1xf32>
    %29 = arith.addf %25, %28 : vector<2x24x1xf32>
    %30 = math.rsqrt %29 : vector<2x24x1xf32>
    %31 = vector.broadcast %30 : vector<2x24x1xf32> to vector<2x24x32xf32>
    %32 = arith.mulf %27, %31 : vector<2x24x32xf32>
    %33 = vector.shape_cast %12 : vector<1x32xf32> to vector<1x1x32xf32>
    %34 = vector.broadcast %33 : vector<1x1x32xf32> to vector<2x24x32xf32>
    %35 = arith.mulf %32, %34 : vector<2x24x32xf32>
    %36 = vector.shape_cast %14 : vector<1x32xf32> to vector<1x1x32xf32>
    %37 = vector.broadcast %36 : vector<1x1x32xf32> to vector<2x24x32xf32>
    %38 = arith.addf %35, %37 : vector<2x24x32xf32>
    %39 = vector.shape_cast %38 : vector<2x24x32xf32> to vector<48x32xf32>
    %c0_16 = arith.constant 0 : index
    %c0_17 = arith.constant 0 : index
    %c0_18 = arith.constant 0 : index
    %40 = vector.load %arg6[%c0_16, %c0_17, %c0_18] : memref<2x32x32xbf16, #tpu.memory_space<vmem>>, vector<1x32x32xbf16>
    %41 = vector.shape_cast %40 : vector<1x32x32xbf16> to vector<32x32xbf16>
    %42 = arith.truncf %39 : vector<48x32xf32> to vector<48x32xbf16>
    %cst_19 = arith.constant dense<0.000000e+00> : vector<48x32xf32>
    %43 = tpu.matmul %42, %41, %cst_19 {dimension_numbers = #tpu.dot_dimension_numbers<[1], [0], [0], [1], [0, 0, 1, 1], [], []>} : vector<48x32xbf16>, vector<32x32xbf16>, vector<48x32xf32> -> vector<48x32xf32>
    %c0_20 = arith.constant 0 : index
    %c0_21 = arith.constant 0 : index
    %c0_22 = arith.constant 0 : index
    %44 = vector.load %arg7[%c0_20, %c0_21, %c0_22] : memref<2x1x32xf32, #tpu.memory_space<vmem>>, vector<1x1x32xf32>
    %45 = vector.shape_cast %44 : vector<1x1x32xf32> to vector<1x32xf32>
    %46 = vector.broadcast %45 : vector<1x32xf32> to vector<48x32xf32>
    %47 = arith.addf %43, %46 : vector<48x32xf32>
    %48 = vector.shape_cast %47 : vector<48x32xf32> to vector<2x24x32xf32>
    %49 = arith.mulf %38, %38 : vector<2x24x32xf32>
    %cst_23 = arith.constant dense<0.000000e+00> : vector<2x24xf32>
    %50 = vector.multi_reduction <add>, %49, %cst_23 [2] : vector<2x24x32xf32> to vector<2x24xf32>
    %51 = vector.shape_cast %50 : vector<2x24xf32> to vector<2x24x1xf32>
    %cst_24 = arith.constant 1.000000e-24 : f32
    %52 = vector.broadcast %cst_24 : f32 to vector<2x24x1xf32>
    %53 = arith.maximumf %51, %52 : vector<2x24x1xf32>
    %54 = math.rsqrt %53 : vector<2x24x1xf32>
    %55 = vector.broadcast %54 : vector<2x24x1xf32> to vector<2x24x32xf32>
    %56 = arith.mulf %38, %55 : vector<2x24x32xf32>
    %57 = tpu.transpose %56, [0, 2, 1] : vector<2x24x32xf32> -> vector<2x32x24xf32>
    %58 = arith.truncf %56 : vector<2x24x32xf32> to vector<2x24x32xbf16>
    %59 = arith.truncf %57 : vector<2x32x24xf32> to vector<2x32x24xbf16>
    "tpu.trace_start"() <{level = 10 : i32, message = "bsd,bdt->bst"}> : () -> ()
    %cst_25 = arith.constant dense<0.000000e+00> : vector<2x24x24xf32>
    %60 = tpu.matmul %58, %59, %cst_25 {dimension_numbers = #tpu.dot_dimension_numbers<[2], [1], [1], [2], [0, 0, 0, 1, 1, 2], [0], [0]>} : vector<2x24x32xbf16>, vector<2x32x24xbf16>, vector<2x24x24xf32> -> vector<2x24x24xf32>
    "tpu.trace_stop"() : () -> ()
    %61 = math.exp %60 : vector<2x24x24xf32>
    %cst_26 = arith.constant 0.000000e+00 : f32
    %62 = vector.shape_cast %10 : vector<1x1x24xi1> to vector<1x1x24xi1>
    %63 = vector.broadcast %62 : vector<1x1x24xi1> to vector<2x24x24xi1>
    %64 = vector.broadcast %cst_26 : f32 to vector<2x24x24xf32>
    %65 = arith.select %63, %61, %64 : vector<2x24x24xi1>, vector<2x24x24xf32>
    %cst_27 = arith.constant dense<0.000000e+00> : vector<2x24xf32>
    %66 = vector.multi_reduction <add>, %65, %cst_27 [2] : vector<2x24x24xf32> to vector<2x24xf32>
    %67 = vector.shape_cast %66 : vector<2x24xf32> to vector<2x24x1xf32>
    %68 = tpu.reciprocal %67 {approx = true} : vector<2x24x1xf32> -> vector<2x24x1xf32>
    %69 = vector.broadcast %68 : vector<2x24x1xf32> to vector<2x24x24xf32>
    %70 = arith.mulf %65, %69 : vector<2x24x24xf32>
    %71 = arith.truncf %70 : vector<2x24x24xf32> to vector<2x24x24xbf16>
    %72 = arith.truncf %48 : vector<2x24x32xf32> to vector<2x24x32xbf16>
    "tpu.trace_start"() <{level = 10 : i32, message = "bst,btd->bsd"}> : () -> ()
    %cst_28 = arith.constant dense<0.000000e+00> : vector<2x24x32xf32>
    %73 = tpu.matmul %71, %72, %cst_28 {dimension_numbers = #tpu.dot_dimension_numbers<[2], [1], [1], [2], [0, 0, 0, 1, 1, 2], [0], [0]>} : vector<2x24x24xbf16>, vector<2x24x32xbf16>, vector<2x24x32xf32> -> vector<2x24x32xf32>
    "tpu.trace_stop"() : () -> ()
    %74 = arith.addf %7, %73 : vector<2x24x32xf32>
    %c0_29 = arith.constant 0 : index
    %c0_30 = arith.constant 0 : index
    %c0_31 = arith.constant 0 : index
    %75 = vector.load %arg8[%c0_29, %c0_30, %c0_31] : memref<2x1x32xf32, #tpu.memory_space<vmem>>, vector<1x1x32xf32>
    %76 = vector.shape_cast %75 : vector<1x1x32xf32> to vector<1x32xf32>
    %c0_32 = arith.constant 0 : index
    %c0_33 = arith.constant 0 : index
    %c0_34 = arith.constant 0 : index
    %77 = vector.load %arg9[%c0_32, %c0_33, %c0_34] : memref<2x1x32xf32, #tpu.memory_space<vmem>>, vector<1x1x32xf32>
    %78 = vector.shape_cast %77 : vector<1x1x32xf32> to vector<1x32xf32>
    %cst_35 = arith.constant dense<0.000000e+00> : vector<2x24xf32>
    %79 = vector.multi_reduction <add>, %74, %cst_35 [2] : vector<2x24x32xf32> to vector<2x24xf32>
    %80 = vector.shape_cast %79 : vector<2x24xf32> to vector<2x24x1xf32>
    %cst_36 = arith.constant 3.200000e+01 : f32
    %81 = vector.broadcast %cst_36 : f32 to vector<2x24x1xf32>
    %82 = arith.divf %80, %81 : vector<2x24x1xf32>
    %83 = vector.broadcast %82 : vector<2x24x1xf32> to vector<2x24x32xf32>
    %84 = arith.subf %74, %83 : vector<2x24x32xf32>
    %85 = arith.mulf %84, %84 : vector<2x24x32xf32>
    %cst_37 = arith.constant dense<0.000000e+00> : vector<2x24xf32>
    %86 = vector.multi_reduction <add>, %85, %cst_37 [2] : vector<2x24x32xf32> to vector<2x24xf32>
    %87 = vector.shape_cast %86 : vector<2x24xf32> to vector<2x24x1xf32>
    %cst_38 = arith.constant 3.200000e+01 : f32
    %88 = vector.broadcast %cst_38 : f32 to vector<2x24x1xf32>
    %89 = arith.divf %87, %88 : vector<2x24x1xf32>
    %90 = vector.broadcast %82 : vector<2x24x1xf32> to vector<2x24x32xf32>
    %91 = arith.subf %74, %90 : vector<2x24x32xf32>
    %cst_39 = arith.constant 9.99999974E-6 : f32
    %92 = vector.broadcast %cst_39 : f32 to vector<2x24x1xf32>
    %93 = arith.addf %89, %92 : vector<2x24x1xf32>
    %94 = math.rsqrt %93 : vector<2x24x1xf32>
    %95 = vector.broadcast %94 : vector<2x24x1xf32> to vector<2x24x32xf32>
    %96 = arith.mulf %91, %95 : vector<2x24x32xf32>
    %97 = vector.shape_cast %76 : vector<1x32xf32> to vector<1x1x32xf32>
    %98 = vector.broadcast %97 : vector<1x1x32xf32> to vector<2x24x32xf32>
    %99 = arith.mulf %96, %98 : vector<2x24x32xf32>
    %100 = vector.shape_cast %78 : vector<1x32xf32> to vector<1x1x32xf32>
    %101 = vector.broadcast %100 : vector<1x1x32xf32> to vector<2x24x32xf32>
    %102 = arith.addf %99, %101 : vector<2x24x32xf32>
    %103 = vector.shape_cast %102 : vector<2x24x32xf32> to vector<48x32xf32>
    %c0_40 = arith.constant 0 : index
    %c0_41 = arith.constant 0 : index
    %c0_42 = arith.constant 0 : index
    %104 = vector.load %arg10[%c0_40, %c0_41, %c0_42] : memref<2x32x64xbf16, #tpu.memory_space<vmem>>, vector<1x32x64xbf16>
    %105 = vector.shape_cast %104 : vector<1x32x64xbf16> to vector<32x64xbf16>
    %106 = arith.truncf %103 : vector<48x32xf32> to vector<48x32xbf16>
    %cst_43 = arith.constant dense<0.000000e+00> : vector<48x64xf32>
    %107 = tpu.matmul %106, %105, %cst_43 {dimension_numbers = #tpu.dot_dimension_numbers<[1], [0], [0], [1], [0, 0, 1, 1], [], []>} : vector<48x32xbf16>, vector<32x64xbf16>, vector<48x64xf32> -> vector<48x64xf32>
    %c0_44 = arith.constant 0 : index
    %c0_45 = arith.constant 0 : index
    %c0_46 = arith.constant 0 : index
    %108 = vector.load %arg11[%c0_44, %c0_45, %c0_46] : memref<2x1x64xf32, #tpu.memory_space<vmem>>, vector<1x1x64xf32>
    %109 = vector.shape_cast %108 : vector<1x1x64xf32> to vector<1x64xf32>
    %110 = vector.broadcast %109 : vector<1x64xf32> to vector<48x64xf32>
    %111 = arith.addf %107, %110 : vector<48x64xf32>
    %112 = arith.mulf %111, %111 : vector<48x64xf32>
    %113 = arith.mulf %111, %112 : vector<48x64xf32>
    %cst_47 = arith.constant 4.471500e-02 : f32
    %114 = vector.broadcast %cst_47 : f32 to vector<48x64xf32>
    %115 = arith.mulf %114, %113 : vector<48x64xf32>
    %116 = arith.addf %111, %115 : vector<48x64xf32>
    %cst_48 = arith.constant 0.797884583 : f32
    %117 = vector.broadcast %cst_48 : f32 to vector<48x64xf32>
    %118 = arith.mulf %117, %116 : vector<48x64xf32>
    %119 = math.tanh %118 : vector<48x64xf32>
    %cst_49 = arith.constant 1.000000e+00 : f32
    %120 = vector.broadcast %cst_49 : f32 to vector<48x64xf32>
    %121 = arith.addf %120, %119 : vector<48x64xf32>
    %cst_50 = arith.constant 5.000000e-01 : f32
    %122 = vector.broadcast %cst_50 : f32 to vector<48x64xf32>
    %123 = arith.mulf %122, %121 : vector<48x64xf32>
    %124 = arith.mulf %111, %123 : vector<48x64xf32>
    %c0_51 = arith.constant 0 : index
    %c0_52 = arith.constant 0 : index
    %c0_53 = arith.constant 0 : index
    %125 = vector.load %arg12[%c0_51, %c0_52, %c0_53] : memref<2x64x32xbf16, #tpu.memory_space<vmem>>, vector<1x64x32xbf16>
    %126 = vector.shape_cast %125 : vector<1x64x32xbf16> to vector<64x32xbf16>
    %127 = arith.truncf %124 : vector<48x64xf32> to vector<48x64xbf16>
    %cst_54 = arith.constant dense<0.000000e+00> : vector<48x32xf32>
    %128 = tpu.matmul %127, %126, %cst_54 {dimension_numbers = #tpu.dot_dimension_numbers<[1], [0], [0], [1], [0, 0, 1, 1], [], []>} : vector<48x64xbf16>, vector<64x32xbf16>, vector<48x32xf32> -> vector<48x32xf32>
    %c0_55 = arith.constant 0 : index
    %c0_56 = arith.constant 0 : index
    %c0_57 = arith.constant 0 : index
    %129 = vector.load %arg13[%c0_55, %c0_56, %c0_57] : memref<2x1x32xf32, #tpu.memory_space<vmem>>, vector<1x1x32xf32>
    %130 = vector.shape_cast %129 : vector<1x1x32xf32> to vector<1x32xf32>
    %131 = vector.broadcast %130 : vector<1x32xf32> to vector<48x32xf32>
    %132 = arith.addf %128, %131 : vector<48x32xf32>
    %133 = vector.shape_cast %132 : vector<48x32xf32> to vector<2x24x32xf32>
    %134 = arith.addf %74, %133 : vector<2x24x32xf32>
    %c1 = arith.constant 1 : index
    %c0_58 = arith.constant 0 : index
    %c0_59 = arith.constant 0 : index
    %135 = vector.load %arg4[%c1, %c0_58, %c0_59] : memref<2x1x32xf32, #tpu.memory_space<vmem>>, vector<1x1x32xf32>
    %136 = vector.shape_cast %135 : vector<1x1x32xf32> to vector<1x32xf32>
    %c1_60 = arith.constant 1 : index
    %c0_61 = arith.constant 0 : index
    %c0_62 = arith.constant 0 : index
    %137 = vector.load %arg5[%c1_60, %c0_61, %c0_62] : memref<2x1x32xf32, #tpu.memory_space<vmem>>, vector<1x1x32xf32>
    %138 = vector.shape_cast %137 : vector<1x1x32xf32> to vector<1x32xf32>
    %cst_63 = arith.constant dense<0.000000e+00> : vector<2x24xf32>
    %139 = vector.multi_reduction <add>, %134, %cst_63 [2] : vector<2x24x32xf32> to vector<2x24xf32>
    %140 = vector.shape_cast %139 : vector<2x24xf32> to vector<2x24x1xf32>
    %cst_64 = arith.constant 3.200000e+01 : f32
    %141 = vector.broadcast %cst_64 : f32 to vector<2x24x1xf32>
    %142 = arith.divf %140, %141 : vector<2x24x1xf32>
    %143 = vector.broadcast %142 : vector<2x24x1xf32> to vector<2x24x32xf32>
    %144 = arith.subf %134, %143 : vector<2x24x32xf32>
    %145 = arith.mulf %144, %144 : vector<2x24x32xf32>
    %cst_65 = arith.constant dense<0.000000e+00> : vector<2x24xf32>
    %146 = vector.multi_reduction <add>, %145, %cst_65 [2] : vector<2x24x32xf32> to vector<2x24xf32>
    %147 = vector.shape_cast %146 : vector<2x24xf32> to vector<2x24x1xf32>
    %cst_66 = arith.constant 3.200000e+01 : f32
    %148 = vector.broadcast %cst_66 : f32 to vector<2x24x1xf32>
    %149 = arith.divf %147, %148 : vector<2x24x1xf32>
    %150 = vector.broadcast %142 : vector<2x24x1xf32> to vector<2x24x32xf32>
    %151 = arith.subf %134, %150 : vector<2x24x32xf32>
    %cst_67 = arith.constant 9.99999974E-6 : f32
    %152 = vector.broadcast %cst_67 : f32 to vector<2x24x1xf32>
    %153 = arith.addf %149, %152 : vector<2x24x1xf32>
    %154 = math.rsqrt %153 : vector<2x24x1xf32>
    %155 = vector.broadcast %154 : vector<2x24x1xf32> to vector<2x24x32xf32>
    %156 = arith.mulf %151, %155 : vector<2x24x32xf32>
    %157 = vector.shape_cast %136 : vector<1x32xf32> to vector<1x1x32xf32>
    %158 = vector.broadcast %157 : vector<1x1x32xf32> to vector<2x24x32xf32>
    %159 = arith.mulf %156, %158 : vector<2x24x32xf32>
    %160 = vector.shape_cast %138 : vector<1x32xf32> to vector<1x1x32xf32>
    %161 = vector.broadcast %160 : vector<1x1x32xf32> to vector<2x24x32xf32>
    %162 = arith.addf %159, %161 : vector<2x24x32xf32>
    %163 = vector.shape_cast %162 : vector<2x24x32xf32> to vector<48x32xf32>
    %c1_68 = arith.constant 1 : index
    %c0_69 = arith.constant 0 : index
    %c0_70 = arith.constant 0 : index
    %164 = vector.load %arg6[%c1_68, %c0_69, %c0_70] : memref<2x32x32xbf16, #tpu.memory_space<vmem>>, vector<1x32x32xbf16>
    %165 = vector.shape_cast %164 : vector<1x32x32xbf16> to vector<32x32xbf16>
    %166 = arith.truncf %163 : vector<48x32xf32> to vector<48x32xbf16>
    %cst_71 = arith.constant dense<0.000000e+00> : vector<48x32xf32>
    %167 = tpu.matmul %166, %165, %cst_71 {dimension_numbers = #tpu.dot_dimension_numbers<[1], [0], [0], [1], [0, 0, 1, 1], [], []>} : vector<48x32xbf16>, vector<32x32xbf16>, vector<48x32xf32> -> vector<48x32xf32>
    %c1_72 = arith.constant 1 : index
    %c0_73 = arith.constant 0 : index
    %c0_74 = arith.constant 0 : index
    %168 = vector.load %arg7[%c1_72, %c0_73, %c0_74] : memref<2x1x32xf32, #tpu.memory_space<vmem>>, vector<1x1x32xf32>
    %169 = vector.shape_cast %168 : vector<1x1x32xf32> to vector<1x32xf32>
    %170 = vector.broadcast %169 : vector<1x32xf32> to vector<48x32xf32>
    %171 = arith.addf %167, %170 : vector<48x32xf32>
    %172 = vector.shape_cast %171 : vector<48x32xf32> to vector<2x24x32xf32>
    %173 = arith.mulf %162, %162 : vector<2x24x32xf32>
    %cst_75 = arith.constant dense<0.000000e+00> : vector<2x24xf32>
    %174 = vector.multi_reduction <add>, %173, %cst_75 [2] : vector<2x24x32xf32> to vector<2x24xf32>
    %175 = vector.shape_cast %174 : vector<2x24xf32> to vector<2x24x1xf32>
    %cst_76 = arith.constant 1.000000e-24 : f32
    %176 = vector.broadcast %cst_76 : f32 to vector<2x24x1xf32>
    %177 = arith.maximumf %175, %176 : vector<2x24x1xf32>
    %178 = math.rsqrt %177 : vector<2x24x1xf32>
    %179 = vector.broadcast %178 : vector<2x24x1xf32> to vector<2x24x32xf32>
    %180 = arith.mulf %162, %179 : vector<2x24x32xf32>
    %181 = tpu.transpose %180, [0, 2, 1] : vector<2x24x32xf32> -> vector<2x32x24xf32>
    %182 = arith.truncf %180 : vector<2x24x32xf32> to vector<2x24x32xbf16>
    %183 = arith.truncf %181 : vector<2x32x24xf32> to vector<2x32x24xbf16>
    "tpu.trace_start"() <{level = 10 : i32, message = "bsd,bdt->bst"}> : () -> ()
    %cst_77 = arith.constant dense<0.000000e+00> : vector<2x24x24xf32>
    %184 = tpu.matmul %182, %183, %cst_77 {dimension_numbers = #tpu.dot_dimension_numbers<[2], [1], [1], [2], [0, 0, 0, 1, 1, 2], [0], [0]>} : vector<2x24x32xbf16>, vector<2x32x24xbf16>, vector<2x24x24xf32> -> vector<2x24x24xf32>
    "tpu.trace_stop"() : () -> ()
    %185 = math.exp %184 : vector<2x24x24xf32>
    %cst_78 = arith.constant 0.000000e+00 : f32
    %186 = vector.shape_cast %10 : vector<1x1x24xi1> to vector<1x1x24xi1>
    %187 = vector.broadcast %186 : vector<1x1x24xi1> to vector<2x24x24xi1>
    %188 = vector.broadcast %cst_78 : f32 to vector<2x24x24xf32>
    %189 = arith.select %187, %185, %188 : vector<2x24x24xi1>, vector<2x24x24xf32>
    %cst_79 = arith.constant dense<0.000000e+00> : vector<2x24xf32>
    %190 = vector.multi_reduction <add>, %189, %cst_79 [2] : vector<2x24x24xf32> to vector<2x24xf32>
    %191 = vector.shape_cast %190 : vector<2x24xf32> to vector<2x24x1xf32>
    %192 = tpu.reciprocal %191 {approx = true} : vector<2x24x1xf32> -> vector<2x24x1xf32>
    %193 = vector.broadcast %192 : vector<2x24x1xf32> to vector<2x24x24xf32>
    %194 = arith.mulf %189, %193 : vector<2x24x24xf32>
    %195 = arith.truncf %194 : vector<2x24x24xf32> to vector<2x24x24xbf16>
    %196 = arith.truncf %172 : vector<2x24x32xf32> to vector<2x24x32xbf16>
    "tpu.trace_start"() <{level = 10 : i32, message = "bst,btd->bsd"}> : () -> ()
    %cst_80 = arith.constant dense<0.000000e+00> : vector<2x24x32xf32>
    %197 = tpu.matmul %195, %196, %cst_80 {dimension_numbers = #tpu.dot_dimension_numbers<[2], [1], [1], [2], [0, 0, 0, 1, 1, 2], [0], [0]>} : vector<2x24x24xbf16>, vector<2x24x32xbf16>, vector<2x24x32xf32> -> vector<2x24x32xf32>
    "tpu.trace_stop"() : () -> ()
    %198 = arith.addf %134, %197 : vector<2x24x32xf32>
    %c1_81 = arith.constant 1 : index
    %c0_82 = arith.constant 0 : index
    %c0_83 = arith.constant 0 : index
    %199 = vector.load %arg8[%c1_81, %c0_82, %c0_83] : memref<2x1x32xf32, #tpu.memory_space<vmem>>, vector<1x1x32xf32>
    %200 = vector.shape_cast %199 : vector<1x1x32xf32> to vector<1x32xf32>
    %c1_84 = arith.constant 1 : index
    %c0_85 = arith.constant 0 : index
    %c0_86 = arith.constant 0 : index
    %201 = vector.load %arg9[%c1_84, %c0_85, %c0_86] : memref<2x1x32xf32, #tpu.memory_space<vmem>>, vector<1x1x32xf32>
    %202 = vector.shape_cast %201 : vector<1x1x32xf32> to vector<1x32xf32>
    %cst_87 = arith.constant dense<0.000000e+00> : vector<2x24xf32>
    %203 = vector.multi_reduction <add>, %198, %cst_87 [2] : vector<2x24x32xf32> to vector<2x24xf32>
    %204 = vector.shape_cast %203 : vector<2x24xf32> to vector<2x24x1xf32>
    %cst_88 = arith.constant 3.200000e+01 : f32
    %205 = vector.broadcast %cst_88 : f32 to vector<2x24x1xf32>
    %206 = arith.divf %204, %205 : vector<2x24x1xf32>
    %207 = vector.broadcast %206 : vector<2x24x1xf32> to vector<2x24x32xf32>
    %208 = arith.subf %198, %207 : vector<2x24x32xf32>
    %209 = arith.mulf %208, %208 : vector<2x24x32xf32>
    %cst_89 = arith.constant dense<0.000000e+00> : vector<2x24xf32>
    %210 = vector.multi_reduction <add>, %209, %cst_89 [2] : vector<2x24x32xf32> to vector<2x24xf32>
    %211 = vector.shape_cast %210 : vector<2x24xf32> to vector<2x24x1xf32>
    %cst_90 = arith.constant 3.200000e+01 : f32
    %212 = vector.broadcast %cst_90 : f32 to vector<2x24x1xf32>
    %213 = arith.divf %211, %212 : vector<2x24x1xf32>
    %214 = vector.broadcast %206 : vector<2x24x1xf32> to vector<2x24x32xf32>
    %215 = arith.subf %198, %214 : vector<2x24x32xf32>
    %cst_91 = arith.constant 9.99999974E-6 : f32
    %216 = vector.broadcast %cst_91 : f32 to vector<2x24x1xf32>
    %217 = arith.addf %213, %216 : vector<2x24x1xf32>
    %218 = math.rsqrt %217 : vector<2x24x1xf32>
    %219 = vector.broadcast %218 : vector<2x24x1xf32> to vector<2x24x32xf32>
    %220 = arith.mulf %215, %219 : vector<2x24x32xf32>
    %221 = vector.shape_cast %200 : vector<1x32xf32> to vector<1x1x32xf32>
    %222 = vector.broadcast %221 : vector<1x1x32xf32> to vector<2x24x32xf32>
    %223 = arith.mulf %220, %222 : vector<2x24x32xf32>
    %224 = vector.shape_cast %202 : vector<1x32xf32> to vector<1x1x32xf32>
    %225 = vector.broadcast %224 : vector<1x1x32xf32> to vector<2x24x32xf32>
    %226 = arith.addf %223, %225 : vector<2x24x32xf32>
    %227 = vector.shape_cast %226 : vector<2x24x32xf32> to vector<48x32xf32>
    %c1_92 = arith.constant 1 : index
    %c0_93 = arith.constant 0 : index
    %c0_94 = arith.constant 0 : index
    %228 = vector.load %arg10[%c1_92, %c0_93, %c0_94] : memref<2x32x64xbf16, #tpu.memory_space<vmem>>, vector<1x32x64xbf16>
    %229 = vector.shape_cast %228 : vector<1x32x64xbf16> to vector<32x64xbf16>
    %230 = arith.truncf %227 : vector<48x32xf32> to vector<48x32xbf16>
    %cst_95 = arith.constant dense<0.000000e+00> : vector<48x64xf32>
    %231 = tpu.matmul %230, %229, %cst_95 {dimension_numbers = #tpu.dot_dimension_numbers<[1], [0], [0], [1], [0, 0, 1, 1], [], []>} : vector<48x32xbf16>, vector<32x64xbf16>, vector<48x64xf32> -> vector<48x64xf32>
    %c1_96 = arith.constant 1 : index
    %c0_97 = arith.constant 0 : index
    %c0_98 = arith.constant 0 : index
    %232 = vector.load %arg11[%c1_96, %c0_97, %c0_98] : memref<2x1x64xf32, #tpu.memory_space<vmem>>, vector<1x1x64xf32>
    %233 = vector.shape_cast %232 : vector<1x1x64xf32> to vector<1x64xf32>
    %234 = vector.broadcast %233 : vector<1x64xf32> to vector<48x64xf32>
    %235 = arith.addf %231, %234 : vector<48x64xf32>
    %236 = arith.mulf %235, %235 : vector<48x64xf32>
    %237 = arith.mulf %235, %236 : vector<48x64xf32>
    %cst_99 = arith.constant 4.471500e-02 : f32
    %238 = vector.broadcast %cst_99 : f32 to vector<48x64xf32>
    %239 = arith.mulf %238, %237 : vector<48x64xf32>
    %240 = arith.addf %235, %239 : vector<48x64xf32>
    %cst_100 = arith.constant 0.797884583 : f32
    %241 = vector.broadcast %cst_100 : f32 to vector<48x64xf32>
    %242 = arith.mulf %241, %240 : vector<48x64xf32>
    %243 = math.tanh %242 : vector<48x64xf32>
    %cst_101 = arith.constant 1.000000e+00 : f32
    %244 = vector.broadcast %cst_101 : f32 to vector<48x64xf32>
    %245 = arith.addf %244, %243 : vector<48x64xf32>
    %cst_102 = arith.constant 5.000000e-01 : f32
    %246 = vector.broadcast %cst_102 : f32 to vector<48x64xf32>
    %247 = arith.mulf %246, %245 : vector<48x64xf32>
    %248 = arith.mulf %235, %247 : vector<48x64xf32>
    %c1_103 = arith.constant 1 : index
    %c0_104 = arith.constant 0 : index
    %c0_105 = arith.constant 0 : index
    %249 = vector.load %arg12[%c1_103, %c0_104, %c0_105] : memref<2x64x32xbf16, #tpu.memory_space<vmem>>, vector<1x64x32xbf16>
    %250 = vector.shape_cast %249 : vector<1x64x32xbf16> to vector<64x32xbf16>
    %251 = arith.truncf %248 : vector<48x64xf32> to vector<48x64xbf16>
    %cst_106 = arith.constant dense<0.000000e+00> : vector<48x32xf32>
    %252 = tpu.matmul %251, %250, %cst_106 {dimension_numbers = #tpu.dot_dimension_numbers<[1], [0], [0], [1], [0, 0, 1, 1], [], []>} : vector<48x64xbf16>, vector<64x32xbf16>, vector<48x32xf32> -> vector<48x32xf32>
    %c1_107 = arith.constant 1 : index
    %c0_108 = arith.constant 0 : index
    %c0_109 = arith.constant 0 : index
    %253 = vector.load %arg13[%c1_107, %c0_108, %c0_109] : memref<2x1x32xf32, #tpu.memory_space<vmem>>, vector<1x1x32xf32>
    %254 = vector.shape_cast %253 : vector<1x1x32xf32> to vector<1x32xf32>
    %255 = vector.broadcast %254 : vector<1x32xf32> to vector<48x32xf32>
    %256 = arith.addf %252, %255 : vector<48x32xf32>
    %257 = vector.shape_cast %256 : vector<48x32xf32> to vector<2x24x32xf32>
    %258 = arith.addf %198, %257 : vector<2x24x32xf32>
    %259 = vector.extract_strided_slice %258 {offsets = [0, 0, 0], sizes = [2, 1, 32], strides = [1, 1, 1]} : vector<2x24x32xf32> to vector<2x1x32xf32>
    %260 = vector.shape_cast %259 : vector<2x1x32xf32> to vector<2x32xf32>
    %c0_110 = arith.constant 0 : index
    %c0_111 = arith.constant 0 : index
    %261 = vector.load %arg14[%c0_110, %c0_111] : memref<1x32xf32, #tpu.memory_space<vmem>>, vector<1x32xf32>
    %c0_112 = arith.constant 0 : index
    %c0_113 = arith.constant 0 : index
    %262 = vector.load %arg15[%c0_112, %c0_113] : memref<1x32xf32, #tpu.memory_space<vmem>>, vector<1x32xf32>
    %cst_114 = arith.constant dense<0.000000e+00> : vector<2xf32>
    %263 = vector.multi_reduction <add>, %260, %cst_114 [1] : vector<2x32xf32> to vector<2xf32>
    %264 = vector.shape_cast %263 : vector<2xf32> to vector<2x1xf32>
    %cst_115 = arith.constant 3.200000e+01 : f32
    %265 = vector.broadcast %cst_115 : f32 to vector<2x1xf32>
    %266 = arith.divf %264, %265 : vector<2x1xf32>
    %267 = vector.broadcast %266 : vector<2x1xf32> to vector<2x32xf32>
    %268 = arith.subf %260, %267 : vector<2x32xf32>
    %269 = arith.mulf %268, %268 : vector<2x32xf32>
    %cst_116 = arith.constant dense<0.000000e+00> : vector<2xf32>
    %270 = vector.multi_reduction <add>, %269, %cst_116 [1] : vector<2x32xf32> to vector<2xf32>
    %271 = vector.shape_cast %270 : vector<2xf32> to vector<2x1xf32>
    %cst_117 = arith.constant 3.200000e+01 : f32
    %272 = vector.broadcast %cst_117 : f32 to vector<2x1xf32>
    %273 = arith.divf %271, %272 : vector<2x1xf32>
    %274 = vector.broadcast %266 : vector<2x1xf32> to vector<2x32xf32>
    %275 = arith.subf %260, %274 : vector<2x32xf32>
    %cst_118 = arith.constant 9.99999974E-6 : f32
    %276 = vector.broadcast %cst_118 : f32 to vector<2x1xf32>
    %277 = arith.addf %273, %276 : vector<2x1xf32>
    %278 = math.rsqrt %277 : vector<2x1xf32>
    %279 = vector.broadcast %278 : vector<2x1xf32> to vector<2x32xf32>
    %280 = arith.mulf %275, %279 : vector<2x32xf32>
    %281 = vector.broadcast %261 : vector<1x32xf32> to vector<2x32xf32>
    %282 = arith.mulf %280, %281 : vector<2x32xf32>
    %283 = vector.broadcast %262 : vector<1x32xf32> to vector<2x32xf32>
    %284 = arith.addf %282, %283 : vector<2x32xf32>
    %c0_119 = arith.constant 0 : index
    %c0_120 = arith.constant 0 : index
    %285 = vector.load %arg16[%c0_119, %c0_120] : memref<1x32xf32, #tpu.memory_space<vmem>>, vector<1x32xf32>
    %c0_121 = arith.constant 0 : index
    %c0_122 = arith.constant 0 : index
    %286 = vector.load %arg17[%c0_121, %c0_122] : memref<1x32xf32, #tpu.memory_space<vmem>>, vector<1x32xf32>
    %cst_123 = arith.constant dense<0.000000e+00> : vector<2xf32>
    %287 = vector.multi_reduction <add>, %284, %cst_123 [1] : vector<2x32xf32> to vector<2xf32>
    %288 = vector.shape_cast %287 : vector<2xf32> to vector<2x1xf32>
    %cst_124 = arith.constant 3.200000e+01 : f32
    %289 = vector.broadcast %cst_124 : f32 to vector<2x1xf32>
    %290 = arith.divf %288, %289 : vector<2x1xf32>
    %291 = vector.broadcast %290 : vector<2x1xf32> to vector<2x32xf32>
    %292 = arith.subf %284, %291 : vector<2x32xf32>
    %293 = arith.mulf %292, %292 : vector<2x32xf32>
    %cst_125 = arith.constant dense<0.000000e+00> : vector<2xf32>
    %294 = vector.multi_reduction <add>, %293, %cst_125 [1] : vector<2x32xf32> to vector<2xf32>
    %295 = vector.shape_cast %294 : vector<2xf32> to vector<2x1xf32>
    %cst_126 = arith.constant 3.200000e+01 : f32
    %296 = vector.broadcast %cst_126 : f32 to vector<2x1xf32>
    %297 = arith.divf %295, %296 : vector<2x1xf32>
    %298 = vector.broadcast %290 : vector<2x1xf32> to vector<2x32xf32>
    %299 = arith.subf %284, %298 : vector<2x32xf32>
    %cst_127 = arith.constant 9.99999974E-6 : f32
    %300 = vector.broadcast %cst_127 : f32 to vector<2x1xf32>
    %301 = arith.addf %297, %300 : vector<2x1xf32>
    %302 = math.rsqrt %301 : vector<2x1xf32>
    %303 = vector.broadcast %302 : vector<2x1xf32> to vector<2x32xf32>
    %304 = arith.mulf %299, %303 : vector<2x32xf32>
    %305 = vector.broadcast %285 : vector<1x32xf32> to vector<2x32xf32>
    %306 = arith.mulf %304, %305 : vector<2x32xf32>
    %307 = vector.broadcast %286 : vector<1x32xf32> to vector<2x32xf32>
    %308 = arith.addf %306, %307 : vector<2x32xf32>
    %c0_128 = arith.constant 0 : index
    %c0_129 = arith.constant 0 : index
    %309 = vector.load %arg18[%c0_128, %c0_129] : memref<32x32xbf16, #tpu.memory_space<vmem>>, vector<32x32xbf16>
    %310 = arith.truncf %308 : vector<2x32xf32> to vector<2x32xbf16>
    %cst_130 = arith.constant dense<0.000000e+00> : vector<2x32xf32>
    %311 = tpu.matmul %310, %309, %cst_130 {dimension_numbers = #tpu.dot_dimension_numbers<[1], [0], [0], [1], [0, 0, 1, 1], [], []>} : vector<2x32xbf16>, vector<32x32xbf16>, vector<2x32xf32> -> vector<2x32xf32>
    %c0_131 = arith.constant 0 : index
    %c0_132 = arith.constant 0 : index
    %312 = vector.load %arg19[%c0_131, %c0_132] : memref<1x32xf32, #tpu.memory_space<vmem>>, vector<1x32xf32>
    %313 = vector.broadcast %312 : vector<1x32xf32> to vector<2x32xf32>
    %314 = arith.addf %311, %313 : vector<2x32xf32>
    %315 = math.tanh %314 : vector<2x32xf32>
    %c0_133 = arith.constant 0 : index
    %c0_134 = arith.constant 0 : index
    %316 = vector.load %arg20[%c0_133, %c0_134] : memref<32x128xbf16, #tpu.memory_space<vmem>>, vector<32x128xbf16>
    %317 = arith.truncf %315 : vector<2x32xf32> to vector<2x32xbf16>
    %cst_135 = arith.constant dense<0.000000e+00> : vector<2x128xf32>
    %318 = tpu.matmul %317, %316, %cst_135 {dimension_numbers = #tpu.dot_dimension_numbers<[1], [0], [0], [1], [0, 0, 1, 1], [], []>} : vector<2x32xbf16>, vector<32x128xbf16>, vector<2x128xf32> -> vector<2x128xf32>
    %c0_136 = arith.constant 0 : index
    %c0_137 = arith.constant 0 : index
    %319 = vector.load %arg21[%c0_136, %c0_137] : memref<1x128xf32, #tpu.memory_space<vmem>>, vector<1x128xf32>
    %320 = vector.broadcast %319 : vector<1x128xf32> to vector<2x128xf32>
    %321 = arith.addf %318, %320 : vector<2x128xf32>
    %c0_138 = arith.constant 0 : index
    %c0_139 = arith.constant 0 : index
    %322 = vector.load %arg22[%c0_138, %c0_139] : memref<2x128xf32, #tpu.memory_space<vmem>>, vector<2x128xf32>
    tpu.vector_store %arg22[%c0_138, %c0_139], %321 {strides = array<i32>} : memref<2x128xf32, #tpu.memory_space<vmem>>, vector<2x128xf32>,
    return
  }
  func.func @transform_0(%arg0: i32) -> (i32, i32) {
    %c0_i32 = arith.constant 0 : i32
    %c0_i32_0 = arith.constant 0 : i32
    return %arg0, %c0_i32 : i32, i32
  }
  func.func @transform_1(%arg0: i32) -> (i32, i32) {
    %c0_i32 = arith.constant 0 : i32
    %c0_i32_0 = arith.constant 0 : i32
    %c0_i32_1 = arith.constant 0 : i32
    return %c0_i32, %c0_i32_0 : i32, i32
  }
  func.func @transform_2(%arg0: i32) -> (i32, i32) {
    %c0_i32 = arith.constant 0 : i32
    %c0_i32_0 = arith.constant 0 : i32
    %c0_i32_1 = arith.constant 0 : i32
    return %c0_i32, %c0_i32_0 : i32, i32
  }
  func.func @transform_3(%arg0: i32) -> (i32, i32, i32) {
    %c0_i32 = arith.constant 0 : i32
    %c0_i32_0 = arith.constant 0 : i32
    %c0_i32_1 = arith.constant 0 : i32
    %c0_i32_2 = arith.constant 0 : i32
    return %c0_i32, %c0_i32_0, %c0_i32_1 : i32, i32, i32
  }
  func.func @transform_4(%arg0: i32) -> (i32, i32, i32) {
    %c0_i32 = arith.constant 0 : i32
    %c0_i32_0 = arith.constant 0 : i32
    %c0_i32_1 = arith.constant 0 : i32
    %c0_i32_2 = arith.constant 0 : i32
    return %c0_i32, %c0_i32_0, %c0_i32_1 : i32, i32, i32
  }
  func.func @transform_5(%arg0: i32) -> (i32, i32, i32) {
    %c0_i32 = arith.constant 0 : i32
    %c0_i32_0 = arith.constant 0 : i32
    %c0_i32_1 = arith.constant 0 : i32
    %c0_i32_2 = arith.constant 0 : i32
    return %c0_i32, %c0_i32_0, %c0_i32_1 : i32, i32, i32
  }
  func.func @transform_6(%arg0: i32) -> (i32, i32, i32) {
    %c0_i32 = arith.constant 0 : i32
    %c0_i32_0 = arith.constant 0 : i32
    %c0_i32_1 = arith.constant 0 : i32
    %c0_i32_2 = arith.constant 0 : i32
    return %c0_i32, %c0_i32_0, %c0_i32_1 : i32, i32, i32
  }
  func.func @transform_7(%arg0: i32) -> (i32, i32, i32) {
    %c0_i32 = arith.constant 0 : i32
    %c0_i32_0 = arith.constant 0 : i32
    %c0_i32_1 = arith.constant 0 : i32
    %c0_i32_2 = arith.constant 0 : i32
    return %c0_i32, %c0_i32_0, %c0_i32_1 : i32, i32, i32
  }
  func.func @transform_8(%arg0: i32) -> (i32, i32, i32) {
    %c0_i32 = arith.constant 0 : i32
    %c0_i32_0 = arith.constant 0 : i32
    %c0_i32_1 = arith.constant 0 : i32
    %c0_i32_2 = arith.constant 0 : i32
    return %c0_i32, %c0_i32_0, %c0_i32_1 : i32, i32, i32
  }
  func.func @transform_9(%arg0: i32) -> (i32, i32, i32) {
    %c0_i32 = arith.constant 0 : i32
    %c0_i32_0 = arith.constant 0 : i32
    %c0_i32_1 = arith.constant 0 : i32
    %c0_i32_2 = arith.constant 0 : i32
    return %c0_i32, %c0_i32_0, %c0_i32_1 : i32, i32, i32
  }
  func.func @transform_10(%arg0: i32) -> (i32, i32, i32) {
    %c0_i32 = arith.constant 0 : i32
    %c0_i32_0 = arith.constant 0 : i32
    %c0_i32_1 = arith.constant 0 : i32
    %c0_i32_2 = arith.constant 0 : i32
    return %c0_i32, %c0_i32_0, %c0_i32_1 : i32, i32, i32
  }
  func.func @transform_11(%arg0: i32) -> (i32, i32, i32) {
    %c0_i32 = arith.constant 0 : i32
    %c0_i32_0 = arith.constant 0 : i32
    %c0_i32_1 = arith.constant 0 : i32
    %c0_i32_2 = arith.constant 0 : i32
    return %c0_i32, %c0_i32_0, %c0_i32_1 : i32, i32, i32
  }
  func.func @transform_12(%arg0: i32) -> (i32, i32, i32) {
    %c0_i32 = arith.constant 0 : i32
    %c0_i32_0 = arith.constant 0 : i32
    %c0_i32_1 = arith.constant 0 : i32
    %c0_i32_2 = arith.constant 0 : i32
    return %c0_i32, %c0_i32_0, %c0_i32_1 : i32, i32, i32
  }
  func.func @transform_13(%arg0: i32) -> (i32, i32) {
    %c0_i32 = arith.constant 0 : i32
    %c0_i32_0 = arith.constant 0 : i32
    %c0_i32_1 = arith.constant 0 : i32
    return %c0_i32, %c0_i32_0 : i32, i32
  }
  func.func @transform_14(%arg0: i32) -> (i32, i32) {
    %c0_i32 = arith.constant 0 : i32
    %c0_i32_0 = arith.constant 0 : i32
    %c0_i32_1 = arith.constant 0 : i32
    return %c0_i32, %c0_i32_0 : i32, i32
  }
  func.func @transform_15(%arg0: i32) -> (i32, i32) {
    %c0_i32 = arith.constant 0 : i32
    %c0_i32_0 = arith.constant 0 : i32
    %c0_i32_1 = arith.constant 0 : i32
    return %c0_i32, %c0_i32_0 : i32, i32
  }
  func.func @transform_16(%arg0: i32) -> (i32, i32) {
    %c0_i32 = arith.constant 0 : i32
    %c0_i32_0 = arith.constant 0 : i32
    %c0_i32_1 = arith.constant 0 : i32
    return %c0_i32, %c0_i32_0 : i32, i32
  }
  func.func @transform_17(%arg0: i32) -> (i32, i32) {
    %c0_i32 = arith.constant 0 : i32
    %c0_i32_0 = arith.constant 0 : i32
    %c0_i32_1 = arith.constant 0 : i32
    return %c0_i32, %c0_i32_0 : i32, i32
  }
  func.func @transform_18(%arg0: i32) -> (i32, i32) {
    %c0_i32 = arith.constant 0 : i32
    %c0_i32_0 = arith.constant 0 : i32
    %c0_i32_1 = arith.constant 0 : i32
    return %c0_i32, %c0_i32_0 : i32, i32
  }
  func.func @transform_19(%arg0: i32) -> (i32, i32) {
    %c0_i32 = arith.constant 0 : i32
    %c0_i32_0 = arith.constant 0 : i32
    %c0_i32_1 = arith.constant 0 : i32
    return %c0_i32, %c0_i32_0 : i32, i32
  }
  func.func @transform_20(%arg0: i32) -> (i32, i32) {
    %c0_i32 = arith.constant 0 : i32
    %c0_i32_0 = arith.constant 0 : i32
    %c0_i32_1 = arith.constant 0 : i32
    return %c0_i32, %c0_i32_0 : i32, i32
  }
  func.func @transform_21(%arg0: i32) -> (i32, i32) {
    %c0_i32 = arith.constant 0 : i32
    %c0_i32_0 = arith.constant 0 : i32
    return %arg0, %c0_i32 : i32, i32
  }
}

</mosaic_0001>

<bundles_post_ra>
// kernel: tpu_custom_call.1
= control target key start
LH: loop header
LB: loop body
LE: loop exit
PB: predicated region body
PF: predicated region fallthrough
CT: control target
= control target key end

     0   :  { %s4106_s0 = inlined_call_operand.vmem [shape: bf16[48,64], index: 0, kind: input, shape index: {}]   ;;  %s4107_s1 = inlined_call_operand.vmem [shape: bf16[64,32], index: 1, kind: input, shape index: {}]   ;;  %s4108_s2 = inlined_call_operand.vmem [shape: f32[24,32], index: 2, kind: input, shape index: {}]   ;;  %s4109_s3 = inlined_call_operand.hbm [shape: f32[2,1,32], index: 3, kind: input, shape index: {}]   ;;  %s4110_s4 = inlined_call_operand.hbm [shape: f32[2,1,32], index: 4, kind: input, shape index: {}]   ;;  %s4111_s5 = inlined_call_operand.vmem [shape: bf16[2,32,32], index: 5, kind: input, shape index: {}]   ;;  %s4112_s6 = inlined_call_operand.hbm [shape: f32[2,1,32], index: 6, kind: input, shape index: {}]   ;;  %s4113_s7 = inlined_call_operand.hbm [shape: f32[2,1,32], index: 7, kind: input, shape index: {}]   ;;  %s4114_s8 = inlined_call_operand.hbm [shape: f32[2,1,32], index: 8, kind: input, shape index: {}]   ;;  %s4115_s9 = inlined_call_operand.vmem [shape: bf16[2,32,64], index: 9, kind: input, shape index: {}]   ;;  %s4116_s10 = inlined_call_operand.hbm [shape: f32[2,1,64], index: 10, kind: input, shape index: {}]   ;;  %s4117_s11 = inlined_call_operand.vmem [shape: bf16[2,64,32], index: 11, kind: input, shape index: {}]   ;;  %s4118_s12 = inlined_call_operand.hbm [shape: f32[2,1,32], index: 12, kind: input, shape index: {}]   ;;  %s4119_s13 = inlined_call_operand.hbm [shape: f32[1,32], index: 13, kind: input, shape index: {}]   ;;  %s4120_s14 = inlined_call_operand.hbm [shape: f32[1,32], index: 14, kind: input, shape index: {}]   ;;  %s4121_s15 = inlined_call_operand.hbm [shape: f32[1,32], index: 15, kind: input, shape index: {}]   ;;  %s4122_s16 = inlined_call_operand.hbm [shape: f32[1,32], index: 16, kind: input, shape index: {}]   ;;  %s4123_s17 = inlined_call_operand.vmem [shape: bf16[32,32], index: 17, kind: input, shape index: {}]   ;;  %s4124_s18 = inlined_call_operand.hbm [shape: f32[1,32], index: 18, kind: input, shape index: {}]   ;;  %s4125_s19 = inlined_call_operand.vmem [shape: bf16[32,128], index: 19, kind: input, shape index: {}]   ;;  %s4126_s20 = inlined_call_operand.vmem [shape: f32[1,128], index: 20, kind: input, shape index: {}]   ;;  %s4127_s21 = inlined_call_operand.hbm [shape: f32[2,128], index: 21, kind: output, shape index: {}]  }
   0x1   :  { %4132 = sst [smem:[#allocation31_spill]] %s4106_s0 }
   0x2   :  { %4133 = sst [smem:[#allocation32_spill]] %s4107_s1 }
   0x3   :  { %4134 = sst [smem:[#allocation33_spill]] %s4108_s2 }
   0x4   :  { %4135 = sst [smem:[#allocation34_spill]] %s4109_s3 }
   0x5   :  { %4136 = sst [smem:[#allocation35_spill]] %s4110_s4 }
   0x6   :  { %4137 = sst [smem:[#allocation36_spill]] %s4111_s5 }
   0x7   :  { %26 = vsyncpa [#allocation3], 0 }
   0x8   :  { %27 = vsyncpa [#allocation6], 0 }
   0x9   :  { %28 = vsyncpa [#allocation9], 0 }
   0xa   :  { %29 = vsyncpa [#allocation12], 0 }
   0xb   :  { %30 = vsyncpa [#allocation15], 0 }
   0xc   :  { %31 = vsyncpa [#allocation18], 0 }
   0xd   :  { %32 = vsyncpa [#allocation21], 0 }
   0xe   :  { %33 = vsyncpa [#allocation4], 0  ;;  %s3409_s2 = smov [#allocation5]   ;;  %s3410_s26 = smov [#allocation8]  }
   0xf   :  { %s57_s25 = sshll.u32 %s3409_s2, 4  ;;  %s83_s27 = sshll.u32 %s3410_s26, 4  ;;  %s58_s25 = int_to_ptr.vmem [resolvable:$true] %s57_s25  ;;  %s84_s27 = int_to_ptr.vmem [resolvable:$true] %s83_s27 }
  0x10   :  { %s3141_s3 = scalar_lea.vmem %s58_s25, 32  ;;  %p3146_p1 = scmp.lt.s32.totalorder %s58_s25, %s58_s25 }
  0x11   :  { %p3142_p0 = scmp.ne.s32.totalorder %s58_s25, %s3141_s3  ;;  %p3147_p2 = scmp.lt.s32.totalorder %s3141_s3, %s3141_s3 }
  0x13   :  { %p3148_p3 = por %p3147_p2, %p3146_p1 }
  0x15   :  { %p3149_p4 = pnand %p3148_p3, %p3142_p0 }
  0x17   :  { %3152 = shalt.err (!%p3149_p4)
}
  0x18   :  { %s3411_s28 = smov 16   ;;  %s3412_s29 = smov 1  }
  0x19   :  { %s4138_s30 = sld [smem:[#allocation35_spill]]  ;;  %s3161_s5 = scalar_lea.vmem %s84_s27, 32 }
  0x1a   :  { %p3162_p5 = scmp.ne.s32.totalorder %s84_s27, %s3161_s5  ;;  %p3166_p6 = scmp.lt.s32.totalorder %s84_s27, %s84_s27 }
  0x1b   :  { %p3167_p7 = scmp.lt.s32.totalorder %s3161_s5, %s3161_s5 }
  0x1d   :  { %p3168_p8 = por %p3167_p7, %p3166_p6 }
  0x1f   :  { %63 = dma.hbm_to_vmem [thread:$0]  %s4138_s30, 32, %s58_s25, [#allocation6], %s3411_s28, %s3411_s28, %s3412_s29  }
  0x20   :  { %p3169_p9 = pnand %p3168_p8, %p3162_p5 }
  0x22   :  { %3172 = shalt.err (!%p3169_p9)
}
  0x23   :  { %89 = dma.hbm_to_vmem [thread:$0]  %s4113_s7, 32, %s84_s27, [#allocation9], %s3411_s28, %s3411_s28, %s3412_s29  }
  0x24   :  { %s3413_s1 = smov [#allocation11]   ;;  %s3414_s2 = smov [#allocation14]  }
  0x25   :  { %s109_s24 = sshll.u32 %s3413_s1, 4  ;;  %s136_s26 = sshll.u32 %s3414_s2, 4  ;;  %s110_s24 = int_to_ptr.vmem [resolvable:$true] %s109_s24  ;;  %s137_s26 = int_to_ptr.vmem [resolvable:$true] %s136_s26 }
  0x26   :  { %s3181_s25 = scalar_lea.vmem %s110_s24, 32  ;;  %p3186_p11 = scmp.lt.s32.totalorder %s110_s24, %s110_s24 }
  0x27   :  { %p3182_p10 = scmp.ne.s32.totalorder %s110_s24, %s3181_s25  ;;  %p3187_p12 = scmp.lt.s32.totalorder %s3181_s25, %s3181_s25 }
  0x29   :  { %p3188_p13 = por %p3187_p12, %p3186_p11 }
  0x2b   :  { %p3189_p0 = pnand %p3188_p13, %p3182_p10 }
  0x2d   :  { %3192 = shalt.err (!%p3189_p0)
}
  0x2e   :  { %115 = dma.hbm_to_vmem [thread:$0]  %s4116_s10, 32, %s110_s24, [#allocation12], %s3411_s28, %s3411_s28, %s3412_s29  }
  0x2f   :  { %s3201_s7 = scalar_lea.vmem %s137_s26, 16  ;;  %s3205_s27 = scalar_lea.vmem %s137_s26, 32 }
  0x30   :  { %p3202_p1 = scmp.ne.s32.totalorder %s137_s26, %s3201_s7  ;;  %p3206_p2 = scmp.lt.s32.totalorder %s137_s26, %s137_s26 }
  0x31   :  { %p3207_p3 = scmp.lt.s32.totalorder %s3205_s27, %s3201_s7 }
  0x33   :  { %p3208_p4 = por %p3207_p3, %p3206_p2 }
  0x35   :  { %p3209_p5 = pnand %p3208_p4, %p3202_p1 }
  0x37   :  { %3212 = shalt.err (!%p3209_p5)
}
  0x38   :  { %139 = dma.hbm_to_vmem [thread:$0]  %s4119_s13, 16, %s137_s26, [#allocation15]  }
  0x39   :  { %s3415_s5 = smov [#allocation17]   ;;  %s3416_s23 = smov [#allocation2]  }
  0x3a   :  { %s156_s22 = sshll.u32 %s3415_s5, 4  ;;  %s45_s1 = sshll.u32 %s3416_s23, 4  ;;  %s157_s22 = int_to_ptr.vmem [resolvable:$true] %s156_s22  ;;  %s46_s1 = int_to_ptr.vmem [resolvable:$true] %s45_s1 }
  0x3b   :  { %s3221_s2 = scalar_lea.vmem %s157_s22, 16  ;;  %s3225_s10 = scalar_lea.vmem %s157_s22, 32 }
  0x3c   :  { %p3222_p6 = scmp.ne.s32.totalorder %s157_s22, %s3221_s2  ;;  %p3226_p7 = scmp.lt.s32.totalorder %s157_s22, %s157_s22 }
  0x3d   :  { %p3227_p8 = scmp.lt.s32.totalorder %s3225_s10, %s3221_s2 }
  0x3f   :  { %p3228_p9 = por %p3227_p8, %p3226_p7 }
  0x41   :  { %p3229_p10 = pnand %p3228_p9, %p3222_p6 }
  0x43   :  { %3232 = shalt.err (!%p3229_p10)
}
  0x44   :  { %159 = dma.hbm_to_vmem [thread:$0]  %s4121_s15, 16, %s157_s22, [#allocation18]  }
  0x45   :  { %s3241_s3 = scalar_lea.vmem %s46_s1, 32  ;;  %p3246_p12 = scmp.lt.s32.totalorder %s46_s1, %s46_s1 }
  0x46   :  { %p3242_p11 = scmp.ne.s32.totalorder %s46_s1, %s3241_s3  ;;  %p3247_p13 = scmp.lt.s32.totalorder %s3241_s3, %s3241_s3 }
  0x48   :  { %p3248_p0 = por %p3247_p13, %p3246_p12 }
  0x4a   :  { %p3249_p1 = pnand %p3248_p0, %p3242_p11 }
  0x4c   :  { %3252 = shalt.err (!%p3249_p1)
}
  0x4d   :  { %s4139_s0 = sld [smem:[#allocation34_spill]]  ;;  %s3417_s7 = smov [#allocation7]  }
  0x4e   :  { %s71_s27 = sshll.u32 %s3417_s7, 4  ;;  %s3418_s4 = smov [#allocation10]   ;;  %s72_s27 = int_to_ptr.vmem [resolvable:$true] %s71_s27 }
  0x4f   :  { %s95_s30 = sshll.u32 %s3418_s4, 4  ;;  %s3261_s15 = scalar_lea.vmem %s72_s27, 32  ;;  %s96_s30 = int_to_ptr.vmem [resolvable:$true] %s95_s30 }
  0x50   :  { %p3262_p2 = scmp.ne.s32.totalorder %s72_s27, %s3261_s15  ;;  %p3266_p3 = scmp.lt.s32.totalorder %s72_s27, %s72_s27 }
  0x51   :  { %p3267_p4 = scmp.lt.s32.totalorder %s3261_s15, %s3261_s15 }
  0x53   :  { %51 = dma.hbm_to_vmem [thread:$0]  %s4139_s0, 32, %s46_s1, [#allocation3], %s3411_s28, %s3411_s28, %s3412_s29  }
  0x54   :  { %p3268_p5 = por %p3267_p4, %p3266_p3 }
  0x56   :  { %p3269_p6 = pnand %p3268_p5, %p3262_p2 }
  0x58   :  { %3272 = shalt.err (!%p3269_p6)
}
  0x59   :  { %77 = dma.hbm_to_vmem [thread:$0]  %s4112_s6, 32, %s72_s27, [#allocation6], %s3411_s28, %s3411_s28, %s3412_s29  }
  0x5a   :  { %s3281_s23 = scalar_lea.vmem %s96_s30, 32  ;;  %p3286_p8 = scmp.lt.s32.totalorder %s96_s30, %s96_s30 }
  0x5b   :  { %p3282_p7 = scmp.ne.s32.totalorder %s96_s30, %s3281_s23  ;;  %p3287_p9 = scmp.lt.s32.totalorder %s3281_s23, %s3281_s23 }
  0x5d   :  { %p3288_p10 = por %p3287_p9, %p3286_p8 }
  0x5f   :  { %p3289_p11 = pnand %p3288_p10, %p3282_p7 }
  0x61   :  { %3292 = shalt.err (!%p3289_p11)
}
  0x62   :  { %101 = dma.hbm_to_vmem [thread:$0]  %s4114_s8, 32, %s96_s30, [#allocation9], %s3411_s28, %s3411_s28, %s3412_s29  }
  0x63   :  { %s3419_s10 = smov [#allocation13]   ;;  %s3420_s25 = smov [#allocation16]  }
  0x64   :  { %s123_s24 = sshll.u32 %s3419_s10, 4  ;;  %s146_s3 = sshll.u32 %s3420_s25, 4  ;;  %s124_s24 = int_to_ptr.vmem [resolvable:$true] %s123_s24  ;;  %s147_s3 = int_to_ptr.vmem [resolvable:$true] %s146_s3 }
  0x65   :  { %s3301_s6 = scalar_lea.vmem %s124_s24, 32  ;;  %p3306_p13 = scmp.lt.s32.totalorder %s124_s24, %s124_s24 }
  0x66   :  { %p3302_p12 = scmp.ne.s32.totalorder %s124_s24, %s3301_s6  ;;  %p3307_p0 = scmp.lt.s32.totalorder %s3301_s6, %s3301_s6 }
  0x68   :  { %p3308_p1 = por %p3307_p0, %p3306_p13 }
  0x6a   :  { %p3309_p2 = pnand %p3308_p1, %p3302_p12 }
  0x6c   :  { %3312 = shalt.err (!%p3309_p2)
}
  0x6d   :  { %129 = dma.hbm_to_vmem [thread:$0]  %s4118_s12, 32, %s124_s24, [#allocation12], %s3411_s28, %s3411_s28, %s3412_s29  }
  0x6e   :  { %s3321_s8 = scalar_lea.vmem %s147_s3, 16  ;;  %s3325_s0 = scalar_lea.vmem %s147_s3, 32 }
  0x6f   :  { %p3322_p3 = scmp.ne.s32.totalorder %s147_s3, %s3321_s8  ;;  %p3326_p4 = scmp.lt.s32.totalorder %s147_s3, %s147_s3 }
  0x70   :  { %p3327_p5 = scmp.lt.s32.totalorder %s3325_s0, %s3321_s8 }
  0x72   :  { %p3328_p6 = por %p3327_p5, %p3326_p4 }
  0x74   :  { %p3329_p7 = pnand %p3328_p6, %p3322_p3 }
  0x76   :  { %3332 = shalt.err (!%p3329_p7)
}
  0x77   :  { %149 = dma.hbm_to_vmem [thread:$0]  %s4120_s14, 16, %s147_s3, [#allocation15]  }
  0x78   :  { %s3421_s4 = smov [#allocation19]   ;;  %s3422_s15 = smov [#allocation20]  }
  0x79   :  { %s166_s30 = sshll.u32 %s3421_s4, 4  ;;  %s178_s5 = sshll.u32 %s3422_s15, 4  ;;  %s167_s30 = int_to_ptr.vmem [resolvable:$true] %s166_s30  ;;  %s179_s5 = int_to_ptr.vmem [resolvable:$true] %s178_s5 }
  0x7a   :  { %s3341_s22 = scalar_lea.vmem %s167_s30, 16  ;;  %s3345_s12 = scalar_lea.vmem %s167_s30, 32 }
  0x7b   :  { %p3342_p8 = scmp.ne.s32.totalorder %s167_s30, %s3341_s22  ;;  %p3346_p9 = scmp.lt.s32.totalorder %s167_s30, %s167_s30 }
  0x7c   :  { %p3347_p10 = scmp.lt.s32.totalorder %s3345_s12, %s3341_s22 }
  0x7e   :  { %p3348_p11 = por %p3347_p10, %p3346_p9 }
  0x80   :  { %p3349_p12 = pnand %p3348_p11, %p3342_p8 }
  0x82   :  { %3352 = shalt.err (!%p3349_p12)
}
  0x83   :  { %169 = dma.hbm_to_vmem [thread:$0]  %s4122_s16, 16, %s167_s30, [#allocation18]  }
  0x84   :  { %s3361_s23 = scalar_lea.vmem %s179_s5, 16  ;;  %s3365_s14 = scalar_lea.vmem %s179_s5, 32 }
  0x85   :  { %p3362_p13 = scmp.ne.s32.totalorder %s179_s5, %s3361_s23  ;;  %p3366_p0 = scmp.lt.s32.totalorder %s179_s5, %s179_s5 }
  0x86   :  { %p3367_p1 = scmp.lt.s32.totalorder %s3365_s14, %s3361_s23 }
  0x88   :  { %p3368_p2 = por %p3367_p1, %p3366_p0 }
  0x8a   :  { %p3369_p3 = pnand %p3368_p2, %p3362_p13 }
  0x8c   :  { %3372 = shalt.err (!%p3369_p3)
}
  0x8d   :  { %181 = dma.hbm_to_vmem [thread:$0]  %s4124_s18, 16, %s179_s5, [#allocation21]  }
  0x8e   :  { %3393 = dma.done.wait [#allocation3], 32  }
  0x8f   :  { %3394 = vsyncadd [#allocation3], 4294967264 }
  0x90   :  { %3395 = dma.done.wait [#allocation6], 64  }
  0x91   :  { %3396 = vsyncadd [#allocation6], 4294967232 }
  0x92   :  { %3397 = dma.done.wait [#allocation9], 64  }
  0x93   :  { %3398 = vsyncadd [#allocation9], 4294967232 }
  0x94   :  { %3399 = dma.done.wait [#allocation12], 64  }
  0x95   :  { %3400 = vsyncadd [#allocation12], 4294967232 }
  0x96   :  { %3401 = dma.done.wait [#allocation15], 32  }
  0x97   :  { %3402 = vsyncadd [#allocation15], 4294967264 }
  0x98   :  { %3403 = dma.done.wait [#allocation18], 32  }
  0x99   :  { %3404 = vsyncadd [#allocation18], 4294967264 }
  0x9a   :  { %3405 = dma.done.wait [#allocation21], 16  }
  0x9b   :  { %3406 = vsyncadd [#allocation21], 4294967280  ;;  %v3423_v0 = vmov 0.0   ;;  %vm3424_vm0 = vmmov 0   ;;  %s4140_s10 = sld [smem:[#allocation32_spill]]  ;;  %vm276_vm1 = vcmask 523264  }
  0x9c   :  { %2731 = vmatprep.subr.bf16.mxu0 %v3423_v0  ;;  %2739 = vmatprep.mubr.msk.bf16.mxu0 %vm3424_vm0, %v3423_v0  ;;  %s4141_s7 = sld [smem:[#allocation31_spill]]  ;;  %vm357_vm2 = vcmask 261120   ;;  %vm840_vm3 = vcmask 1043456   ;;  %vm795_vm5 = vcmask 195584   ;;  %vm2284_vm6 = vcmask 1041409  }
  0x9d   :  { %2751 = vmatprep.subr.bf16.mxu1 %v3423_v0  ;;  %2755 = vmatprep.mubr.msk.bf16.mxu1 %vm3424_vm0, %v3423_v0  ;;  %s4142_s12 = sld [smem:[#allocation33_spill]]  ;;  %vm2287_vm7 = vcmask 254976  }
  0x9e   :  { %s4143_s16 = sld [smem:[#allocation36_spill]] }
  0xa1   :  { %v2956_v1 = vld [vmem:[%s4140_s10 + $0x18] sm:$0xff]   ;;  %v2957_v2 = vld [vmem:[%s4140_s10 + $0x10] sm:$0xff]   ;;  %v2958_v3 = vld [vmem:[%s4140_s10 + $0x8] sm:$0xff]  }
  0xa2   :  { %2732 = vmatpush3.bf16.msra.mxu0 %v2956_v1  ;;  %v2959_v4 = vld [vmem:[%s4140_s10] sm:$0xff]   ;;  %v2961_v6 = vld [vmem:[%s4141_s7 + $0x8] sm:$0xff]   ;;  %v2962_v7 = vld [vmem:[%s4141_s7 + $0x10] sm:$0xff]  }
  0xa3   :  { %2733 = vmatprep.subr.bf16.mxu0 %v3423_v0  ;;  %v2960_v5 = vld [vmem:[%s4141_s7] sm:$0xff]   ;;  %v344_v12 = vld [vmem:[%s4142_s12 + $0x8] sm:$0xff]  ;;  %v345_v17 = vld [vmem:[%s4142_s12 + $0x10] sm:$0xff] }
  0xa4   :  { %v343_v8 = vld [vmem:[%s4142_s12] sm:$0xff] }
  0xa6   :  { %2734 = vmatpush3.bf16.msra.mxu0 %v2957_v2  ;;  %v2963_v2 = vld [vmem:[%s4143_s16 + $0x8] sm:$0xff]  }
  0xa7   :  { %2735 = vmatprep.subr.bf16.mxu0 %v3423_v0  ;;  %2752 = vmatpush3.bf16.msra.mxu1 %v2963_v2 }
  0xa8   :  { %2753 = vmatprep.subr.bf16.mxu1 %v3423_v0 }
  0xaa   :  { %2736 = vmatpush3.bf16.msra.mxu0 %v2958_v3  ;;  %v2964_v3 = vld [vmem:[%s4143_s16] sm:$0xff]  }
  0xab   :  { %2737 = vmatprep.subr.bf16.mxu0 %v3423_v0  ;;  %2754 = vmatpush3.bf16.msra.mxu1 %v2964_v3 }
  0xae   :  { %2738 = vmatpush3.bf16.msra.mxu0 %v2959_v4 }
  0xb1   :  { %2740 = vmatmul.mubr.msk.bf16.vlgmr.msra.gmra.mxu0 %vm276_vm1, %v2960_v5 }
  0xb2   :  { %2743 = vmatprep.mubr.msk.bf16.mxu0 %vm3424_vm0, %v3423_v0 }
  0xb9   :  { %2744 = vmatmul.mubr.msk.bf16.gmra.mxu0 %vm276_vm1, %v2961_v6 }
  0xba   :  { %2747 = vmatprep.mubr.msk.bf16.mxu0 %vm3424_vm0, %v3423_v0 }
  0xc1   :  { %2748 = vmatmul.mubr.msk.bf16.gmra.mxu0 %vm276_vm1, %v2962_v7 }
 0x171   :  { %v320_v9 = vpop.f32.mrf.mxu0 }
 0x172   :  { %v3633_v10 = vadd.f32 %v343_v8, %v320_v9 }
 0x173   :  { %v2741_v11 = vpop.f32.mrf.mxu0 }
 0x174   :  { %v358_v13 = vsel %vm357_vm2, %v3633_v10, 0.0 }
 0x175   :  { %359 = vadd.xlane.f32.xlu0 %v358_v13  ;;  %v323_v14 = vpop.f32.mrf.mxu0 }
 0x176   :  { %v3640_v15 = vadd.f32 %v344_v12, %v323_v14 }
 0x177   :  { %v2742_v16 = vpop.f32.mrf.mxu0 }
 0x178   :  { %v361_v18 = vsel %vm357_vm2, %v3640_v15, 0.0 }
 0x179   :  { %362 = vadd.xlane.f32.xlu0 %v361_v18  ;;  %v328_v19 = vpop.f32.mrf.mxu0 }
 0x17a   :  { %v3647_v20 = vadd.f32 %v345_v17, %v328_v19 }
 0x17b   :  { %v2745_v21 = vpop.f32.mrf.mxu0 }
 0x17c   :  { %v364_v22 = vsel %vm357_vm2, %v3647_v20, 0.0 }
 0x17d   :  { %365 = vadd.xlane.f32.xlu1 %v364_v22  ;;  %v331_v23 = vpop.f32.mrf.mxu0  ;;  %v2560_v22 = vld [vmem:[#allocation2] ss:$0 sm:$0xff] }
 0x17e   :  { %v3651_v24 = vadd.f32 %v343_v8, %v331_v23 }
 0x17f   :  { %v2746_v25 = vpop.f32.mrf.mxu0 }
 0x180   :  { %v367_v26 = vsel %vm357_vm2, %v3651_v24, 0.0 }
 0x181   :  { %368 = vadd.xlane.f32.xlu1 %v367_v26  ;;  %v336_v27 = vpop.f32.mrf.mxu0 }
 0x182   :  { %v3655_v28 = vadd.f32 %v344_v12, %v336_v27  ;;  %v2561_v27 = vld [vmem:[#allocation5] ss:$0 sm:$0xff] }
 0x183   :  { %v2749_v29 = vpop.f32.mrf.mxu0 }
 0x184   :  { %v370_v30 = vsel %vm357_vm2, %v3655_v28, 0.0 }
 0x185   :  { %371 = vadd.xlane.f32.xlu0 %v370_v30  ;;  %v339_v31 = vpop.f32.mrf.mxu0 }
 0x186   :  { %v3659_v32 = vadd.f32 %v345_v17, %v339_v31 }
 0x187   :  { %v2750_v33 = vpop.f32.mrf.mxu0 }
 0x188   :  { %v373_v34 = vsel %vm357_vm2, %v3659_v32, 0.0 }
 0x189   :  { %374 = vadd.xlane.f32.xlu1 %v373_v34 }
 0x1fe   :  { %v360_v35 = vpop.xlane.xlu0 %359 }
 0x1ff   :  { %v377_v36 = vmul.f32 0.03125, %v360_v35 }
 0x201   :  { %v383_v37 = vsub.f32 %v3633_v10, %v377_v36 }
 0x202   :  { %v363_v38 = vpop.xlane.xlu0 %362 }
 0x203   :  { %v378_v39 = vmul.f32 0.03125, %v363_v38  ;;  %v389_v40 = vmul.f32 %v383_v37, %v383_v37 }
 0x205   :  { %v3665_v41 = vsub.f32 %v3640_v15, %v378_v39  ;;  %v395_v42 = vsel %vm357_vm2, %v389_v40, 0.0 }
 0x206   :  { %v366_v43 = vpop.xlane.xlu1 %365  ;;  %396 = vadd.xlane.f32.xlu0 %v395_v42 }
 0x207   :  { %v379_v44 = vmul.f32 0.03125, %v366_v43  ;;  %v390_v45 = vmul.f32 %v3665_v41, %v3665_v41 }
 0x209   :  { %v3671_v46 = vsub.f32 %v3647_v20, %v379_v44  ;;  %v398_v47 = vsel %vm357_vm2, %v390_v45, 0.0 }
 0x20a   :  { %v369_v48 = vpop.xlane.xlu1 %368  ;;  %399 = vadd.xlane.f32.xlu1 %v398_v47 }
 0x20b   :  { %v380_v49 = vmul.f32 0.03125, %v369_v48  ;;  %v391_v50 = vmul.f32 %v3671_v46, %v3671_v46 }
 0x20d   :  { %v3677_v51 = vsub.f32 %v3651_v24, %v380_v49  ;;  %v401_v52 = vsel %vm357_vm2, %v391_v50, 0.0 }
 0x20e   :  { %402 = vadd.xlane.f32.xlu0 %v401_v52  ;;  %v372_v53 = vpop.xlane.xlu0 %371 }
 0x20f   :  { %v381_v54 = vmul.f32 0.03125, %v372_v53  ;;  %v392_v55 = vmul.f32 %v3677_v51, %v3677_v51 }
 0x211   :  { %v3683_v56 = vsub.f32 %v3655_v28, %v381_v54  ;;  %v404_v57 = vsel %vm357_vm2, %v392_v55, 0.0 }
 0x212   :  { %405 = vadd.xlane.f32.xlu1 %v404_v57  ;;  %v375_v58 = vpop.xlane.xlu1 %374 }
 0x213   :  { %v382_v59 = vmul.f32 0.03125, %v375_v58  ;;  %v393_v60 = vmul.f32 %v3683_v56, %v3683_v56 }
 0x215   :  { %v3689_v61 = vsub.f32 %v3659_v32, %v382_v59  ;;  %v407_v62 = vsel %vm357_vm2, %v393_v60, 0.0 }
 0x216   :  { %408 = vadd.xlane.f32.xlu0 %v407_v62 }
 0x217   :  { %v394_v63 = vmul.f32 %v3689_v61, %v3689_v61 }
 0x219   :  { %v410_v1 = vsel %vm357_vm2, %v394_v63, 0.0 }
 0x21a   :  { %411 = vadd.xlane.f32.xlu1 %v410_v1 }
 0x28f   :  { %v397_v4 = vpop.xlane.xlu0 %396 }
 0x290   :  { %v413_v5 = vmul.f32 0.03125, %v397_v4 }
 0x292   :  { %v419_v6 = vadd.f32 1e-05, %v413_v5 }
 0x293   :  { %v400_v7 = vpop.xlane.xlu1 %399 }
 0x294   :  { %2983 = vrsqrt.f32 %v419_v6  ;;  %v414_v8 = vmul.f32 0.03125, %v400_v7 }
 0x296   :  { %v420_v9 = vadd.f32 1e-05, %v414_v8 }
 0x297   :  { %v403_v11 = vpop.xlane.xlu0 %402 }
 0x298   :  { %2985 = vrsqrt.f32 %v420_v9  ;;  %v415_v12 = vmul.f32 0.03125, %v403_v11 }
 0x29a   :  { %v421_v13 = vadd.f32 1e-05, %v415_v12 }
 0x29b   :  { %v406_v14 = vpop.xlane.xlu1 %405 }
 0x29c   :  { %2987 = vrsqrt.f32 %v421_v13  ;;  %v416_v16 = vmul.f32 0.03125, %v406_v14 }
 0x29e   :  { %v422_v17 = vadd.f32 1e-05, %v416_v16 }
 0x29f   :  { %v409_v18 = vpop.xlane.xlu0 %408 }
 0x2a0   :  { %2989 = vrsqrt.f32 %v422_v17  ;;  %v417_v19 = vmul.f32 0.03125, %v409_v18 }
 0x2a1   :  { %v2984_v21 = vpop.eup %2983 }
 0x2a2   :  { %v423_v23 = vadd.f32 1e-05, %v417_v19  ;;  %v431_v25 = vmul.f32 %v2984_v21, %v383_v37 }
 0x2a3   :  { %v412_v26 = vpop.xlane.xlu1 %411 }
 0x2a4   :  { %2991 = vrsqrt.f32 %v423_v23  ;;  %v418_v29 = vmul.f32 0.03125, %v412_v26  ;;  %v443_v30 = vmul.f32 %v2560_v22, %v431_v25 }
 0x2a5   :  { %v2986_v31 = vpop.eup %2985 }
 0x2a6   :  { %v432_v33 = vmul.f32 %v2986_v31, %v3665_v41  ;;  %v424_v34 = vadd.f32 1e-05, %v418_v29  ;;  %v455_v35 = vadd.f32 %v2561_v27, %v443_v30 }
 0x2a8   :  { %2993 = vrsqrt.f32 %v424_v34  ;;  %v553_v36 = vmul.f32 %v455_v35, %v455_v35  ;;  %v444_v38 = vmul.f32 %v2560_v22, %v432_v33 }
 0x2a9   :  { %v2988_v39 = vpop.eup %2987 }
 0x2aa   :  { %v559_v40 = vsel %vm357_vm2, %v553_v36, 0.0  ;;  %v456_v42 = vadd.f32 %v2561_v27, %v444_v38  ;;  %v433_v43 = vmul.f32 %v2988_v39, %v3671_v46 }
 0x2ab   :  { %560 = vadd.xlane.f32.xlu0 %v559_v40  ;;  %v2562_v40 = vld [vmem:[#allocation7] ss:$0 sm:$0xff] }
 0x2ac   :  { %v465_v37 = vpack.c.bf16 %v456_v42, %v455_v35  ;;  %v554_v44 = vmul.f32 %v456_v42, %v456_v42  ;;  %v445_v45 = vmul.f32 %v2560_v22, %v433_v43 }
 0x2ad   :  { %v2990_v47 = vpop.eup %2989 }
 0x2ae   :  { %v434_v48 = vmul.f32 %v2990_v47, %v3677_v51  ;;  %2756 = vmatmul.mubr.msk.bf16.vlgmr.msra.gmra.mxu1 %vm357_vm2, %v465_v37  ;;  %v562_v41 = vsel %vm357_vm2, %v554_v44, 0.0  ;;  %v457_v49 = vadd.f32 %v2561_v27, %v445_v45 }
 0x2af   :  { %563 = vadd.xlane.f32.xlu1 %v562_v41  ;;  %2759 = vmatprep.mubr.msk.bf16.mxu1 %vm3424_vm0, %v3423_v0 }
 0x2b0   :  { %v555_v50 = vmul.f32 %v457_v49, %v457_v49  ;;  %v446_v52 = vmul.f32 %v2560_v22, %v434_v48 }
 0x2b1   :  { %v2992_v53 = vpop.eup %2991 }
 0x2b2   :  { %v565_v46 = vsel %vm357_vm2, %v555_v50, 0.0  ;;  %v458_v54 = vadd.f32 %v2561_v27, %v446_v52  ;;  %v435_v55 = vmul.f32 %v2992_v53, %v3683_v56 }
 0x2b3   :  { %566 = vadd.xlane.f32.xlu0 %v565_v46 }
 0x2b4   :  { %v466_v57 = vpack.c.bf16 %v458_v54, %v457_v49  ;;  %v556_v51 = vmul.f32 %v458_v54, %v458_v54  ;;  %v447_v58 = vmul.f32 %v2560_v22, %v435_v55 }
 0x2b5   :  { %v2994_v59 = vpop.eup %2993 }
 0x2b6   :  { %v436_v60 = vmul.f32 %v2994_v59, %v3689_v61  ;;  %2760 = vmatmul.mubr.msk.bf16.gmra.mxu1 %vm357_vm2, %v466_v57  ;;  %v568_v62 = vsel %vm357_vm2, %v556_v51, 0.0  ;;  %v459_v63 = vadd.f32 %v2561_v27, %v447_v58 }
 0x2b7   :  { %569 = vadd.xlane.f32.xlu1 %v568_v62  ;;  %2763 = vmatprep.mubr.msk.bf16.mxu1 %vm3424_vm0, %v3423_v0 }
 0x2b8   :  { %v557_v1 = vmul.f32 %v459_v63, %v459_v63  ;;  %v448_v2 = vmul.f32 %v2560_v22, %v436_v60 }
 0x2ba   :  { %v571_v56 = vsel %vm357_vm2, %v557_v1, 0.0  ;;  %v460_v3 = vadd.f32 %v2561_v27, %v448_v2 }
 0x2bb   :  { %572 = vadd.xlane.f32.xlu0 %v571_v56 }
 0x2bc   :  { %v467_v4 = vpack.c.bf16 %v460_v3, %v459_v63  ;;  %v558_v5 = vmul.f32 %v460_v3, %v460_v3 }
 0x2be   :  { %2764 = vmatmul.mubr.msk.bf16.gmra.mxu1 %vm357_vm2, %v467_v4  ;;  %v574_v61 = vsel %vm357_vm2, %v558_v5, 0.0 }
 0x2bf   :  { %575 = vadd.xlane.f32.xlu1 %v574_v61 }
 0x334   :  { %v561_v6 = vpop.xlane.xlu0 %560 }
 0x335   :  { %v577_v7 = vmax.f32 %v561_v6, 1e-24 }
 0x337   :  { %2995 = vrsqrt.f32 %v577_v7 }
 0x338   :  { %v564_v8 = vpop.xlane.xlu1 %563 }
 0x339   :  { %v578_v9 = vmax.f32 %v564_v8, 1e-24 }
 0x33b   :  { %2997 = vrsqrt.f32 %v578_v9 }
 0x33c   :  { %v567_v11 = vpop.xlane.xlu0 %566 }
 0x33d   :  { %v579_v12 = vmax.f32 %v567_v11, 1e-24 }
 0x33f   :  { %2999 = vrsqrt.f32 %v579_v12 }
 0x340   :  { %v570_v13 = vpop.xlane.xlu1 %569 }
 0x341   :  { %v580_v14 = vmax.f32 %v570_v13, 1e-24 }
 0x343   :  { %3001 = vrsqrt.f32 %v580_v14 }
 0x344   :  { %v2996_v16 = vpop.eup %2995  ;;  %v573_v17 = vpop.xlane.xlu0 %572 }
 0x345   :  { %v581_v18 = vmax.f32 %v573_v17, 1e-24  ;;  %v589_v19 = vmul.f32 %v2996_v16, %v455_v35 }
 0x347   :  { %3003 = vrsqrt.f32 %v581_v18  ;;  %595 = vxpose.xlu0.b32.start [1/3] (short) (narrow) %v589_v19, 32 }
 0x348   :  { %v2998_v21 = vpop.eup %2997  ;;  %v576_v22 = vpop.xlane.xlu1 %575 }
 0x349   :  { %v590_v23 = vmul.f32 %v2998_v21, %v456_v42  ;;  %v582_v25 = vmax.f32 %v576_v22, 1e-24 }
 0x34b   :  { %v659_v26 = vpack.c.bf16 %v590_v23, %v589_v19  ;;  %3005 = vrsqrt.f32 %v582_v25  ;;  %596 = vxpose.xlu0.b32.cont [2/3] (short) (narrow) %v590_v23, 32  ;;  %v352_v25 = vlaneseq }
 0x34c   :  { %v3000_v27 = vpop.eup %2999 }
 0x34d   :  { %2771 = vmatprep.mubr.msk.bf16.mxu1 %vm357_vm2, %v659_v26  ;;  %v591_v29 = vmul.f32 %v3000_v27, %v457_v49 }
 0x34f   :  { %597 = vxpose.xlu0.b32.end [3/3] (short) (narrow) %v591_v29, 32  ;;  %v660_v61 = vpack.c.bf16 %v591_v29, %v591_v29 }
 0x350   :  { %v3002_v30 = vpop.eup %3001 }
 0x351   :  { %v592_v31 = vmul.f32 %v3002_v30, %v458_v54  ;;  %v3730_v30 = vand.u32 127, %v352_v25 }
 0x353   :  { %627 = vxpose.xlu1.b32.start [1/3] (short) (narrow) %v592_v31, 32  ;;  %vm354_vm4 = vcmp.lt.s32.totalorder %v3730_v30, 17 }
 0x354   :  { %v3004_v33 = vpop.eup %3003 }
 0x355   :  { %v593_v34 = vmul.f32 %v3004_v33, %v459_v63 }
 0x357   :  { %v661_v35 = vpack.c.bf16 %v593_v34, %v592_v31  ;;  %628 = vxpose.xlu1.b32.cont [2/3] (short) (narrow) %v593_v34, 32 }
 0x358   :  { %v3006_v36 = vpop.eup %3005 }
 0x359   :  { %2779 = vmatprep.mubr.msk.bf16.mxu0 %vm357_vm2, %v661_v35  ;;  %v594_v38 = vmul.f32 %v3006_v36, %v460_v3 }
 0x35b   :  { %629 = vxpose.xlu1.b32.end [3/3] (short) (narrow) %v594_v38, 32  ;;  %v662_v13 = vpack.c.bf16 %v594_v38, %v594_v38 }
 0x36e   :  { %v530_v39 = vpop.f32.mrf.mxu1 }
 0x36f   :  { %v531_v37 = vadd.f32 %v2562_v40, %v530_v39 }
 0x370   :  { %v2757_v42 = vpop.f32.mrf.mxu1 }
 0x372   :  { %v533_v43 = vpop.f32.mrf.mxu1 }
 0x373   :  { %v534_v44 = vadd.f32 %v2562_v40, %v533_v43 }
 0x374   :  { %v2758_v45 = vpop.f32.mrf.mxu1 }
 0x375   :  { %v830_v47 = vpack.c.bf16 %v534_v44, %v531_v37 }
 0x376   :  { %v538_v48 = vpop.f32.mrf.mxu1 }
 0x377   :  { %v539_v2 = vadd.f32 %v2562_v40, %v538_v48 }
 0x378   :  { %v2761_v41 = vpop.f32.mrf.mxu1 }
 0x379   :  { %v831_v4 = vpack.c.bf16 %v539_v2, %v539_v2 }
 0x37a   :  { %v541_v49 = vpop.f32.mrf.mxu1 }
 0x37b   :  { %v542_v53 = vadd.f32 %v2562_v40, %v541_v49  ;;  %v842_v6 = vsel %vm840_vm3, %v831_v4, 0 }
 0x37c   :  { %v2762_v50 = vpop.f32.mrf.mxu1 }
 0x37e   :  { %v546_v52 = vpop.f32.mrf.mxu1 }
 0x37f   :  { %v547_v46 = vadd.f32 %v2562_v40, %v546_v52 }
 0x380   :  { %v2765_v54 = vpop.f32.mrf.mxu1 }
 0x381   :  { %v832_v55 = vpack.c.bf16 %v547_v46, %v542_v53 }
 0x382   :  { %v549_v57 = vpop.f32.mrf.mxu1 }
 0x383   :  { %v550_v9 = vadd.f32 %v2562_v40, %v549_v57 }
 0x384   :  { %v2766_v51 = vpop.f32.mrf.mxu1 }
 0x385   :  { %v833_v12 = vpack.c.bf16 %v550_v9, %v550_v9 }
 0x387   :  { %v899_v14 = vsel %vm840_vm3, %v833_v12, 0 }
 0x3c3   :  { %v611_v58 = vpop.trf.xlu0 }
 0x3c7   :  { %v612_v59 = vpop.trf.xlu0 }
 0x3c8   :  { %v663_v56 = vpack.c.bf16 %v612_v59, %v611_v58 }
 0x3cb   :  { %v613_v60 = vpop.trf.xlu0 }
 0x3cf   :  { %v614_v62 = vpop.trf.xlu0  ;;  %v643_v63 = vpop.trf.xlu1 }
 0x3d0   :  { %v664_v1 = vpack.c.bf16 %v614_v62, %v613_v60 }
 0x3d2   :  { %2767 = vmatprep.subr.bf16.mxu1 %v664_v1 }
 0x3d3   :  { %2768 = vmatpush3.bf16.msra.mxu1 %v664_v1  ;;  %v644_v3 = vpop.trf.xlu1 }
 0x3d4   :  { %2769 = vmatprep.subr.bf16.mxu1 %v663_v56  ;;  %v665_v11 = vpack.c.bf16 %v644_v3, %v643_v63 }
 0x3d7   :  { %2770 = vmatpush3.bf16.msra.mxu1 %v663_v56  ;;  %v645_v5 = vpop.trf.xlu1 }
 0x3d8   :  { %2935 = vmatprep.subr.msk.bf16.mxu1 %vm840_vm3, %v831_v4 }
 0x3da   :  { %2772 = vmatmul.mubr.msk.bf16.vlgmr.msra.gmra.mxu1 %vm357_vm2, %v660_v61 }
 0x3db   :  { %2784 = vmatpush3.bf16.msra.mxu1 %v842_v6  ;;  %v646_v7 = vpop.trf.xlu1 }
 0x3dc   :  { %v666_v8 = vpack.c.bf16 %v646_v7, %v645_v5  ;;  %2785 = vmatprep.subr.bf16.mxu1 %v830_v47 }
 0x3de   :  { %2775 = vmatprep.subr.bf16.mxu0 %v666_v8 }
 0x3df   :  { %2776 = vmatpush3.bf16.msra.mxu0 %v666_v8  ;;  %2786 = vmatpush3.bf16.msra.mxu1 %v830_v47 }
 0x3e0   :  { %2777 = vmatprep.subr.bf16.mxu0 %v665_v11  ;;  %2799 = vmatprep.subr.bf16.mxu1 %v3423_v0 }
 0x3e3   :  { %2778 = vmatpush3.bf16.msra.mxu0 %v665_v11 }
 0x3e4   :  { %2936 = vmatprep.subr.msk.bf16.mxu0 %vm840_vm3, %v833_v12 }
 0x3e6   :  { %2780 = vmatmul.mubr.msk.bf16.vlgmr.msra.gmra.mxu0 %vm357_vm2, %v662_v13 }
 0x3e7   :  { %2792 = vmatpush3.bf16.msra.mxu0 %v899_v14 }
 0x3e8   :  { %2793 = vmatprep.subr.bf16.mxu0 %v832_v55 }
 0x3eb   :  { %2794 = vmatpush3.bf16.msra.mxu0 %v832_v55 }
 0x3ec   :  { %2815 = vmatprep.subr.bf16.mxu0 %v3423_v0 }
 0x49a   :  { %v2773_v16 = vpop.f32.mrf.mxu1 }
 0x49b   :  { %v779_v17 = vmul.f32 1.442695, %v2773_v16 }
 0x49c   :  { %v707_v18 = vpop.f32.mrf.mxu1 }
 0x49d   :  { %v775_v19 = vmul.f32 1.442695, %v707_v18  ;;  %3007 = vpow2.f32 %v779_v17 }
 0x49e   :  { %v2774_v21 = vpop.f32.mrf.mxu1 }
 0x49f   :  { %3009 = vpow2.f32 %v775_v19 }
 0x4a0   :  { %v710_v22 = vpop.f32.mrf.mxu1 }
 0x4a1   :  { %v777_v23 = vmul.f32 1.442695, %v710_v22 }
 0x4a3   :  { %3011 = vpow2.f32 %v777_v23 }
 0x4a6   :  { %v2781_v26 = vpop.f32.mrf.mxu0 }
 0x4a7   :  { %v785_v27 = vmul.f32 1.442695, %v2781_v26 }
 0x4a8   :  { %v761_v29 = vpop.f32.mrf.mxu0 }
 0x4a9   :  { %v781_v31 = vmul.f32 1.442695, %v761_v29  ;;  %3013 = vpow2.f32 %v785_v27 }
 0x4aa   :  { %v2782_v33 = vpop.f32.mrf.mxu0  ;;  %v3008_v34 = vpop.eup %3007 }
 0x4ab   :  { %3015 = vpow2.f32 %v781_v31  ;;  %v791_v42 = vsel %vm354_vm4, %v3008_v34, 0.0 }
 0x4ac   :  { %v3010_v35 = vpop.eup %3009  ;;  %v764_v36 = vpop.f32.mrf.mxu0  ;;  %v802_v44 = vsel %vm795_vm5, %v791_v42, 0.0 }
 0x4ad   :  { %v783_v38 = vmul.f32 1.442695, %v764_v36  ;;  %v789_v39 = vsel %vm354_vm4, %v3010_v35, 0.0 }
 0x4ae   :  { %v796_v40 = vsel %vm795_vm5, %v789_v39, 0.0 }
 0x4af   :  { %3017 = vpow2.f32 %v783_v38  ;;  %797 = vadd.xlane.f32.xlu0 %v796_v40 }
 0x4b0   :  { %v3012_v43 = vpop.eup %3011 }
 0x4b1   :  { %v790_v37 = vsel %vm354_vm4, %v3012_v43, 0.0 }
 0x4b2   :  { %v799_v45 = vsel %vm795_vm5, %v790_v37, 0.0 }
 0x4b3   :  { %803 = vadd.xlane.f32.xlu0 %v802_v44  ;;  %800 = vadd.xlane.f32.xlu1 %v799_v45 }
 0x4b6   :  { %v3014_v47 = vpop.eup %3013 }
 0x4b7   :  { %v794_v50 = vsel %vm354_vm4, %v3014_v47, 0.0 }
 0x4b8   :  { %v3016_v48 = vpop.eup %3015  ;;  %v811_v46 = vsel %vm795_vm5, %v794_v50, 0.0 }
 0x4b9   :  { %v792_v41 = vsel %vm354_vm4, %v3016_v48, 0.0 }
 0x4ba   :  { %v805_v49 = vsel %vm795_vm5, %v792_v41, 0.0 }
 0x4bb   :  { %806 = vadd.xlane.f32.xlu1 %v805_v49 }
 0x4bc   :  { %v3018_v52 = vpop.eup %3017 }
 0x4bd   :  { %v793_v53 = vsel %vm354_vm4, %v3018_v52, 0.0 }
 0x4be   :  { %v808_v54 = vsel %vm795_vm5, %v793_v53, 0.0 }
 0x4bf   :  { %812 = vadd.xlane.f32.xlu1 %v811_v46  ;;  %809 = vadd.xlane.f32.xlu0 %v808_v54 }
 0x538   :  { %v798_v55 = vpop.xlane.xlu0 %797 }
 0x539   :  { %3019 = vrcp.f32 %v798_v55 }
 0x53c   :  { %v804_v57 = vpop.xlane.xlu0 %803  ;;  %v801_v51 = vpop.xlane.xlu1 %800 }
 0x53d   :  { %3021 = vrcp.f32 %v804_v57 }
 0x53e   :  { %3023 = vrcp.f32 %v801_v51 }
 0x544   :  { %v807_v58 = vpop.xlane.xlu1 %806 }
 0x545   :  { %3025 = vrcp.f32 %v807_v58 }
 0x546   :  { %v3020_v62 = vpop.eup %3019 }
 0x547   :  { %v820_v56 = vmul.f32 %v3020_v62, %v789_v39 }
 0x548   :  { %v813_v59 = vpop.xlane.xlu1 %812  ;;  %v810_v60 = vpop.xlane.xlu0 %809 }
 0x549   :  { %3027 = vrcp.f32 %v813_v59 }
 0x54a   :  { %v3022_v63 = vpop.eup %3021  ;;  %3029 = vrcp.f32 %v810_v60 }
 0x54b   :  { %v3024_v1 = vpop.eup %3023  ;;  %v822_v2 = vmul.f32 %v3022_v63, %v791_v42 }
 0x54c   :  { %v821_v3 = vmul.f32 %v3024_v1, %v790_v37 }
 0x54d   :  { %v827_v4 = vpack.c.bf16 %v822_v2, %v822_v2 }
 0x54e   :  { %v826_v5 = vpack.c.bf16 %v821_v3, %v820_v56  ;;  %v2965_v56 = vld [vmem:[%s4115_s9 + $0x8] sm:$0xff]   ;;  %v2966_v3 = vld [vmem:[%s4115_s9] sm:$0xff]  }
 0x550   :  { %2787 = vmatprep.mubr.msk.bf16.mxu1 %vm795_vm5, %v826_v5 }
 0x551   :  { %2788 = vmatmul.mubr.msk.bf16.vlgmr.msra.gmra.mxu1 %vm795_vm5, %v827_v4 }
 0x552   :  { %2803 = vmatprep.mubr.msk.bf16.mxu1 %vm3424_vm0, %v3423_v0  ;;  %v3026_v61 = vpop.eup %3025  ;;  %2800 = vmatpush3.bf16.msra.mxu1 %v2965_v56 }
 0x553   :  { %v823_v9 = vmul.f32 %v3026_v61, %v792_v41  ;;  %2801 = vmatprep.subr.bf16.mxu1 %v3423_v0 }
 0x556   :  { %v3028_v6 = vpop.eup %3027  ;;  %2802 = vmatpush3.bf16.msra.mxu1 %v2966_v3 }
 0x557   :  { %v3030_v7 = vpop.eup %3029  ;;  %v825_v8 = vmul.f32 %v3028_v6, %v794_v50  ;;  %2835 = vmatprep.subr.bf16.mxu1 %v3423_v0 }
 0x558   :  { %v824_v11 = vmul.f32 %v3030_v7, %v793_v53 }
 0x559   :  { %v829_v12 = vpack.c.bf16 %v825_v8, %v825_v8 }
 0x55a   :  { %v828_v13 = vpack.c.bf16 %v824_v11, %v823_v9 }
 0x55c   :  { %2795 = vmatprep.mubr.msk.bf16.mxu0 %vm795_vm5, %v828_v13 }
 0x55d   :  { %2796 = vmatmul.mubr.msk.bf16.vlgmr.msra.gmra.mxu0 %vm795_vm5, %v829_v12 }
 0x55e   :  { %2823 = vmatprep.mubr.msk.bf16.mxu0 %vm3424_vm0, %v3423_v0 }
 0x611   :  { %v2789_v14 = vpop.f32.mrf.mxu1 }
 0x612   :  { %v3763_v19 = vadd.f32 %v2789_v14, %v3647_v20 }
 0x613   :  { %v878_v16 = vpop.f32.mrf.mxu1 }
 0x614   :  { %v3760_v17 = vadd.f32 %v878_v16, %v3633_v10  ;;  %v963_v26 = vsel %vm357_vm2, %v3763_v19, 0.0 }
 0x615   :  { %v2790_v18 = vpop.f32.mrf.mxu1 }
 0x616   :  { %v957_v21 = vsel %vm357_vm2, %v3760_v17, 0.0 }
 0x617   :  { %v881_v22 = vpop.f32.mrf.mxu1  ;;  %958 = vadd.xlane.f32.xlu0 %v957_v21 }
 0x618   :  { %v3768_v23 = vadd.f32 %v881_v22, %v3640_v15 }
 0x61a   :  { %v960_v25 = vsel %vm357_vm2, %v3768_v23, 0.0 }
 0x61b   :  { %961 = vadd.xlane.f32.xlu1 %v960_v25  ;;  %964 = vadd.xlane.f32.xlu0 %v963_v26 }
 0x61d   :  { %v2797_v10 = vpop.f32.mrf.mxu0 }
 0x61e   :  { %v3778_v31 = vadd.f32 %v2797_v10, %v3659_v32 }
 0x61f   :  { %v935_v27 = vpop.f32.mrf.mxu0 }
 0x620   :  { %v3775_v20 = vadd.f32 %v935_v27, %v3651_v24  ;;  %v972_v35 = vsel %vm357_vm2, %v3778_v31, 0.0 }
 0x621   :  { %v2798_v29 = vpop.f32.mrf.mxu0 }
 0x622   :  { %v966_v15 = vsel %vm357_vm2, %v3775_v20, 0.0 }
 0x623   :  { %967 = vadd.xlane.f32.xlu1 %v966_v15  ;;  %v938_v33 = vpop.f32.mrf.mxu0  ;;  %v2576_v15 = vld [vmem:[#allocation8] ss:$0 sm:$0xff] }
 0x624   :  { %v3783_v34 = vadd.f32 %v938_v33, %v3655_v28 }
 0x626   :  { %v969_v36 = vsel %vm357_vm2, %v3783_v34, 0.0 }
 0x627   :  { %973 = vadd.xlane.f32.xlu1 %v972_v35  ;;  %970 = vadd.xlane.f32.xlu0 %v969_v36 }
 0x6a0   :  { %v959_v24 = vpop.xlane.xlu0 %958 }
 0x6a1   :  { %v975_v38 = vmul.f32 0.03125, %v959_v24 }
 0x6a3   :  { %v981_v32 = vsub.f32 %v3760_v17, %v975_v38  ;;  %v2577_v38 = vld [vmem:[#allocation10] ss:$0 sm:$0xff] }
 0x6a4   :  { %v962_v39 = vpop.xlane.xlu1 %961  ;;  %v965_v40 = vpop.xlane.xlu0 %964 }
 0x6a5   :  { %v976_v42 = vmul.f32 0.03125, %v962_v39  ;;  %v977_v43 = vmul.f32 0.03125, %v965_v40  ;;  %v987_v37 = vmul.f32 %v981_v32, %v981_v32 }
 0x6a7   :  { %v982_v28 = vsub.f32 %v3768_v23, %v976_v42  ;;  %v3792_v44 = vsub.f32 %v3763_v19, %v977_v43  ;;  %v993_v45 = vsel %vm357_vm2, %v987_v37, 0.0 }
 0x6a8   :  { %994 = vadd.xlane.f32.xlu0 %v993_v45 }
 0x6a9   :  { %v988_v47 = vmul.f32 %v982_v28, %v982_v28  ;;  %v989_v48 = vmul.f32 %v3792_v44, %v3792_v44 }
 0x6ab   :  { %v996_v41 = vsel %vm357_vm2, %v988_v47, 0.0  ;;  %v999_v49 = vsel %vm357_vm2, %v989_v48, 0.0 }
 0x6ac   :  { %997 = vadd.xlane.f32.xlu1 %v996_v41  ;;  %v968_v50 = vpop.xlane.xlu1 %967  ;;  %1000 = vadd.xlane.f32.xlu0 %v999_v49 }
 0x6ad   :  { %v978_v52 = vmul.f32 0.03125, %v968_v50 }
 0x6af   :  { %v984_v53 = vsub.f32 %v3775_v20, %v978_v52 }
 0x6b0   :  { %v974_v46 = vpop.xlane.xlu1 %973  ;;  %v971_v54 = vpop.xlane.xlu0 %970 }
 0x6b1   :  { %v980_v55 = vmul.f32 0.03125, %v974_v46  ;;  %v979_v57 = vmul.f32 0.03125, %v971_v54  ;;  %v990_v51 = vmul.f32 %v984_v53, %v984_v53 }
 0x6b3   :  { %v3801_v58 = vsub.f32 %v3778_v31, %v980_v55  ;;  %v3804_v59 = vsub.f32 %v3783_v34, %v979_v57  ;;  %v1002_v60 = vsel %vm357_vm2, %v990_v51, 0.0 }
 0x6b4   :  { %1003 = vadd.xlane.f32.xlu1 %v1002_v60  ;;  %v2969_v60 = vld [vmem:[%s4117_s11 + $0x8] sm:$0xff]  }
 0x6b5   :  { %v992_v62 = vmul.f32 %v3801_v58, %v3801_v58  ;;  %v991_v63 = vmul.f32 %v3804_v59, %v3804_v59 }
 0x6b7   :  { %v1008_v1 = vsel %vm357_vm2, %v992_v62, 0.0  ;;  %v1005_v2 = vsel %vm357_vm2, %v991_v63, 0.0  ;;  %v2970_v62 = vld [vmem:[%s4117_s11] sm:$0xff]   ;;  %v2578_v63 = vld [vmem:[#allocation11] ss:$0 sm:$0xff] }
 0x6b8   :  { %1009 = vadd.xlane.f32.xlu1 %v1008_v1  ;;  %1006 = vadd.xlane.f32.xlu0 %v1005_v2 }
 0x731   :  { %v995_v4 = vpop.xlane.xlu0 %994 }
 0x732   :  { %v1011_v5 = vmul.f32 0.03125, %v995_v4 }
 0x734   :  { %v1017_v61 = vadd.f32 1e-05, %v1011_v5 }
 0x735   :  { %v998_v6 = vpop.xlane.xlu1 %997  ;;  %v1001_v7 = vpop.xlane.xlu0 %1000 }
 0x736   :  { %3031 = vrsqrt.f32 %v1017_v61  ;;  %v1012_v8 = vmul.f32 0.03125, %v998_v6  ;;  %v1013_v9 = vmul.f32 0.03125, %v1001_v7 }
 0x738   :  { %v1018_v11 = vadd.f32 1e-05, %v1012_v8  ;;  %v1019_v12 = vadd.f32 1e-05, %v1013_v9 }
 0x73a   :  { %3033 = vrsqrt.f32 %v1018_v11 }
 0x73b   :  { %3035 = vrsqrt.f32 %v1019_v12 }
 0x73d   :  { %v1004_v13 = vpop.xlane.xlu1 %1003 }
 0x73e   :  { %v1014_v14 = vmul.f32 0.03125, %v1004_v13 }
 0x740   :  { %v1020_v16 = vadd.f32 1e-05, %v1014_v14 }
 0x741   :  { %v1010_v18 = vpop.xlane.xlu1 %1009  ;;  %v1007_v21 = vpop.xlane.xlu0 %1006 }
 0x742   :  { %3037 = vrsqrt.f32 %v1020_v16  ;;  %v1016_v22 = vmul.f32 0.03125, %v1010_v18  ;;  %v1015_v25 = vmul.f32 0.03125, %v1007_v21 }
 0x743   :  { %v3032_v26 = vpop.eup %3031 }
 0x744   :  { %v1029_v10 = vmul.f32 %v3032_v26, %v981_v32  ;;  %v1022_v27 = vadd.f32 1e-05, %v1016_v22  ;;  %v1021_v29 = vadd.f32 1e-05, %v1015_v25 }
 0x746   :  { %3039 = vrsqrt.f32 %v1022_v27  ;;  %v1041_v36 = vmul.f32 %v2576_v15, %v1029_v10 }
 0x747   :  { %v3034_v33 = vpop.eup %3033  ;;  %3041 = vrsqrt.f32 %v1021_v29 }
 0x748   :  { %v1030_v35 = vmul.f32 %v3034_v33, %v982_v28  ;;  %v3036_v24 = vpop.eup %3035  ;;  %v1053_v40 = vadd.f32 %v2577_v38, %v1041_v36 }
 0x749   :  { %v1031_v43 = vmul.f32 %v3036_v24, %v3792_v44 }
 0x74a   :  { %v1042_v39 = vmul.f32 %v2576_v15, %v1030_v35 }
 0x74b   :  { %v1043_v47 = vmul.f32 %v2576_v15, %v1031_v43 }
 0x74c   :  { %v1054_v42 = vadd.f32 %v2577_v38, %v1042_v39 }
 0x74d   :  { %v1055_v49 = vadd.f32 %v2577_v38, %v1043_v47 }
 0x74e   :  { %v1063_v37 = vpack.c.bf16 %v1054_v42, %v1053_v40 }
 0x74f   :  { %v3038_v45 = vpop.eup %3037 }
 0x750   :  { %2804 = vmatmul.mubr.msk.bf16.vlgmr.msra.gmra.mxu1 %vm357_vm2, %v1063_v37  ;;  %v1032_v32 = vmul.f32 %v3038_v45, %v984_v53 }
 0x751   :  { %2807 = vmatprep.mubr.msk.bf16.mxu1 %vm3424_vm0, %v3423_v0 }
 0x752   :  { %v1044_v48 = vmul.f32 %v2576_v15, %v1032_v32 }
 0x753   :  { %v3040_v41 = vpop.eup %3039 }
 0x754   :  { %v3042_v28 = vpop.eup %3041  ;;  %v1056_v50 = vadd.f32 %v2577_v38, %v1044_v48  ;;  %v1034_v52 = vmul.f32 %v3040_v41, %v3801_v58  ;;  %v2967_v58 = vld [vmem:[%s4117_s11 + $0x18] sm:$0xff]  }
 0x755   :  { %v1033_v46 = vmul.f32 %v3042_v28, %v3804_v59  ;;  %2816 = vmatpush3.bf16.msra.mxu0 %v2967_v58  ;;  %v2968_v59 = vld [vmem:[%s4117_s11 + $0x10] sm:$0xff]  }
 0x756   :  { %v1064_v54 = vpack.c.bf16 %v1056_v50, %v1055_v49  ;;  %v1046_v44 = vmul.f32 %v2576_v15, %v1034_v52  ;;  %2817 = vmatprep.subr.bf16.mxu0 %v3423_v0 }
 0x757   :  { %v1045_v55 = vmul.f32 %v2576_v15, %v1033_v46 }
 0x758   :  { %2808 = vmatmul.mubr.msk.bf16.gmra.mxu1 %vm357_vm2, %v1064_v54  ;;  %v1058_v57 = vadd.f32 %v2577_v38, %v1046_v44 }
 0x759   :  { %2811 = vmatprep.mubr.msk.bf16.mxu1 %vm3424_vm0, %v3423_v0  ;;  %v1057_v53 = vadd.f32 %v2577_v38, %v1045_v55  ;;  %2818 = vmatpush3.bf16.msra.mxu0 %v2968_v59 }
 0x75a   :  { %2819 = vmatprep.subr.bf16.mxu0 %v3423_v0 }
 0x75b   :  { %v1065_v51 = vpack.c.bf16 %v1058_v57, %v1057_v53 }
 0x75d   :  { %2820 = vmatpush3.bf16.msra.mxu0 %v2969_v60 }
 0x75e   :  { %2821 = vmatprep.subr.bf16.mxu0 %v3423_v0 }
 0x760   :  { %2812 = vmatmul.mubr.msk.bf16.gmra.mxu1 %vm357_vm2, %v1065_v51 }
 0x761   :  { %2839 = vmatprep.mubr.msk.bf16.mxu1 %vm3424_vm0, %v3423_v0  ;;  %2822 = vmatpush3.bf16.msra.mxu0 %v2970_v62 }
 0x810   :  { %v1128_v1 = vpop.f32.mrf.mxu1 }
 0x811   :  { %v1129_v2 = vadd.f32 %v2578_v63, %v1128_v1 }
 0x812   :  { %v2805_v56 = vpop.f32.mrf.mxu1 }
 0x813   :  { %v1151_v3 = vmul.f32 %v1129_v2, %v1129_v2 }
 0x814   :  { %v1131_v4 = vpop.f32.mrf.mxu1 }
 0x815   :  { %v1157_v5 = vmul.f32 %v1151_v3, %v1129_v2  ;;  %v1132_v61 = vadd.f32 %v2578_v63, %v1131_v4 }
 0x816   :  { %v2806_v6 = vpop.f32.mrf.mxu1 }
 0x817   :  { %v1163_v7 = vmul.f32 0.044715, %v1157_v5  ;;  %v1152_v8 = vmul.f32 %v1132_v61, %v1132_v61 }
 0x818   :  { %v1136_v9 = vpop.f32.mrf.mxu1 }
 0x819   :  { %v1169_v11 = vadd.f32 %v1163_v7, %v1129_v2  ;;  %v1158_v12 = vmul.f32 %v1152_v8, %v1132_v61  ;;  %v1137_v13 = vadd.f32 %v2578_v63, %v1136_v9 }
 0x81a   :  { %v2809_v14 = vpop.f32.mrf.mxu1 }
 0x81b   :  { %v1175_v16 = vmul.f32 0.7978846, %v1169_v11  ;;  %v1164_v18 = vmul.f32 0.044715, %v1158_v12  ;;  %v1153_v21 = vmul.f32 %v1137_v13, %v1137_v13 }
 0x81c   :  { %v1139_v22 = vpop.f32.mrf.mxu1 }
 0x81d   :  { %3043 = vtanh.f32 %v1175_v16  ;;  %v1170_v25 = vadd.f32 %v1164_v18, %v1132_v61  ;;  %v1159_v26 = vmul.f32 %v1153_v21, %v1137_v13  ;;  %v1140_v10 = vadd.f32 %v2578_v63, %v1139_v22 }
 0x81e   :  { %v2810_v27 = vpop.f32.mrf.mxu1 }
 0x81f   :  { %v1176_v29 = vmul.f32 0.7978846, %v1170_v25  ;;  %v1165_v15 = vmul.f32 0.044715, %v1159_v26  ;;  %v1154_v33 = vmul.f32 %v1140_v10, %v1140_v10  ;;  %v2584_v26 = vld [vmem:[#allocation13] ss:$0 sm:$0xff] }
 0x820   :  { %v1144_v35 = vpop.f32.mrf.mxu1 }
 0x821   :  { %3045 = vtanh.f32 %v1176_v29  ;;  %v1171_v36 = vadd.f32 %v1165_v15, %v1137_v13  ;;  %v1160_v24 = vmul.f32 %v1154_v33, %v1140_v10  ;;  %v1145_v38 = vadd.f32 %v2578_v63, %v1144_v35 }
 0x822   :  { %v2813_v39 = vpop.f32.mrf.mxu1 }
 0x823   :  { %v1177_v40 = vmul.f32 0.7978846, %v1171_v36  ;;  %v1166_v42 = vmul.f32 0.044715, %v1160_v24  ;;  %v1155_v43 = vmul.f32 %v1145_v38, %v1145_v38 }
 0x824   :  { %v1147_v37 = vpop.f32.mrf.mxu1 }
 0x825   :  { %3047 = vtanh.f32 %v1177_v40  ;;  %v1172_v45 = vadd.f32 %v1166_v42, %v1140_v10  ;;  %v1161_v32 = vmul.f32 %v1155_v43, %v1145_v38  ;;  %v1148_v47 = vadd.f32 %v2578_v63, %v1147_v37 }
 0x826   :  { %v2814_v48 = vpop.f32.mrf.mxu1 }
 0x827   :  { %v1178_v41 = vmul.f32 0.7978846, %v1172_v45  ;;  %v1167_v28 = vmul.f32 0.044715, %v1161_v32  ;;  %v1156_v49 = vmul.f32 %v1148_v47, %v1148_v47 }
 0x829   :  { %3049 = vtanh.f32 %v1178_v41  ;;  %v1173_v50 = vadd.f32 %v1167_v28, %v1145_v38  ;;  %v1162_v52 = vmul.f32 %v1156_v49, %v1148_v47 }
 0x82a   :  { %v3044_v46 = vpop.eup %3043 }
 0x82b   :  { %v1187_v54 = vadd.f32 1.0, %v3044_v46  ;;  %v1179_v44 = vmul.f32 0.7978846, %v1173_v50  ;;  %v1168_v55 = vmul.f32 0.044715, %v1162_v52 }
 0x82d   :  { %3051 = vtanh.f32 %v1179_v44  ;;  %v1174_v53 = vadd.f32 %v1168_v55, %v1148_v47  ;;  %v1193_v51 = vmul.f32 0.5, %v1187_v54 }
 0x82e   :  { %v3046_v57 = vpop.eup %3045 }
 0x82f   :  { %v1188_v58 = vadd.f32 1.0, %v3046_v57  ;;  %v1180_v59 = vmul.f32 0.7978846, %v1174_v53  ;;  %v1199_v63 = vmul.f32 %v1193_v51, %v1129_v2 }
 0x831   :  { %v1194_v60 = vmul.f32 0.5, %v1188_v58  ;;  %3053 = vtanh.f32 %v1180_v59 }
 0x832   :  { %v3048_v62 = vpop.eup %3047 }
 0x833   :  { %v1200_v1 = vmul.f32 %v1194_v60, %v1132_v61  ;;  %v1189_v56 = vadd.f32 1.0, %v3048_v62 }
 0x835   :  { %v1213_v3 = vpack.c.bf16 %v1200_v1, %v1199_v63  ;;  %v1195_v5 = vmul.f32 0.5, %v1189_v56 }
 0x836   :  { %v3050_v4 = vpop.eup %3049 }
 0x837   :  { %v1190_v6 = vadd.f32 1.0, %v3050_v4  ;;  %2824 = vmatmul.mubr.msk.bf16.vlgmr.msra.gmra.mxu0 %vm276_vm1, %v1213_v3  ;;  %v1201_v9 = vmul.f32 %v1195_v5, %v1137_v13 }
 0x838   :  { %2827 = vmatprep.mubr.msk.bf16.mxu0 %vm3424_vm0, %v3423_v0 }
 0x839   :  { %v1196_v7 = vmul.f32 0.5, %v1190_v6 }
 0x83a   :  { %v3052_v8 = vpop.eup %3051 }
 0x83b   :  { %v1202_v11 = vmul.f32 %v1196_v7, %v1140_v10  ;;  %v1191_v12 = vadd.f32 1.0, %v3052_v8 }
 0x83d   :  { %v1214_v14 = vpack.c.bf16 %v1202_v11, %v1201_v9  ;;  %v1197_v18 = vmul.f32 0.5, %v1191_v12 }
 0x83e   :  { %v3054_v16 = vpop.eup %3053 }
 0x83f   :  { %v1192_v2 = vadd.f32 1.0, %v3054_v16  ;;  %2828 = vmatmul.mubr.msk.bf16.gmra.mxu0 %vm276_vm1, %v1214_v14  ;;  %v1203_v21 = vmul.f32 %v1197_v18, %v1145_v38 }
 0x840   :  { %2831 = vmatprep.mubr.msk.bf16.mxu0 %vm3424_vm0, %v3423_v0 }
 0x841   :  { %v1198_v61 = vmul.f32 0.5, %v1192_v2 }
 0x843   :  { %v1204_v22 = vmul.f32 %v1198_v61, %v1148_v47 }
 0x845   :  { %v1215_v25 = vpack.c.bf16 %v1204_v22, %v1203_v21 }
 0x847   :  { %2832 = vmatmul.mubr.msk.bf16.gmra.mxu0 %vm276_vm1, %v1215_v25  ;;  %v2971_v25 = vld [vmem:[%s4143_s16 + $0x18] sm:$0xff]  }
 0x848   :  { %2836 = vmatpush3.bf16.msra.mxu1 %v2971_v25 }
 0x849   :  { %2837 = vmatprep.subr.bf16.mxu1 %v3423_v0 }
 0x8f7   :  { %v1290_v27 = vpop.f32.mrf.mxu0 }
 0x8f8   :  { %v1291_v13 = vadd.f32 %v2584_v26, %v1290_v27 }
 0x8f9   :  { %v2825_v10 = vpop.f32.mrf.mxu0 }
 0x8fa   :  { %v3856_v29 = vadd.f32 %v1291_v13, %v3760_v17 }
 0x8fb   :  { %v1293_v15 = vpop.f32.mrf.mxu0 }
 0x8fc   :  { %v1294_v33 = vadd.f32 %v2584_v26, %v1293_v15  ;;  %v1323_v35 = vsel %vm357_vm2, %v3856_v29, 0.0 }
 0x8fd   :  { %1324 = vadd.xlane.f32.xlu0 %v1323_v35  ;;  %v2826_v36 = vpop.f32.mrf.mxu0 }
 0x8fe   :  { %v3861_v24 = vadd.f32 %v1294_v33, %v3768_v23 }
 0x8ff   :  { %v1298_v38 = vpop.f32.mrf.mxu0 }
 0x900   :  { %v1299_v39 = vadd.f32 %v2584_v26, %v1298_v38  ;;  %v1326_v40 = vsel %vm357_vm2, %v3861_v24, 0.0 }
 0x901   :  { %1327 = vadd.xlane.f32.xlu1 %v1326_v40  ;;  %v2829_v42 = vpop.f32.mrf.mxu0 }
 0x902   :  { %v3866_v17 = vadd.f32 %v1299_v39, %v3763_v19 }
 0x903   :  { %v1301_v43 = vpop.f32.mrf.mxu0 }
 0x904   :  { %v1302_v37 = vadd.f32 %v2584_v26, %v1301_v43  ;;  %v1329_v45 = vsel %vm357_vm2, %v3866_v17, 0.0 }
 0x905   :  { %1330 = vadd.xlane.f32.xlu0 %v1329_v45  ;;  %v2830_v32 = vpop.f32.mrf.mxu0 }
 0x906   :  { %v3871_v23 = vadd.f32 %v1302_v37, %v3775_v20 }
 0x907   :  { %v1306_v47 = vpop.f32.mrf.mxu0 }
 0x908   :  { %v1307_v48 = vadd.f32 %v2584_v26, %v1306_v47  ;;  %v1332_v41 = vsel %vm357_vm2, %v3871_v23, 0.0  ;;  %v2592_v47 = vld [vmem:[#allocation2 + $0x1] ss:$0 sm:$0xff] }
 0x909   :  { %1333 = vadd.xlane.f32.xlu1 %v1332_v41  ;;  %v2833_v28 = vpop.f32.mrf.mxu0 }
 0x90a   :  { %v3876_v19 = vadd.f32 %v1307_v48, %v3783_v34 }
 0x90b   :  { %v1309_v49 = vpop.f32.mrf.mxu0 }
 0x90c   :  { %v1310_v50 = vadd.f32 %v2584_v26, %v1309_v49  ;;  %v1335_v52 = vsel %vm357_vm2, %v3876_v19, 0.0  ;;  %v2972_v26 = vld [vmem:[%s4143_s16 + $0x10] sm:$0xff]   ;;  %v2593_v49 = vld [vmem:[#allocation5 + $0x1] ss:$0 sm:$0xff] }
 0x90d   :  { %1336 = vadd.xlane.f32.xlu0 %v1335_v52  ;;  %v2834_v46 = vpop.f32.mrf.mxu0  ;;  %2838 = vmatpush3.bf16.msra.mxu1 %v2972_v26 }
 0x90e   :  { %v3881_v20 = vadd.f32 %v1310_v50, %v3778_v31 }
 0x910   :  { %v1338_v54 = vsel %vm357_vm2, %v3881_v20, 0.0 }
 0x911   :  { %1339 = vadd.xlane.f32.xlu1 %v1338_v54 }
 0x986   :  { %v1325_v44 = vpop.xlane.xlu0 %1324 }
 0x987   :  { %v1341_v55 = vmul.f32 0.03125, %v1325_v44 }
 0x989   :  { %v1347_v53 = vsub.f32 %v3856_v29, %v1341_v55 }
 0x98a   :  { %v1328_v34 = vpop.xlane.xlu1 %1327 }
 0x98b   :  { %v1342_v57 = vmul.f32 0.03125, %v1328_v34  ;;  %v1353_v51 = vmul.f32 %v1347_v53, %v1347_v53 }
 0x98d   :  { %v3887_v58 = vsub.f32 %v3861_v24, %v1342_v57  ;;  %v1359_v59 = vsel %vm357_vm2, %v1353_v51, 0.0 }
 0x98e   :  { %1360 = vadd.xlane.f32.xlu0 %v1359_v59  ;;  %v1331_v60 = vpop.xlane.xlu0 %1330 }
 0x98f   :  { %v1343_v31 = vmul.f32 0.03125, %v1331_v60  ;;  %v1354_v62 = vmul.f32 %v3887_v58, %v3887_v58 }
 0x991   :  { %v3893_v63 = vsub.f32 %v3866_v17, %v1343_v31  ;;  %v1362_v1 = vsel %vm357_vm2, %v1354_v62, 0.0 }
 0x992   :  { %v1334_v56 = vpop.xlane.xlu1 %1333  ;;  %1363 = vadd.xlane.f32.xlu1 %v1362_v1 }
 0x993   :  { %v1344_v3 = vmul.f32 0.03125, %v1334_v56  ;;  %v1355_v4 = vmul.f32 %v3893_v63, %v3893_v63 }
 0x995   :  { %v3899_v5 = vsub.f32 %v3871_v23, %v1344_v3  ;;  %v1365_v6 = vsel %vm357_vm2, %v1355_v4, 0.0 }
 0x996   :  { %1366 = vadd.xlane.f32.xlu0 %v1365_v6  ;;  %v1337_v7 = vpop.xlane.xlu0 %1336 }
 0x997   :  { %v1345_v8 = vmul.f32 0.03125, %v1337_v7  ;;  %v1356_v9 = vmul.f32 %v3899_v5, %v3899_v5 }
 0x999   :  { %v3905_v11 = vsub.f32 %v3876_v19, %v1345_v8  ;;  %v1368_v12 = vsel %vm357_vm2, %v1356_v9, 0.0 }
 0x99a   :  { %1369 = vadd.xlane.f32.xlu1 %v1368_v12  ;;  %v1340_v14 = vpop.xlane.xlu1 %1339 }
 0x99b   :  { %v1346_v16 = vmul.f32 0.03125, %v1340_v14  ;;  %v1357_v18 = vmul.f32 %v3905_v11, %v3905_v11 }
 0x99d   :  { %v3911_v2 = vsub.f32 %v3881_v20, %v1346_v16  ;;  %v1371_v61 = vsel %vm357_vm2, %v1357_v18, 0.0 }
 0x99e   :  { %1372 = vadd.xlane.f32.xlu0 %v1371_v61 }
 0x99f   :  { %v1358_v21 = vmul.f32 %v3911_v2, %v3911_v2 }
 0x9a1   :  { %v1374_v22 = vsel %vm357_vm2, %v1358_v21, 0.0 }
 0x9a2   :  { %1375 = vadd.xlane.f32.xlu1 %v1374_v22 }
 0xa17   :  { %v1361_v27 = vpop.xlane.xlu0 %1360 }
 0xa18   :  { %v1377_v13 = vmul.f32 0.03125, %v1361_v27 }
 0xa1a   :  { %v1383_v10 = vadd.f32 1e-05, %v1377_v13 }
 0xa1b   :  { %v1364_v15 = vpop.xlane.xlu1 %1363 }
 0xa1c   :  { %3055 = vrsqrt.f32 %v1383_v10  ;;  %v1378_v33 = vmul.f32 0.03125, %v1364_v15 }
 0xa1e   :  { %v1384_v35 = vadd.f32 1e-05, %v1378_v33 }
 0xa1f   :  { %v1367_v36 = vpop.xlane.xlu0 %1366 }
 0xa20   :  { %3057 = vrsqrt.f32 %v1384_v35  ;;  %v1379_v38 = vmul.f32 0.03125, %v1367_v36 }
 0xa22   :  { %v1385_v39 = vadd.f32 1e-05, %v1379_v38 }
 0xa23   :  { %v1370_v40 = vpop.xlane.xlu1 %1369 }
 0xa24   :  { %3059 = vrsqrt.f32 %v1385_v39  ;;  %v1380_v42 = vmul.f32 0.03125, %v1370_v40 }
 0xa26   :  { %v1386_v43 = vadd.f32 1e-05, %v1380_v42 }
 0xa27   :  { %v1373_v37 = vpop.xlane.xlu0 %1372 }
 0xa28   :  { %3061 = vrsqrt.f32 %v1386_v43  ;;  %v1381_v45 = vmul.f32 0.03125, %v1373_v37 }
 0xa29   :  { %v3056_v32 = vpop.eup %3055 }
 0xa2a   :  { %v1387_v48 = vadd.f32 1e-05, %v1381_v45  ;;  %v1395_v41 = vmul.f32 %v3056_v32, %v1347_v53 }
 0xa2b   :  { %v1376_v28 = vpop.xlane.xlu1 %1375 }
 0xa2c   :  { %3063 = vrsqrt.f32 %v1387_v48  ;;  %v1382_v50 = vmul.f32 0.03125, %v1376_v28  ;;  %v1407_v52 = vmul.f32 %v2592_v47, %v1395_v41 }
 0xa2d   :  { %v3058_v46 = vpop.eup %3057 }
 0xa2e   :  { %v1396_v54 = vmul.f32 %v3058_v46, %v3887_v58  ;;  %v1388_v44 = vadd.f32 1e-05, %v1382_v50  ;;  %v1419_v55 = vadd.f32 %v2593_v49, %v1407_v52 }
 0xa30   :  { %v1408_v34 = vmul.f32 %v2592_v47, %v1396_v54  ;;  %3065 = vrsqrt.f32 %v1388_v44  ;;  %v1519_v57 = vmul.f32 %v1419_v55, %v1419_v55 }
 0xa31   :  { %v3060_v51 = vpop.eup %3059 }
 0xa32   :  { %v1420_v59 = vadd.f32 %v2593_v49, %v1408_v34  ;;  %v1525_v60 = vsel %vm357_vm2, %v1519_v57, 0.0  ;;  %v1397_v31 = vmul.f32 %v3060_v51, %v3893_v63 }
 0xa33   :  { %1526 = vadd.xlane.f32.xlu0 %v1525_v60 }
 0xa34   :  { %v1430_v53 = vpack.c.bf16 %v1420_v59, %v1419_v55  ;;  %v1520_v62 = vmul.f32 %v1420_v59, %v1420_v59  ;;  %v1409_v1 = vmul.f32 %v2592_v47, %v1397_v31 }
 0xa35   :  { %v3062_v56 = vpop.eup %3061 }
 0xa36   :  { %v1398_v3 = vmul.f32 %v3062_v56, %v3899_v5  ;;  %2840 = vmatmul.mubr.msk.bf16.vlgmr.msra.gmra.mxu1 %vm357_vm2, %v1430_v53  ;;  %v1528_v58 = vsel %vm357_vm2, %v1520_v62, 0.0  ;;  %v1421_v4 = vadd.f32 %v2593_v49, %v1409_v1  ;;  %v2598_v62 = vld [vmem:[#allocation7 + $0x1] ss:$0 sm:$0xff] }
 0xa37   :  { %1529 = vadd.xlane.f32.xlu1 %v1528_v58  ;;  %2843 = vmatprep.mubr.msk.bf16.mxu1 %vm3424_vm0, %v3423_v0 }
 0xa38   :  { %v1521_v6 = vmul.f32 %v1421_v4, %v1421_v4  ;;  %v1410_v7 = vmul.f32 %v2592_v47, %v1398_v3 }
 0xa39   :  { %v3064_v8 = vpop.eup %3063 }
 0xa3a   :  { %v1531_v63 = vsel %vm357_vm2, %v1521_v6, 0.0  ;;  %v1422_v9 = vadd.f32 %v2593_v49, %v1410_v7  ;;  %v1399_v12 = vmul.f32 %v3064_v8, %v3905_v11 }
 0xa3b   :  { %1532 = vadd.xlane.f32.xlu0 %v1531_v63 }
 0xa3c   :  { %v1431_v14 = vpack.c.bf16 %v1422_v9, %v1421_v4  ;;  %v1522_v5 = vmul.f32 %v1422_v9, %v1422_v9  ;;  %v1411_v16 = vmul.f32 %v2592_v47, %v1399_v12 }
 0xa3d   :  { %v3066_v18 = vpop.eup %3065 }
 0xa3e   :  { %v1400_v61 = vmul.f32 %v3066_v18, %v3911_v2  ;;  %2844 = vmatmul.mubr.msk.bf16.gmra.mxu1 %vm357_vm2, %v1431_v14  ;;  %v1534_v21 = vsel %vm357_vm2, %v1522_v5, 0.0  ;;  %v1423_v22 = vadd.f32 %v2593_v49, %v1411_v16 }
 0xa3f   :  { %1535 = vadd.xlane.f32.xlu1 %v1534_v21  ;;  %2847 = vmatprep.mubr.msk.bf16.mxu1 %vm3424_vm0, %v3423_v0 }
 0xa40   :  { %v1523_v25 = vmul.f32 %v1423_v22, %v1423_v22  ;;  %v1412_v26 = vmul.f32 %v2592_v47, %v1400_v61 }
 0xa42   :  { %v1537_v11 = vsel %vm357_vm2, %v1523_v25, 0.0  ;;  %v1424_v27 = vadd.f32 %v2593_v49, %v1412_v26 }
 0xa43   :  { %1538 = vadd.xlane.f32.xlu0 %v1537_v11 }
 0xa44   :  { %v1432_v13 = vpack.c.bf16 %v1424_v27, %v1423_v22  ;;  %v1524_v10 = vmul.f32 %v1424_v27, %v1424_v27 }
 0xa46   :  { %2848 = vmatmul.mubr.msk.bf16.gmra.mxu1 %vm357_vm2, %v1432_v13  ;;  %v1540_v2 = vsel %vm357_vm2, %v1524_v10, 0.0 }
 0xa47   :  { %1541 = vadd.xlane.f32.xlu1 %v1540_v2 }
 0xabc   :  { %v1527_v15 = vpop.xlane.xlu0 %1526 }
 0xabd   :  { %v1543_v33 = vmax.f32 %v1527_v15, 1e-24 }
 0xabf   :  { %3067 = vrsqrt.f32 %v1543_v33 }
 0xac0   :  { %v1530_v35 = vpop.xlane.xlu1 %1529 }
 0xac1   :  { %v1544_v36 = vmax.f32 %v1530_v35, 1e-24 }
 0xac3   :  { %3069 = vrsqrt.f32 %v1544_v36 }
 0xac4   :  { %v1533_v38 = vpop.xlane.xlu0 %1532 }
 0xac5   :  { %v1545_v39 = vmax.f32 %v1533_v38, 1e-24 }
 0xac7   :  { %3071 = vrsqrt.f32 %v1545_v39 }
 0xac8   :  { %v1536_v40 = vpop.xlane.xlu1 %1535 }
 0xac9   :  { %v1546_v42 = vmax.f32 %v1536_v40, 1e-24 }
 0xacb   :  { %3073 = vrsqrt.f32 %v1546_v42 }
 0xacc   :  { %v3068_v43 = vpop.eup %3067  ;;  %v1539_v37 = vpop.xlane.xlu0 %1538 }
 0xacd   :  { %v1547_v45 = vmax.f32 %v1539_v37, 1e-24  ;;  %v1555_v32 = vmul.f32 %v3068_v43, %v1419_v55 }
 0xacf   :  { %3075 = vrsqrt.f32 %v1547_v45  ;;  %1561 = vxpose.xlu0.b32.start [1/3] (short) (narrow) %v1555_v32, 32 }
 0xad0   :  { %v3070_v47 = vpop.eup %3069  ;;  %v1542_v48 = vpop.xlane.xlu1 %1541 }
 0xad1   :  { %v1556_v41 = vmul.f32 %v3070_v47, %v1420_v59  ;;  %v1548_v28 = vmax.f32 %v1542_v48, 1e-24 }
 0xad3   :  { %v1625_v49 = vpack.c.bf16 %v1556_v41, %v1555_v32  ;;  %3077 = vrsqrt.f32 %v1548_v28  ;;  %1562 = vxpose.xlu0.b32.cont [2/3] (short) (narrow) %v1556_v41, 32 }
 0xad4   :  { %v3072_v50 = vpop.eup %3071 }
 0xad5   :  { %2855 = vmatprep.mubr.msk.bf16.mxu0 %vm357_vm2, %v1625_v49  ;;  %v1557_v52 = vmul.f32 %v3072_v50, %v1421_v4 }
 0xad7   :  { %1563 = vxpose.xlu0.b32.end [3/3] (short) (narrow) %v1557_v52, 32  ;;  %v1626_v35 = vpack.c.bf16 %v1557_v52, %v1557_v52 }
 0xad8   :  { %v3074_v46 = vpop.eup %3073 }
 0xad9   :  { %v1558_v54 = vmul.f32 %v3074_v46, %v1422_v9 }
 0xadb   :  { %1593 = vxpose.xlu1.b32.start [1/3] (short) (narrow) %v1558_v54, 32 }
 0xadc   :  { %v3076_v44 = vpop.eup %3075 }
 0xadd   :  { %v1559_v34 = vmul.f32 %v3076_v44, %v1423_v22 }
 0xadf   :  { %v1627_v55 = vpack.c.bf16 %v1559_v34, %v1558_v54  ;;  %1594 = vxpose.xlu1.b32.cont [2/3] (short) (narrow) %v1559_v34, 32 }
 0xae0   :  { %v3078_v57 = vpop.eup %3077 }
 0xae1   :  { %v1560_v51 = vmul.f32 %v3078_v57, %v1424_v27 }
 0xae3   :  { %1595 = vxpose.xlu1.b32.end [3/3] (short) (narrow) %v1560_v51, 32  ;;  %v1628_v42 = vpack.c.bf16 %v1560_v51, %v1560_v51 }
 0xaf6   :  { %v1496_v59 = vpop.f32.mrf.mxu1 }
 0xaf7   :  { %v1497_v4 = vadd.f32 %v2598_v62, %v1496_v59 }
 0xaf8   :  { %v2841_v60 = vpop.f32.mrf.mxu1 }
 0xafa   :  { %v1499_v31 = vpop.f32.mrf.mxu1 }
 0xafb   :  { %v1500_v56 = vadd.f32 %v2598_v62, %v1499_v31 }
 0xafc   :  { %v2842_v53 = vpop.f32.mrf.mxu1 }
 0xafd   :  { %v1793_v8 = vpack.c.bf16 %v1500_v56, %v1497_v4 }
 0xafe   :  { %v1504_v1 = vpop.f32.mrf.mxu1 }
 0xaff   :  { %v1505_v3 = vadd.f32 %v2598_v62, %v1504_v1 }
 0xb00   :  { %v2845_v58 = vpop.f32.mrf.mxu1 }
 0xb01   :  { %v1794_v6 = vpack.c.bf16 %v1505_v3, %v1505_v3 }
 0xb02   :  { %v1507_v7 = vpop.f32.mrf.mxu1 }
 0xb03   :  { %v1804_v63 = vsel %vm840_vm3, %v1794_v6, 0  ;;  %v1508_v9 = vadd.f32 %v2598_v62, %v1507_v7  ;;  %2937 = vmatprep.subr.msk.bf16.mxu1 %vm840_vm3, %v1794_v6 }
 0xb04   :  { %v2846_v12 = vpop.f32.mrf.mxu1  ;;  %2868 = vmatpush3.bf16.msra.mxu1 %v1804_v63 }
 0xb05   :  { %2869 = vmatprep.subr.bf16.mxu1 %v1793_v8 }
 0xb06   :  { %v1512_v14 = vpop.f32.mrf.mxu1 }
 0xb07   :  { %v1513_v5 = vadd.f32 %v2598_v62, %v1512_v14 }
 0xb08   :  { %v2849_v16 = vpop.f32.mrf.mxu1  ;;  %2870 = vmatpush3.bf16.msra.mxu1 %v1793_v8 }
 0xb09   :  { %v1795_v18 = vpack.c.bf16 %v1513_v5, %v1508_v9  ;;  %2883 = vmatprep.subr.bf16.mxu1 %v3423_v0 }
 0xb0a   :  { %v1515_v61 = vpop.f32.mrf.mxu1 }
 0xb0b   :  { %v1516_v21 = vadd.f32 %v2598_v62, %v1515_v61 }
 0xb0c   :  { %v2850_v22 = vpop.f32.mrf.mxu1 }
 0xb0d   :  { %v1796_v40 = vpack.c.bf16 %v1516_v21, %v1516_v21 }
 0xb0f   :  { %v1861_v43 = vsel %vm840_vm3, %v1796_v40, 0 }
 0xb4b   :  { %v1577_v25 = vpop.trf.xlu0 }
 0xb4f   :  { %v1578_v26 = vpop.trf.xlu0 }
 0xb50   :  { %v1629_v2 = vpack.c.bf16 %v1578_v26, %v1577_v25 }
 0xb53   :  { %v1579_v11 = vpop.trf.xlu0 }
 0xb57   :  { %v1609_v27 = vpop.trf.xlu1  ;;  %v1580_v13 = vpop.trf.xlu0 }
 0xb58   :  { %v1630_v10 = vpack.c.bf16 %v1580_v13, %v1579_v11 }
 0xb5a   :  { %2851 = vmatprep.subr.bf16.mxu0 %v1630_v10 }
 0xb5b   :  { %v1610_v15 = vpop.trf.xlu1  ;;  %2852 = vmatpush3.bf16.msra.mxu0 %v1630_v10 }
 0xb5c   :  { %2853 = vmatprep.subr.bf16.mxu0 %v1629_v2  ;;  %v1631_v39 = vpack.c.bf16 %v1610_v15, %v1609_v27 }
 0xb5f   :  { %v1611_v33 = vpop.trf.xlu1  ;;  %2854 = vmatpush3.bf16.msra.mxu0 %v1629_v2 }
 0xb62   :  { %2856 = vmatmul.mubr.msk.bf16.vlgmr.msra.gmra.mxu0 %vm357_vm2, %v1626_v35 }
 0xb63   :  { %v1612_v36 = vpop.trf.xlu1  ;;  %2863 = vmatprep.mubr.msk.bf16.mxu0 %vm357_vm2, %v1627_v55 }
 0xb64   :  { %v1632_v38 = vpack.c.bf16 %v1612_v36, %v1611_v33 }
 0xb66   :  { %2859 = vmatprep.subr.bf16.mxu0 %v1632_v38 }
 0xb67   :  { %2860 = vmatpush3.bf16.msra.mxu0 %v1632_v38 }
 0xb68   :  { %2861 = vmatprep.subr.bf16.mxu0 %v1631_v39 }
 0xb6b   :  { %2862 = vmatpush3.bf16.msra.mxu0 %v1631_v39 }
 0xb6c   :  { %2938 = vmatprep.subr.msk.bf16.mxu0 %vm840_vm3, %v1796_v40 }
 0xb6e   :  { %2864 = vmatmul.mubr.msk.bf16.vlgmr.msra.gmra.mxu0 %vm357_vm2, %v1628_v42 }
 0xb6f   :  { %2876 = vmatpush3.bf16.msra.mxu0 %v1861_v43 }
 0xb70   :  { %2877 = vmatprep.subr.bf16.mxu0 %v1795_v18 }
 0xb73   :  { %2878 = vmatpush3.bf16.msra.mxu0 %v1795_v18 }
 0xb74   :  { %2899 = vmatprep.subr.bf16.mxu0 %v3423_v0 }
 0xc22   :  { %v2857_v37 = vpop.f32.mrf.mxu0 }
 0xc23   :  { %v1745_v45 = vmul.f32 1.442695, %v2857_v37 }
 0xc24   :  { %v1673_v32 = vpop.f32.mrf.mxu0 }
 0xc25   :  { %v1741_v47 = vmul.f32 1.442695, %v1673_v32  ;;  %3079 = vpow2.f32 %v1745_v45 }
 0xc26   :  { %v2858_v48 = vpop.f32.mrf.mxu0 }
 0xc27   :  { %3081 = vpow2.f32 %v1741_v47 }
 0xc28   :  { %v1676_v41 = vpop.f32.mrf.mxu0 }
 0xc29   :  { %v1743_v28 = vmul.f32 1.442695, %v1676_v41 }
 0xc2b   :  { %3083 = vpow2.f32 %v1743_v28 }
 0xc2e   :  { %v2865_v49 = vpop.f32.mrf.mxu0 }
 0xc2f   :  { %v1751_v50 = vmul.f32 1.442695, %v2865_v49 }
 0xc30   :  { %v1727_v52 = vpop.f32.mrf.mxu0 }
 0xc31   :  { %v1747_v46 = vmul.f32 1.442695, %v1727_v52  ;;  %3085 = vpow2.f32 %v1751_v50 }
 0xc32   :  { %v2866_v54 = vpop.f32.mrf.mxu0  ;;  %v3080_v44 = vpop.eup %3079 }
 0xc33   :  { %3087 = vpow2.f32 %v1747_v46  ;;  %v1755_v60 = vsel %vm354_vm4, %v3080_v44, 0.0 }
 0xc34   :  { %v3082_v34 = vpop.eup %3081  ;;  %v1730_v55 = vpop.f32.mrf.mxu0  ;;  %v1765_v62 = vsel %vm795_vm5, %v1755_v60, 0.0 }
 0xc35   :  { %v1749_v57 = vmul.f32 1.442695, %v1730_v55  ;;  %v1753_v51 = vsel %vm354_vm4, %v3082_v34, 0.0 }
 0xc36   :  { %v1759_v59 = vsel %vm795_vm5, %v1753_v51, 0.0 }
 0xc37   :  { %3089 = vpow2.f32 %v1749_v57  ;;  %1760 = vadd.xlane.f32.xlu0 %v1759_v59 }
 0xc38   :  { %v3084_v31 = vpop.eup %3083 }
 0xc39   :  { %v1754_v53 = vsel %vm354_vm4, %v3084_v31, 0.0 }
 0xc3a   :  { %v1762_v1 = vsel %vm795_vm5, %v1754_v53, 0.0 }
 0xc3b   :  { %1766 = vadd.xlane.f32.xlu0 %v1765_v62  ;;  %1763 = vadd.xlane.f32.xlu1 %v1762_v1 }
 0xc3e   :  { %v3086_v56 = vpop.eup %3085 }
 0xc3f   :  { %v1758_v6 = vsel %vm354_vm4, %v3086_v56, 0.0 }
 0xc40   :  { %v3088_v3 = vpop.eup %3087  ;;  %v1774_v63 = vsel %vm795_vm5, %v1758_v6, 0.0 }
 0xc41   :  { %v1756_v58 = vsel %vm354_vm4, %v3088_v3, 0.0 }
 0xc42   :  { %v1768_v4 = vsel %vm795_vm5, %v1756_v58, 0.0 }
 0xc43   :  { %1769 = vadd.xlane.f32.xlu1 %v1768_v4 }
 0xc44   :  { %v3090_v7 = vpop.eup %3089 }
 0xc45   :  { %v1757_v8 = vsel %vm354_vm4, %v3090_v7, 0.0  ;;  %v2973_v7 = vld [vmem:[%s4115_s9 + $0x18] sm:$0xff]  }
 0xc46   :  { %v1771_v9 = vsel %vm795_vm5, %v1757_v8, 0.0 }
 0xc47   :  { %1775 = vadd.xlane.f32.xlu1 %v1774_v63  ;;  %1772 = vadd.xlane.f32.xlu0 %v1771_v9 }
 0xcc0   :  { %v1761_v12 = vpop.xlane.xlu0 %1760 }
 0xcc1   :  { %3091 = vrcp.f32 %v1761_v12 }
 0xcc4   :  { %v1767_v14 = vpop.xlane.xlu0 %1766  ;;  %v1764_v5 = vpop.xlane.xlu1 %1763 }
 0xcc5   :  { %3093 = vrcp.f32 %v1767_v14 }
 0xcc6   :  { %3095 = vrcp.f32 %v1764_v5 }
 0xccc   :  { %v1770_v16 = vpop.xlane.xlu1 %1769 }
 0xccd   :  { %3097 = vrcp.f32 %v1770_v16 }
 0xcce   :  { %v3092_v21 = vpop.eup %3091 }
 0xccf   :  { %v1783_v26 = vmul.f32 %v3092_v21, %v1753_v51 }
 0xcd0   :  { %v1776_v18 = vpop.xlane.xlu1 %1775  ;;  %v1773_v61 = vpop.xlane.xlu0 %1772 }
 0xcd1   :  { %3099 = vrcp.f32 %v1776_v18 }
 0xcd2   :  { %v3094_v30 = vpop.eup %3093  ;;  %3101 = vrcp.f32 %v1773_v61 }
 0xcd3   :  { %v3096_v22 = vpop.eup %3095  ;;  %v1785_v25 = vmul.f32 %v3094_v30, %v1755_v60 }
 0xcd4   :  { %v1784_v11 = vmul.f32 %v3096_v22, %v1754_v53 }
 0xcd5   :  { %v1790_v27 = vpack.c.bf16 %v1785_v25, %v1785_v25 }
 0xcd6   :  { %v1789_v13 = vpack.c.bf16 %v1784_v11, %v1783_v26 }
 0xcd8   :  { %2871 = vmatprep.mubr.msk.bf16.mxu1 %vm795_vm5, %v1789_v13 }
 0xcd9   :  { %2872 = vmatmul.mubr.msk.bf16.vlgmr.msra.gmra.mxu1 %vm795_vm5, %v1790_v27  ;;  %v4008_v27 = vld [vmem:[#allocation8 + $0x1] ss:$0 sm:$0xff] }
 0xcda   :  { %2887 = vmatprep.mubr.msk.bf16.mxu1 %vm3424_vm0, %v3423_v0  ;;  %v3098_v10 = vpop.eup %3097  ;;  %2884 = vmatpush3.bf16.msra.mxu1 %v2973_v7 }
 0xcdb   :  { %v1786_v35 = vmul.f32 %v3098_v10, %v1756_v58  ;;  %2885 = vmatprep.subr.bf16.mxu1 %v3423_v0 }
 0xcde   :  { %v3100_v2 = vpop.eup %3099 }
 0xcdf   :  { %v3102_v15 = vpop.eup %3101  ;;  %v1788_v33 = vmul.f32 %v3100_v2, %v1758_v6 }
 0xce0   :  { %v1787_v36 = vmul.f32 %v3102_v15, %v1757_v8  ;;  %v2974_v8 = vld [vmem:[%s4115_s9 + $0x10] sm:$0xff]  }
 0xce1   :  { %v1792_v38 = vpack.c.bf16 %v1788_v33, %v1788_v33  ;;  %2886 = vmatpush3.bf16.msra.mxu1 %v2974_v8  ;;  %v4011_v33 = vld [vmem:[#allocation10 + $0x1] ss:$0 sm:$0xff] }
 0xce2   :  { %v1791_v39 = vpack.c.bf16 %v1787_v36, %v1786_v35  ;;  %2919 = vmatprep.subr.bf16.mxu1 %v3423_v0 }
 0xce4   :  { %2879 = vmatprep.mubr.msk.bf16.mxu0 %vm795_vm5, %v1791_v39 }
 0xce5   :  { %2880 = vmatmul.mubr.msk.bf16.vlgmr.msra.gmra.mxu0 %vm795_vm5, %v1792_v38 }
 0xce6   :  { %2907 = vmatprep.mubr.msk.bf16.mxu0 %vm3424_vm0, %v3423_v0 }
 0xd99   :  { %v2873_v40 = vpop.f32.mrf.mxu1 }
 0xd9a   :  { %v1913_v45 = vadd.f32 %v2873_v40, %v3866_v17 }
 0xd9b   :  { %v1840_v42 = vpop.f32.mrf.mxu1 }
 0xd9c   :  { %v3979_v43 = vadd.f32 %v1840_v42, %v3856_v29  ;;  %v1927_v28 = vsel %vm357_vm2, %v1913_v45, 0.0 }
 0xd9d   :  { %v2874_v37 = vpop.f32.mrf.mxu1 }
 0xd9e   :  { %v1921_v32 = vsel %vm357_vm2, %v3979_v43, 0.0 }
 0xd9f   :  { %v1843_v47 = vpop.f32.mrf.mxu1  ;;  %1922 = vadd.xlane.f32.xlu0 %v1921_v32 }
 0xda0   :  { %v1912_v48 = vadd.f32 %v1843_v47, %v3861_v24 }
 0xda2   :  { %v1924_v41 = vsel %vm357_vm2, %v1912_v48, 0.0 }
 0xda3   :  { %1925 = vadd.xlane.f32.xlu1 %v1924_v41  ;;  %1928 = vadd.xlane.f32.xlu0 %v1927_v28  ;;  %v2975_v28 = vld [vmem:[%s4117_s11 + $0x38] sm:$0xff]  }
 0xda4   :  { %2900 = vmatpush3.bf16.msra.mxu0 %v2975_v28 }
 0xda5   :  { %v3987_v49 = vpop.f32.mrf.mxu0  ;;  %2901 = vmatprep.subr.bf16.mxu0 %v3423_v0 }
 0xda7   :  { %v1897_v29 = vpop.f32.mrf.mxu0 }
 0xda8   :  { %v3990_v50 = vadd.f32 %v1897_v29, %v3871_v23  ;;  %v2976_v29 = vld [vmem:[%s4117_s11 + $0x30] sm:$0xff]  }
 0xda9   :  { %v2882_v17 = vpop.f32.mrf.mxu0  ;;  %2902 = vmatpush3.bf16.msra.mxu0 %v2976_v29 }
 0xdaa   :  { %v1930_v52 = vsel %vm357_vm2, %v3990_v50, 0.0  ;;  %2903 = vmatprep.subr.bf16.mxu0 %v3423_v0  ;;  %v2977_v17 = vld [vmem:[%s4117_s11 + $0x28] sm:$0xff]  }
 0xdab   :  { %1931 = vadd.xlane.f32.xlu1 %v1930_v52  ;;  %v2978_v52 = vld [vmem:[%s4117_s11 + $0x20] sm:$0xff]  }
 0xdad   :  { %2904 = vmatpush3.bf16.msra.mxu0 %v2977_v17 }
 0xdae   :  { %2905 = vmatprep.subr.bf16.mxu0 %v3423_v0 }
 0xdb1   :  { %2906 = vmatpush3.bf16.msra.mxu0 %v2978_v52 }
 0xe28   :  { %v1923_v46 = vpop.xlane.xlu0 %1922 }
 0xe29   :  { %v1939_v54 = vmul.f32 0.03125, %v1923_v46  ;;  %v4041_v46 = vld [vmem:[#allocation11 + $0x1] ss:$0 sm:$0xff] }
 0xe2b   :  { %v1945_v24 = vsub.f32 %v3979_v43, %v1939_v54 }
 0xe2c   :  { %v1926_v44 = vpop.xlane.xlu1 %1925  ;;  %v1929_v34 = vpop.xlane.xlu0 %1928 }
 0xe2d   :  { %v1940_v55 = vmul.f32 0.03125, %v1926_v44  ;;  %v1941_v57 = vmul.f32 0.03125, %v1929_v34  ;;  %v1951_v51 = vmul.f32 %v1945_v24, %v1945_v24 }
 0xe2f   :  { %v1946_v59 = vsub.f32 %v1912_v48, %v1940_v55  ;;  %v1947_v60 = vsub.f32 %v1913_v45, %v1941_v57  ;;  %v1957_v31 = vsel %vm357_vm2, %v1951_v51, 0.0 }
 0xe30   :  { %1958 = vadd.xlane.f32.xlu0 %v1957_v31 }
 0xe31   :  { %v1952_v23 = vmul.f32 %v1946_v59, %v1946_v59  ;;  %v1953_v53 = vmul.f32 %v1947_v60, %v1947_v60 }
 0xe33   :  { %v1960_v62 = vsel %vm357_vm2, %v1952_v23, 0.0  ;;  %v1963_v1 = vsel %vm357_vm2, %v1953_v53, 0.0 }
 0xe34   :  { %1961 = vadd.xlane.f32.xlu1 %v1960_v62  ;;  %v1932_v56 = vpop.xlane.xlu1 %1931  ;;  %1964 = vadd.xlane.f32.xlu0 %v1963_v1 }
 0xe35   :  { %v1942_v3 = vmul.f32 0.03125, %v1932_v56 }
 0xe37   :  { %v1948_v58 = vsub.f32 %v3990_v50, %v1942_v3 }
 0xe39   :  { %v1954_v4 = vmul.f32 %v1948_v58, %v1948_v58 }
 0xe3b   :  { %v1966_v6 = vsel %vm357_vm2, %v1954_v4, 0.0 }
 0xe3c   :  { %1967 = vadd.xlane.f32.xlu1 %v1966_v6 }
 0xeb9   :  { %v1959_v63 = vpop.xlane.xlu0 %1958 }
 0xeba   :  { %v1975_v9 = vmul.f32 0.03125, %v1959_v63 }
 0xebc   :  { %v1981_v12 = vadd.f32 1e-05, %v1975_v9 }
 0xebd   :  { %v1962_v14 = vpop.xlane.xlu1 %1961  ;;  %v1965_v5 = vpop.xlane.xlu0 %1964 }
 0xebe   :  { %3103 = vrsqrt.f32 %v1981_v12  ;;  %v1976_v16 = vmul.f32 0.03125, %v1962_v14  ;;  %v1977_v18 = vmul.f32 0.03125, %v1965_v5 }
 0xec0   :  { %v1982_v61 = vadd.f32 1e-05, %v1976_v16  ;;  %v1983_v21 = vadd.f32 1e-05, %v1977_v18 }
 0xec2   :  { %3105 = vrsqrt.f32 %v1982_v61 }
 0xec3   :  { %3107 = vrsqrt.f32 %v1983_v21 }
 0xec5   :  { %v1968_v30 = vpop.xlane.xlu1 %1967 }
 0xec6   :  { %v1978_v22 = vmul.f32 0.03125, %v1968_v30 }
 0xec8   :  { %v1984_v25 = vadd.f32 1e-05, %v1978_v22 }
 0xeca   :  { %3109 = vrsqrt.f32 %v1984_v25 }
 0xecb   :  { %v3104_v26 = vpop.eup %3103 }
 0xecc   :  { %v1993_v11 = vmul.f32 %v3104_v26, %v1945_v24 }
 0xece   :  { %v2005_v2 = vmul.f32 %v4008_v27, %v1993_v11 }
 0xecf   :  { %v3106_v13 = vpop.eup %3105 }
 0xed0   :  { %v1994_v10 = vmul.f32 %v3106_v13, %v1946_v59  ;;  %v3108_v15 = vpop.eup %3107  ;;  %v2017_v36 = vadd.f32 %v4011_v33, %v2005_v2 }
 0xed1   :  { %v1995_v39 = vmul.f32 %v3108_v15, %v1947_v60 }
 0xed2   :  { %v2006_v35 = vmul.f32 %v4008_v27, %v1994_v10 }
 0xed3   :  { %v2007_v45 = vmul.f32 %v4008_v27, %v1995_v39 }
 0xed4   :  { %v2018_v38 = vadd.f32 %v4011_v33, %v2006_v35 }
 0xed5   :  { %v2019_v47 = vadd.f32 %v4011_v33, %v2007_v45 }
 0xed6   :  { %v2028_v40 = vpack.c.bf16 %v2018_v38, %v2017_v36 }
 0xed7   :  { %v3110_v42 = vpop.eup %3109 }
 0xed8   :  { %2888 = vmatmul.mubr.msk.bf16.vlgmr.msra.gmra.mxu1 %vm357_vm2, %v2028_v40  ;;  %v1996_v37 = vmul.f32 %v3110_v42, %v1948_v58 }
 0xed9   :  { %2891 = vmatprep.mubr.msk.bf16.mxu1 %vm3424_vm0, %v3423_v0 }
 0xeda   :  { %v2008_v32 = vmul.f32 %v4008_v27, %v1996_v37 }
 0xedc   :  { %v2020_v48 = vadd.f32 %v4011_v33, %v2008_v32 }
 0xede   :  { %v2029_v41 = vpack.c.bf16 %v2020_v48, %v2019_v47 }
 0xee0   :  { %2892 = vmatmul.mubr.msk.bf16.gmra.mxu1 %vm357_vm2, %v2029_v41  ;;  %v1900_v41 = vpop.f32.mrf.mxu0 }
 0xee1   :  { %2895 = vmatprep.mubr.msk.bf16.mxu1 %vm3424_vm0, %v3423_v0 }
 0xf98   :  { %v2094_v54 = vpop.f32.mrf.mxu1 }
 0xf99   :  { %v2095_v24 = vadd.f32 %v4041_v46, %v2094_v54 }
 0xf9a   :  { %v2889_v44 = vpop.f32.mrf.mxu1 }
 0xf9b   :  { %v2117_v34 = vmul.f32 %v2095_v24, %v2095_v24 }
 0xf9c   :  { %v2097_v55 = vpop.f32.mrf.mxu1 }
 0xf9d   :  { %v2123_v57 = vmul.f32 %v2117_v34, %v2095_v24  ;;  %v2098_v51 = vadd.f32 %v4041_v46, %v2097_v55 }
 0xf9e   :  { %v2890_v59 = vpop.f32.mrf.mxu1 }
 0xf9f   :  { %v2129_v60 = vmul.f32 0.044715, %v2123_v57  ;;  %v2118_v31 = vmul.f32 %v2098_v51, %v2098_v51 }
 0xfa0   :  { %v2102_v23 = vpop.f32.mrf.mxu1 }
 0xfa1   :  { %v2135_v53 = vadd.f32 %v2129_v60, %v2095_v24  ;;  %v2124_v62 = vmul.f32 %v2118_v31, %v2098_v51  ;;  %v2103_v1 = vadd.f32 %v4041_v46, %v2102_v23 }
 0xfa2   :  { %v2893_v56 = vpop.f32.mrf.mxu1 }
 0xfa3   :  { %v2141_v3 = vmul.f32 0.7978846, %v2135_v53  ;;  %v2130_v58 = vmul.f32 0.044715, %v2124_v62  ;;  %v2119_v4 = vmul.f32 %v2103_v1, %v2103_v1  ;;  %v1915_v53 = vadd.f32 %v1900_v41, %v3876_v19 }
 0xfa4   :  { %v2105_v6 = vpop.f32.mrf.mxu1  ;;  %v1916_v19 = vadd.f32 %v3987_v49, %v3881_v20  ;;  %v2640_v20 = vld [vmem:[#allocation14] ss:$0 sm:$0xff] }
 0xfa5   :  { %3111 = vtanh.f32 %v2141_v3  ;;  %v2136_v7 = vadd.f32 %v2130_v58, %v2098_v51  ;;  %v2125_v8 = vmul.f32 %v2119_v4, %v2103_v1  ;;  %v2106_v63 = vadd.f32 %v4041_v46, %v2105_v6 }
 0xfa6   :  { %v2894_v9 = vpop.f32.mrf.mxu1 }
 0xfa7   :  { %v2142_v12 = vmul.f32 0.7978846, %v2136_v7  ;;  %v2131_v14 = vmul.f32 0.044715, %v2125_v8  ;;  %v2120_v5 = vmul.f32 %v2106_v63, %v2106_v63 }
 0xfa9   :  { %3113 = vtanh.f32 %v2142_v12  ;;  %v2137_v16 = vadd.f32 %v2131_v14, %v2103_v1  ;;  %v2126_v18 = vmul.f32 %v2120_v5, %v2106_v63  ;;  %v1936_v5 = vsel %vm357_vm2, %v1916_v19, 0.0 }
 0xfab   :  { %v2143_v61 = vmul.f32 0.7978846, %v2137_v16  ;;  %v2132_v21 = vmul.f32 0.044715, %v2126_v18 }
 0xfad   :  { %3115 = vtanh.f32 %v2143_v61  ;;  %v2138_v30 = vadd.f32 %v2132_v21, %v2106_v63 }
 0xfaf   :  { %v2144_v22 = vmul.f32 0.7978846, %v2138_v30 }
 0xfb1   :  { %3117 = vtanh.f32 %v2144_v22 }
 0xfb2   :  { %v3112_v25 = vpop.eup %3111 }
 0xfb3   :  { %v2153_v26 = vadd.f32 1.0, %v3112_v25 }
 0xfb5   :  { %v2159_v13 = vmul.f32 0.5, %v2153_v26 }
 0xfb6   :  { %v3114_v11 = vpop.eup %3113 }
 0xfb7   :  { %v2154_v10 = vadd.f32 1.0, %v3114_v11  ;;  %v2165_v35 = vmul.f32 %v2159_v13, %v2095_v24  ;;  %v2632_v24 = vld [vmem:[#allocation13 + $0x1] ss:$0 sm:$0xff] }
 0xfb9   :  { %v2160_v2 = vmul.f32 0.5, %v2154_v10 }
 0xfba   :  { %v3116_v15 = vpop.eup %3115 }
 0xfbb   :  { %v2166_v36 = vmul.f32 %v2160_v2, %v2098_v51  ;;  %v2155_v38 = vadd.f32 1.0, %v3116_v15  ;;  %v2641_v15 = vld [vmem:[#allocation16] ss:$0 sm:$0xff] }
 0xfbd   :  { %v2180_v39 = vpack.c.bf16 %v2166_v36, %v2165_v35  ;;  %v2161_v42 = vmul.f32 0.5, %v2155_v38 }
 0xfbe   :  { %v3118_v40 = vpop.eup %3117 }
 0xfbf   :  { %v2156_v37 = vadd.f32 1.0, %v3118_v40  ;;  %2908 = vmatmul.mubr.msk.bf16.vlgmr.msra.gmra.mxu0 %vm276_vm1, %v2180_v39  ;;  %v2167_v32 = vmul.f32 %v2161_v42, %v2103_v1  ;;  %v1933_v1 = vsel %vm357_vm2, %v1915_v53, 0.0 }
 0xfc0   :  { %2911 = vmatprep.mubr.msk.bf16.mxu0 %vm3424_vm0, %v3423_v0 }
 0xfc1   :  { %v2162_v45 = vmul.f32 0.5, %v2156_v37 }
 0xfc3   :  { %v2168_v47 = vmul.f32 %v2162_v45, %v2106_v63 }
 0xfc5   :  { %v2181_v48 = vpack.c.bf16 %v2168_v47, %v2167_v32 }
 0xfc7   :  { %2912 = vmatmul.mubr.msk.bf16.gmra.mxu0 %vm276_vm1, %v2181_v48 }
 0xfc8   :  { %2915 = vmatprep.mubr.msk.bf16.mxu0 %vm3424_vm0, %v3423_v0 }
0x107f   :  { %v2258_v28 = vpop.f32.mrf.mxu0 }
0x1080   :  { %v2259_v55 = vadd.f32 %v2632_v24, %v2258_v28 }
0x1081   :  { %v2909_v29 = vpop.f32.mrf.mxu0 }
0x1082   :  { %v2277_v60 = vadd.f32 %v2259_v55, %v3979_v43 }
0x1083   :  { %v2261_v17 = vpop.f32.mrf.mxu0 }
0x1085   :  { %v2910_v52 = vpop.f32.mrf.mxu0 }
0x1087   :  { %v2265_v54 = vpop.f32.mrf.mxu0 }
0x1089   :  { %v2913_v44 = vpop.f32.mrf.mxu0 }
0x108b   :  { %v2267_v34 = vpop.f32.mrf.mxu0 }
0x108c   :  { %v2268_v57 = vadd.f32 %v2632_v24, %v2267_v34 }
0x108d   :  { %v2914_v51 = vpop.f32.mrf.mxu0 }
0x108e   :  { %v2278_v59 = vadd.f32 %v2268_v57, %v3990_v50 }
0x1090   :  { %v2283_v31 = vrot.slane %v2278_v59, 7 }
0x1092   :  { %v2285_v23 = vsel %vm2284_vm6, %v2283_v31, %v2277_v60 }
0x1093   :  { %v2288_v62 = vsel %vm2287_vm7, %v2285_v23, 0.0 }
0x1094   :  { %2289 = vadd.xlane.f32.xlu0 %v2288_v62 }
0x1098   :  { %1934 = vadd.xlane.f32.xlu0 %v1933_v1 }
0x111d   :  { %v2290_v56 = vpop.xlane.xlu0 %2289 }
0x111e   :  { %v2291_v3 = vmul.f32 0.03125, %v2290_v56 }
0x1120   :  { %v2293_v58 = vrot.slane %v2291_v3, 1  ;;  %v2296_v4 = vsub.f32 %v2277_v60, %v2291_v3 }
0x1121   :  { %v1935_v6 = vpop.xlane.xlu0 %1934 }
0x1122   :  { %v2297_v50 = vsub.f32 %v2278_v59, %v2293_v58  ;;  %v1943_v43 = vmul.f32 0.03125, %v1935_v6  ;;  %v2298_v8 = vmul.f32 %v2296_v4, %v2296_v4 }
0x1124   :  { %v2299_v7 = vmul.f32 %v2297_v50, %v2297_v50  ;;  %v1949_v12 = vsub.f32 %v1915_v53, %v1943_v43  ;;  %v2642_v43 = vld [vmem:[#allocation17] ss:$0 sm:$0xff] }
0x1126   :  { %v2302_v63 = vrot.slane %v2299_v7, 7  ;;  %v1955_v16 = vmul.f32 %v1949_v12, %v1949_v12 }
0x1128   :  { %v2303_v9 = vsel %vm2284_vm6, %v2302_v63, %v2298_v8  ;;  %v1969_v18 = vsel %vm357_vm2, %v1955_v16, 0.0 }
0x1129   :  { %v2305_v14 = vsel %vm2287_vm7, %v2303_v9, 0.0  ;;  %v2643_v9 = vld [vmem:[#allocation19] ss:$0 sm:$0xff] }
0x112a   :  { %2306 = vadd.xlane.f32.xlu1 %v2305_v14 }
0x112e   :  { %1937 = vadd.xlane.f32.xlu1 %v1936_v5 }
0x1132   :  { %1970 = vadd.xlane.f32.xlu1 %v1969_v18 }
0x11b3   :  { %v2307_v61 = vpop.xlane.xlu1 %2306 }
0x11b4   :  { %v2308_v21 = vmul.f32 0.03125, %v2307_v61 }
0x11b6   :  { %v2309_v30 = vadd.f32 1e-05, %v2308_v21 }
0x11b7   :  { %v1938_v25 = vpop.xlane.xlu1 %1937 }
0x11b8   :  { %3119 = vrsqrt.f32 %v2309_v30  ;;  %v1944_v13 = vmul.f32 0.03125, %v1938_v25 }
0x11ba   :  { %v1950_v36 = vsub.f32 %v1916_v19, %v1944_v13 }
0x11bb   :  { %v1971_v32 = vpop.xlane.xlu1 %1970 }
0x11bc   :  { %v1956_v37 = vmul.f32 %v1950_v36, %v1950_v36  ;;  %v1979_v47 = vmul.f32 0.03125, %v1971_v32 }
0x11be   :  { %v1972_v45 = vsel %vm357_vm2, %v1956_v37, 0.0  ;;  %v1985_v48 = vadd.f32 1e-05, %v1979_v47 }
0x11c0   :  { %3121 = vrsqrt.f32 %v1985_v48 }
0x11c5   :  { %v3120_v22 = vpop.eup %3119 }
0x11c6   :  { %v2312_v26 = vrot.slane %v3120_v22, 1  ;;  %v2315_v11 = vmul.f32 %v3120_v22, %v2296_v4  ;;  %v2979_v4 = vld [vmem:[%s4123_s17 + $0x8] sm:$0xff]  }
0x11c7   :  { %2920 = vmatpush3.bf16.msra.mxu1 %v2979_v4 }
0x11c8   :  { %v2316_v49 = vmul.f32 %v2312_v26, %v2297_v50  ;;  %v2323_v10 = vmul.f32 %v2640_v20, %v2315_v11  ;;  %v2980_v50 = vld [vmem:[%s4123_s17] sm:$0xff]   ;;  %2921 = vmatprep.subr.bf16.mxu1 %v3423_v0 }
0x11ca   :  { %v2324_v2 = vmul.f32 %v2640_v20, %v2316_v49  ;;  %v2331_v38 = vadd.f32 %v2641_v15, %v2323_v10 }
0x11cb   :  { %2922 = vmatpush3.bf16.msra.mxu1 %v2980_v50 }
0x11cc   :  { %v2332_v35 = vadd.f32 %v2641_v15, %v2324_v2  ;;  %2927 = vmatprep.subr.bf16.mxu1 %v3423_v0 }
0x11cd   :  { %v3122_v60 = vpop.eup %3121 }
0x11ce   :  { %v2337_v39 = vrot.slane %v2332_v35, 7  ;;  %v1997_v31 = vmul.f32 %v3122_v60, %v1949_v12 }
0x11d0   :  { %v2338_v40 = vsel %vm2284_vm6, %v2337_v39, %v2331_v38  ;;  %v2009_v62 = vmul.f32 %v4008_v27, %v1997_v31 }
0x11d1   :  { %v2340_v42 = vsel %vm2287_vm7, %v2338_v40, 0.0 }
0x11d2   :  { %2341 = vadd.xlane.f32.xlu0 %v2340_v42  ;;  %v2021_v56 = vadd.f32 %v4011_v33, %v2009_v62 }
0x11d6   :  { %1973 = vadd.xlane.f32.xlu0 %v1972_v45 }
0x125b   :  { %v2342_v41 = vpop.xlane.xlu0 %2341 }
0x125c   :  { %v2343_v28 = vmul.f32 0.03125, %v2342_v41 }
0x125e   :  { %v2345_v29 = vrot.slane %v2343_v28, 1  ;;  %v2348_v52 = vsub.f32 %v2331_v38, %v2343_v28 }
0x125f   :  { %v1974_v17 = vpop.xlane.xlu0 %1973 }
0x1260   :  { %v2349_v54 = vsub.f32 %v2332_v35, %v2345_v29  ;;  %v1980_v24 = vmul.f32 0.03125, %v1974_v17  ;;  %v2350_v55 = vmul.f32 %v2348_v52, %v2348_v52 }
0x1262   :  { %v1986_v44 = vadd.f32 1e-05, %v1980_v24  ;;  %v2351_v34 = vmul.f32 %v2349_v54, %v2349_v54  ;;  %v2981_v24 = vld [vmem:[%s4125_s19 + $0x8] sm:$0xff]  }
0x1264   :  { %3123 = vrsqrt.f32 %v1986_v44  ;;  %v2354_v57 = vrot.slane %v2351_v34, 7  ;;  %v2982_v44 = vld [vmem:[%s4125_s19] sm:$0xff]   ;;  %v2644_v34 = vld [vmem:[#allocation20] ss:$0 sm:$0xff]  ;;  %s3425_s19 = smov [#allocation22]  }
0x1265   :  { %s2535_s4 = sshll.u32 %s3425_s19, 4  ;;  %s2536_s4 = int_to_ptr.vmem [resolvable:$true] %s2535_s4 }
0x1266   :  { %v2355_v51 = vsel %vm2284_vm6, %v2354_v57, %v2350_v55  ;;  %s3373_s30 = scalar_lea.vmem %s2536_s4, 32  ;;  %p3378_p5 = scmp.lt.s32.totalorder %s2536_s4, %s2536_s4 }
0x1267   :  { %v2357_v59 = vsel %vm2287_vm7, %v2355_v51, 0.0  ;;  %p3374_p4 = scmp.ne.s32.totalorder %s2536_s4, %s3373_s30  ;;  %p3379_p6 = scmp.lt.s32.totalorder %s3373_s30, %s3373_s30 }
0x1268   :  { %2358 = vadd.xlane.f32.xlu1 %v2357_v59 }
0x1269   :  { %p3380_p7 = por %p3379_p6, %p3378_p5 }
0x126b   :  { %p3381_p8 = pnand %p3380_p7, %p3374_p4 }
0x1271   :  { %v3124_v23 = vpop.eup %3123 }
0x1272   :  { %v1998_v53 = vmul.f32 %v3124_v23, %v1950_v36 }
0x1274   :  { %v2010_v1 = vmul.f32 %v4008_v27, %v1998_v53 }
0x1276   :  { %v2022_v3 = vadd.f32 %v4011_v33, %v2010_v1 }
0x1278   :  { %v2030_v58 = vpack.c.bf16 %v2022_v3, %v2021_v56  ;;  %v2648_v56 = vld [vmem:[%s4126_s20] ss:$0 sm:$0xff] }
0x127a   :  { %2896 = vmatmul.mubr.msk.bf16.gmra.mxu1 %vm357_vm2, %v2030_v58 }
0x127b   :  { %2923 = vmatprep.mubr.msk.bf16.mxu1 %vm3424_vm0, %v3423_v0 }
0x12f1   :  { %v2359_v27 = vpop.xlane.xlu1 %2358 }
0x12f2   :  { %v2360_v33 = vmul.f32 0.03125, %v2359_v27 }
0x12f4   :  { %v2361_v6 = vadd.f32 1e-05, %v2360_v33 }
0x12f6   :  { %3125 = vrsqrt.f32 %v2361_v6 }
0x1303   :  { %v3126_v7 = vpop.eup %3125 }
0x1304   :  { %v2364_v8 = vrot.slane %v3126_v7, 1  ;;  %v2367_v63 = vmul.f32 %v3126_v7, %v2348_v52 }
0x1306   :  { %v2368_v19 = vmul.f32 %v2364_v8, %v2349_v54  ;;  %v2375_v12 = vmul.f32 %v2642_v43, %v2367_v63 }
0x1308   :  { %v2376_v14 = vmul.f32 %v2642_v43, %v2368_v19  ;;  %v2383_v5 = vadd.f32 %v2643_v9, %v2375_v12 }
0x130a   :  { %v2384_v16 = vadd.f32 %v2643_v9, %v2376_v14  ;;  %v2389_v18 = vpack.c.bf16 %v2383_v5, %v2383_v5 }
0x130c   :  { %v2390_v61 = vpack.c.bf16 %v2384_v16, %v2384_v16  ;;  %v2400_v30 = vunpack.c.l.b16 %v2389_v18 }
0x130e   :  { %v2401_v21 = vunpack.c.l.b16 %v2390_v61 }
0x1310   :  { %v2402_v22 = vrot.slane %v2401_v21, 7 }
0x1312   :  { %v2403_v25 = vsel %vm2284_vm6, %v2402_v22, %v2400_v30 }
0x1313   :  { %v2404_v26 = vpack.c.b16 %v2403_v25, %v2403_v25 }
0x1315   :  { %2924 = vmatmul.mubr.msk.bf16.vlgmr.msra.gmra.mxu1 %vm357_vm2, %v2404_v26 }
0x1316   :  { %2931 = vmatprep.mubr.msk.bf16.mxu1 %vm3424_vm0, %v3423_v0  ;;  %2928 = vmatpush3.bf16.msra.mxu1 %v2981_v24 }
0x1317   :  { %2929 = vmatprep.subr.bf16.mxu1 %v3423_v0 }
0x131a   :  { %2930 = vmatpush3.bf16.msra.mxu1 %v2982_v44 }
0x133a   :  { %v2110_v11 = vpop.f32.mrf.mxu1 }
0x133b   :  { %v2111_v20 = vadd.f32 %v4041_v46, %v2110_v11 }
0x133c   :  { %v2897_v49 = vpop.f32.mrf.mxu1 }
0x133d   :  { %v2121_v13 = vmul.f32 %v2111_v20, %v2111_v20 }
0x133e   :  { %v2113_v10 = vpop.f32.mrf.mxu1 }
0x133f   :  { %v2127_v2 = vmul.f32 %v2121_v13, %v2111_v20  ;;  %v2114_v15 = vadd.f32 %v4041_v46, %v2113_v10 }
0x1340   :  { %v2898_v35 = vpop.f32.mrf.mxu1 }
0x1341   :  { %v2133_v36 = vmul.f32 0.044715, %v2127_v2  ;;  %v2122_v38 = vmul.f32 %v2114_v15, %v2114_v15 }
0x1343   :  { %v2139_v39 = vadd.f32 %v2133_v36, %v2111_v20  ;;  %v2128_v40 = vmul.f32 %v2122_v38, %v2114_v15 }
0x1345   :  { %v2145_v42 = vmul.f32 0.7978846, %v2139_v39  ;;  %v2134_v37 = vmul.f32 0.044715, %v2128_v40 }
0x1347   :  { %3127 = vtanh.f32 %v2145_v42  ;;  %v2140_v45 = vadd.f32 %v2134_v37, %v2114_v15 }
0x1349   :  { %v2146_v32 = vmul.f32 0.7978846, %v2140_v45 }
0x134b   :  { %3129 = vtanh.f32 %v2146_v32 }
0x1354   :  { %v3128_v47 = vpop.eup %3127 }
0x1355   :  { %v2157_v48 = vadd.f32 1.0, %v3128_v47 }
0x1357   :  { %v2163_v28 = vmul.f32 0.5, %v2157_v48 }
0x1358   :  { %v3130_v41 = vpop.eup %3129 }
0x1359   :  { %v2158_v29 = vadd.f32 1.0, %v3130_v41  ;;  %v2169_v52 = vmul.f32 %v2163_v28, %v2111_v20 }
0x135b   :  { %v2164_v17 = vmul.f32 0.5, %v2158_v29 }
0x135d   :  { %v2170_v54 = vmul.f32 %v2164_v17, %v2114_v15 }
0x135f   :  { %v2182_v46 = vpack.c.bf16 %v2170_v54, %v2169_v52 }
0x1361   :  { %2916 = vmatmul.mubr.msk.bf16.gmra.mxu0 %vm276_vm1, %v2182_v46 }
0x13d5   :  { %v2454_v55 = vpop.f32.mrf.mxu1 }
0x13d6   :  { %v2455_v57 = vadd.f32 %v2644_v34, %v2454_v55 }
0x13d7   :  { %v2925_v51 = vpop.f32.mrf.mxu1 }
0x13d8   :  { %3131 = vtanh.f32 %v2455_v57 }
0x13d9   :  { %v2457_v59 = vpop.f32.mrf.mxu1 }
0x13db   :  { %v2926_v60 = vpop.f32.mrf.mxu1 }
0x13e5   :  { %v3132_v31 = vpop.eup %3131 }
0x13e6   :  { %v2465_v23 = vpack.c.bf16 %v3132_v31, %v3132_v31 }
0x13e8   :  { %2932 = vmatmul.mubr.msk.bf16.vlgmr.msra.gmra.mxu1 %vm357_vm2, %v2465_v23 }
0x1421   :  { %v2272_v53 = vpop.f32.mrf.mxu0 }
0x1423   :  { %v2917_v62 = vpop.f32.mrf.mxu0 }
0x1425   :  { %v2274_v1 = vpop.f32.mrf.mxu0 }
0x1427   :  { %v2918_v0 = vpop.f32.mrf.mxu0 }
0x14a8   :  { %v2522_v3 = vpop.f32.mrf.mxu1 }
0x14a9   :  { %v2523_v58 = vadd.f32 %v2648_v56, %v2522_v3 }
0x14aa   :  { %v2933_v4 = vpop.f32.mrf.mxu1 }
0x14ab   :  { %2528 = vst [vmem:[#allocation22] sm:$0x3] %v2523_v58 }
0x14ac   :  { %v2525_v50 = vpop.f32.mrf.mxu1 }
0x14ad   :  { %3384 = shalt.err (!%p3381_p8)
}
0x14ae   :  { %2538 = dma.vmem_to_hbm [thread:$0]  %s2536_s4, 32, %s4127_s21, [#allocation4]   ;;  %v2934_v27 = vpop.f32.mrf.mxu1 }
0x14af   :  { %3407 = dma.done.wait [#allocation4], 32  }
0x14b0   :  { %3408 = vsyncadd [#allocation4], 4294967264 }
0x14b1   :  { %2542 = vsyncpa [#allocation3], 1 }
0x14b2   :  { %2543 = vsyncpa [#allocation6], 1 }
0x14b3   :  { %2544 = vsyncpa [#allocation9], 1 }
0x14b4   :  { %2545 = vsyncpa [#allocation12], 1 }
0x14b5   :  { %2546 = vsyncpa [#allocation15], 1 }
0x14b6   :  { %2547 = vsyncpa [#allocation18], 1 }
0x14b7   :  { %2548 = vsyncpa [#allocation21], 1 }
0x14b8   :  { %2549 = vsyncpa [#allocation4], 1 }

</bundles_post_ra>
